<compile_context>
chip_gen: v7x
topology: tpu7x:2x2x1
jax: 0.10.0
libtpu: 0.0.40
codegen_flags: <defaults>
</compile_context>

<pallas_src>
import functools

import jax
import jax.numpy as jnp
from jax.experimental import pallas as pl
from jax.experimental.pallas import tpu as pltpu


# --------------------------------------------------------------------------
# Fused kernel: conv-as-matmul (+bias) -> Linear (+bias) -> LayerNorm
#
# Per grid step the kernel receives G independent (batch, patch-row) units.
# For each unit g:
#     P_g : [Wp, K]                       space-to-depth patches (K = C*p*p)
#     Y_g = P_g @ Wc + bc     [Wp, mid]   (Conv2d with kernel == stride)
#     Z_g = Wl @ Y_g + bl     [E,  mid]   (nn.Linear applied to the W axis)
#     out_g = LayerNorm_m(Z_g) * gamma + beta
# --------------------------------------------------------------------------
def _patch_embed_kernel(p_ref, wc_ref, bc_ref, wl_ref, bl_ref, g_ref, b_ref,
                        o_ref):
    group = p_ref.shape[0]
    # Weights / biases / LN params loaded once per grid step (hoisted out of the
    # per-unit loop); the (1, C) rows broadcast for free on the VPU.
    wc = wc_ref[...]            # [K,  mid]
    wl = wl_ref[...]            # [E,  Wp]
    bc = bc_ref[...]            # [1,  mid]  (f32)
    bl = bl_ref[...]            # [E,  1]    (f32)
    gamma = g_ref[...]          # [1,  mid]  (f32)
    beta = b_ref[...]           # [1,  mid]  (f32)

    for g in range(group):      # static unroll; group is small (<= 8)
        patches = p_ref[g]                                            # [Wp, K]
        # Stage 1: patch_partition (Conv2d as matmul), f32 accumulation on MXU.
        y = jnp.dot(patches, wc, preferred_element_type=jnp.float32) + bc
        # Stage 2: linearembed over the W/patch axis (second MXU matmul).
        z = jnp.dot(wl, y.astype(wl.dtype),
                    preferred_element_type=jnp.float32) + bl          # [E, mid]
        # Stage 3: LayerNorm over the mid axis (f32 stats, eps = 1e-5; rsqrt -> EUP).
        mean = jnp.mean(z, axis=-1, keepdims=True)
        var = jnp.mean(jnp.square(z - mean), axis=-1, keepdims=True)
        zn = (z - mean) * jax.lax.rsqrt(var + 1e-5)
        o_ref[g] = (zn * gamma + beta).astype(o_ref.dtype)


def _choose_group(m, bytes_per_unit, *, vmem_budget=8 << 20, max_group=8,
                  min_steps=2):
    """Largest divisor of m (<= max_group, fitting the double-buffer VMEM budget)
    that still leaves at least `min_steps` grid steps (v7x has 2 TensorCores)."""
    cap = max(1, min(max_group, vmem_budget // max(1, 2 * bytes_per_unit)))
    best = 1
    for g in range(1, cap + 1):
        if m % g == 0 and m // g >= min_steps:
            best = g
    return best


def _pad_like_module(x, p):
    """Literal F.pad(x, [0, p - W % p, 0, p - H % p, 0, 0]) when padding is needed
    (a dim already divisible by p still gets a full extra patch of zeros if the
    other one needs padding — exactly what the PyTorch module does)."""
    _, _, H, W = x.shape
    if H % p != 0 or W % p != 0:
        x = jnp.pad(x, ((0, 0), (0, 0), (0, p - H % p), (0, p - W % p)))
    return x


def patch_embed_forward(x, params, *, in_channel, patch_size, embed_dim,
                        mxu_dtype=jnp.float32):
    """Literal re-implementation of PatchEmbed.forward.  Returns (out, H, W)."""
    p = patch_size
    mid = in_channel * p * p

    B, C, H, W = x.shape
    if C != in_channel:
        raise ValueError(f"expected {in_channel} input channels, got {C}")
    x = _pad_like_module(x, p)
    _, _, Hpad, Wpad = x.shape
    Hp, Wp = Hpad // p, Wpad // p
    K = C * p * p
    E = embed_dim

    # Shape constraints implied by the module-as-written (explicit asserts).
    if Wp != mid:
        raise ValueError(f"PatchEmbed (as written) needs W_padded/patch == mid "
                         f"({Wp} != {mid})")
    if E != mid:
        raise ValueError(f"PatchEmbed (as written) needs embed_dim == mid "
                         f"({E} != {mid})")

    # --- space-to-depth: the single remaining XLA data-movement pass ---------
    # Patch feature order is (c, kh, kw), matching conv_w.reshape(mid, K).
    patches = (x.reshape(B, C, Hp, p, Wp, p)
                .transpose(0, 2, 4, 1, 3, 5)
                .reshape(B * Hp, Wp, K))
    # TODO(synk): fold this gather into the kernel (strided NCHW window reads via
    # index_map) to remove the last full-tensor XLA transpose.

    wc = params["conv_w"].reshape(mid, K).T                      # [K, mid]
    wl = params["lin_w"]                                         # [E, Wp] (Wp == mid)
    bc = params["conv_b"].reshape(1, mid).astype(jnp.float32)
    bl = params["lin_b"].reshape(E, 1).astype(jnp.float32)
    gamma = params["ln_g"].reshape(1, mid).astype(jnp.float32)
    beta = params["ln_b"].reshape(1, mid).astype(jnp.float32)

    if mxu_dtype != jnp.float32:                                 # bf16 MXU operands
        patches = patches.astype(mxu_dtype)                      # halves P HBM traffic
        wc = wc.astype(mxu_dtype)
        wl = wl.astype(mxu_dtype)

    M = B * Hp
    in_bytes = jnp.dtype(patches.dtype).itemsize
    out_bytes = jnp.dtype(x.dtype).itemsize
    bytes_per_unit = Wp * K * in_bytes + E * mid * out_bytes
    G = _choose_group(M, bytes_per_unit)
    grid = (M // G,)

    # Explicit scoped-VMEM limit with headroom: >= what we use (~2*G*bytes_per_unit
    # plus weights), <= v7x's 64 MiB physical, above v5e's 16 MiB default.
    vmem_limit = 32 * 1024 * 1024

    out = pl.pallas_call(
        _patch_embed_kernel,
        out_shape=jax.ShapeDtypeStruct((M, E, mid), x.dtype),
        grid=grid,
        in_specs=[
            pl.BlockSpec((G, Wp, K), lambda i: (i, 0, 0)),   # patches (pipelined)
            pl.BlockSpec((K, mid), lambda i: (0, 0)),        # conv weight
            pl.BlockSpec((1, mid), lambda i: (0, 0)),        # conv bias
            pl.BlockSpec((E, Wp), lambda i: (0, 0)),         # linear weight
            pl.BlockSpec((E, 1), lambda i: (0, 0)),          # linear bias
            pl.BlockSpec((1, mid), lambda i: (0, 0)),        # LN gamma
            pl.BlockSpec((1, mid), lambda i: (0, 0)),        # LN beta
        ],
        out_specs=pl.BlockSpec((G, E, mid), lambda i: (i, 0, 0)),
        compiler_params=pltpu.CompilerParams(
            dimension_semantics=("parallel",),
            vmem_limit_bytes=vmem_limit),
    )(patches, wc, bc, wl, bl, gamma, beta)

    # flatten(2).transpose(1, 2) is already realized by the kernel's output layout:
    # out rows are ordered (b, h, e), so this reshape is contiguous (no transpose).
    out = out.reshape(B, Hp * E, mid)
    return out, Hp, E


# ---------------------------- pure-JAX reference ----------------------------
def ref_forward(x, params, *, patch_size):
    p = patch_size
    hi = jax.lax.Precision.HIGHEST
    x = _pad_like_module(x, p)
    y = jax.lax.conv_general_dilated(
        x, params["conv_w"], window_strides=(p, p), padding="VALID",
        dimension_numbers=("NCHW", "OIHW", "NCHW"), precision=hi,
        preferred_element_type=jnp.float32)
    y = y + params["conv_b"][None, :, None, None]
    z = jnp.einsum("bmhw,ew->bmhe", y, params["lin_w"], precision=hi,
                   preferred_element_type=jnp.float32) + params["lin_b"]
    B, M_, Hh, Ww = z.shape
    t = z.reshape(B, M_, Hh * Ww).transpose(0, 2, 1)
    mean = t.mean(-1, keepdims=True)
    var = ((t - mean) ** 2).mean(-1, keepdims=True)
    out = (t - mean) / jnp.sqrt(var + 1e-5) * params["ln_g"] + params["ln_b"]
    return out, Hh, Ww


# --------------------------------- driver -----------------------------------
if __name__ == "__main__":
    # Config chosen so the (as-written) module is runnable AND lane-dense:
    #   mid = in_channel*p*p = 128, W_padded/p = 128 = mid, embed_dim = 128 = mid.
    in_channel, patch_size, embed_dim = 32, 2, 128
    mid = in_channel * patch_size * patch_size                   # 128

    key = jax.random.PRNGKey(0)
    kx, kcw, kcb, klw, klb = jax.random.split(key, 5)

    # H, W deliberately not multiples of patch_size to exercise the pad path:
    # [B=2, C=32, H=31, W=255] -> padded to [2, 32, 32, 256]; Hp=16, Wp=128.
    x = jax.random.normal(kx, (2, in_channel, 31, 255), dtype=jnp.float32)

    params = {
        "conv_w": 0.1 * jax.random.normal(
            kcw, (mid, in_channel, patch_size, patch_size), jnp.float32),
        "conv_b": 0.1 * jax.random.normal(kcb, (mid,), jnp.float32),
        "lin_w": 0.1 * jax.random.normal(klw, (embed_dim, mid), jnp.float32),
        "lin_b": 0.1 * jax.random.normal(klb, (embed_dim,), jnp.float32),
        "ln_g": jnp.ones((embed_dim,), jnp.float32),   # PyTorch LayerNorm init
        "ln_b": jnp.zeros((embed_dim,), jnp.float32),
    }

    ref_out, ref_h, ref_w = ref_forward(x, params, patch_size=patch_size)

    # f32 path (default): tighter tolerance than before.
    fwd = jax.jit(functools.partial(
        patch_embed_forward, in_channel=in_channel, patch_size=patch_size,
        embed_dim=embed_dim))
    out, H_out, W_out = fwd(x, params)
    out = jax.block_until_ready(out)
    H_out, W_out = int(H_out), int(W_out)
    assert out.shape == ref_out.shape == (2, 16 * 128, 128), out.shape
    assert (H_out, W_out) == (int(ref_h), int(ref_w)) == (16, 128)
    assert jnp.allclose(out, ref_out, atol=2e-3, rtol=2e-3), \
        "f32 kernel mismatch vs reference"

    # bf16 MXU-operand path (v6e/v7x perf feedback): same kernel, looser tolerance.
    fwd_bf16 = jax.jit(functools.partial(
        patch_embed_forward, in_channel=in_channel, patch_size=patch_size,
        embed_dim=embed_dim, mxu_dtype=jnp.bfloat16))
    out_bf16, _, _ = fwd_bf16(x, params)
    out_bf16 = jax.block_until_ready(out_bf16)
    assert jnp.allclose(out_bf16, ref_out, atol=1e-1, rtol=1e-1), \
        "bf16 kernel mismatch vs reference"

    print("KERNEL_OK")
</pallas_src>

<mosaic_0001>
module attributes {stable_mosaic.version = 11 : i64} {
  func.func @_patch_embed_kernel(%arg0: i32, %arg1: memref<8x128x128xf32, #tpu.memory_space<vmem>>, %arg2: memref<128x128xf32, #tpu.memory_space<vmem>>, %arg3: memref<1x128xf32, #tpu.memory_space<vmem>>, %arg4: memref<128x128xf32, #tpu.memory_space<vmem>>, %arg5: memref<128x1xf32, #tpu.memory_space<vmem>>, %arg6: memref<1x128xf32, #tpu.memory_space<vmem>>, %arg7: memref<1x128xf32, #tpu.memory_space<vmem>>, %arg8: memref<8x128x128xf32, #tpu.memory_space<vmem>>) attributes {dimension_semantics = [#tpu.dimension_semantics<parallel>], iteration_bounds = array<i64: 4>, scalar_prefetch = 0 : i64, scratch_operands = 0 : i64, tpu.core_type = #tpu.core_type<tc>, window_params = [{transform_indices = @transform_0, window_bounds = array<i64: 8, 128, 128>}, {pipeline_mode = #tpu.pipeline_mode<synchronous>, transform_indices = @transform_1, window_bounds = array<i64: 128, 128>}, {pipeline_mode = #tpu.pipeline_mode<synchronous>, transform_indices = @transform_2, window_bounds = array<i64: 1, 128>}, {pipeline_mode = #tpu.pipeline_mode<synchronous>, transform_indices = @transform_3, window_bounds = array<i64: 128, 128>}, {pipeline_mode = #tpu.pipeline_mode<synchronous>, transform_indices = @transform_4, window_bounds = array<i64: 128, 1>}, {pipeline_mode = #tpu.pipeline_mode<synchronous>, transform_indices = @transform_5, window_bounds = array<i64: 1, 128>}, {pipeline_mode = #tpu.pipeline_mode<synchronous>, transform_indices = @transform_6, window_bounds = array<i64: 1, 128>}, {transform_indices = @transform_7, window_bounds = array<i64: 8, 128, 128>}]} {
    %c0 = arith.constant 0 : index
    %c0_0 = arith.constant 0 : index
    %0 = vector.load %arg2[%c0, %c0_0] : memref<128x128xf32, #tpu.memory_space<vmem>>, vector<128x128xf32>
    %c0_1 = arith.constant 0 : index
    %c0_2 = arith.constant 0 : index
    %1 = vector.load %arg4[%c0_1, %c0_2] : memref<128x128xf32, #tpu.memory_space<vmem>>, vector<128x128xf32>
    %c0_3 = arith.constant 0 : index
    %c0_4 = arith.constant 0 : index
    %2 = vector.load %arg3[%c0_3, %c0_4] : memref<1x128xf32, #tpu.memory_space<vmem>>, vector<1x128xf32>
    %c0_5 = arith.constant 0 : index
    %c0_6 = arith.constant 0 : index
    %3 = vector.load %arg5[%c0_5, %c0_6] : memref<128x1xf32, #tpu.memory_space<vmem>>, vector<128x1xf32>
    %c0_7 = arith.constant 0 : index
    %c0_8 = arith.constant 0 : index
    %4 = vector.load %arg6[%c0_7, %c0_8] : memref<1x128xf32, #tpu.memory_space<vmem>>, vector<1x128xf32>
    %c0_9 = arith.constant 0 : index
    %c0_10 = arith.constant 0 : index
    %5 = vector.load %arg7[%c0_9, %c0_10] : memref<1x128xf32, #tpu.memory_space<vmem>>, vector<1x128xf32>
    %c0_11 = arith.constant 0 : index
    %c0_12 = arith.constant 0 : index
    %c0_13 = arith.constant 0 : index
    %6 = vector.load %arg1[%c0_11, %c0_12, %c0_13] : memref<8x128x128xf32, #tpu.memory_space<vmem>>, vector<1x128x128xf32>
    %7 = vector.shape_cast %6 : vector<1x128x128xf32> to vector<128x128xf32>
    %cst = arith.constant dense<0.000000e+00> : vector<128x128xf32>
    %8 = tpu.matmul %7, %0, %cst {dimension_numbers = #tpu.dot_dimension_numbers<[1], [0], [0], [1], [0, 0, 1, 1], [], []>} : vector<128x128xf32>, vector<128x128xf32>, vector<128x128xf32> -> vector<128x128xf32>
    %9 = vector.broadcast %2 : vector<1x128xf32> to vector<128x128xf32>
    %10 = arith.addf %8, %9 : vector<128x128xf32>
    %cst_14 = arith.constant dense<0.000000e+00> : vector<128x128xf32>
    %11 = tpu.matmul %1, %10, %cst_14 {dimension_numbers = #tpu.dot_dimension_numbers<[1], [0], [0], [1], [0, 0, 1, 1], [], []>} : vector<128x128xf32>, vector<128x128xf32>, vector<128x128xf32> -> vector<128x128xf32>
    %12 = vector.broadcast %3 : vector<128x1xf32> to vector<128x128xf32>
    %13 = arith.addf %11, %12 : vector<128x128xf32>
    %cst_15 = arith.constant dense<0.000000e+00> : vector<128xf32>
    %14 = vector.multi_reduction <add>, %13, %cst_15 [1] : vector<128x128xf32> to vector<128xf32>
    %15 = vector.shape_cast %14 : vector<128xf32> to vector<128x1xf32>
    %cst_16 = arith.constant 1.280000e+02 : f32
    %16 = vector.broadcast %cst_16 : f32 to vector<128x1xf32>
    %17 = arith.divf %15, %16 : vector<128x1xf32>
    %18 = vector.broadcast %17 : vector<128x1xf32> to vector<128x128xf32>
    %19 = arith.subf %13, %18 : vector<128x128xf32>
    %20 = arith.mulf %19, %19 : vector<128x128xf32>
    %cst_17 = arith.constant dense<0.000000e+00> : vector<128xf32>
    %21 = vector.multi_reduction <add>, %20, %cst_17 [1] : vector<128x128xf32> to vector<128xf32>
    %22 = vector.shape_cast %21 : vector<128xf32> to vector<128x1xf32>
    %cst_18 = arith.constant 1.280000e+02 : f32
    %23 = vector.broadcast %cst_18 : f32 to vector<128x1xf32>
    %24 = arith.divf %22, %23 : vector<128x1xf32>
    %25 = vector.broadcast %17 : vector<128x1xf32> to vector<128x128xf32>
    %26 = arith.subf %13, %25 : vector<128x128xf32>
    %cst_19 = arith.constant 9.99999974E-6 : f32
    %27 = vector.broadcast %cst_19 : f32 to vector<128x1xf32>
    %28 = arith.addf %24, %27 : vector<128x1xf32>
    %29 = math.rsqrt %28 : vector<128x1xf32>
    %30 = vector.broadcast %29 : vector<128x1xf32> to vector<128x128xf32>
    %31 = arith.mulf %26, %30 : vector<128x128xf32>
    %32 = vector.broadcast %4 : vector<1x128xf32> to vector<128x128xf32>
    %33 = arith.mulf %31, %32 : vector<128x128xf32>
    %34 = vector.broadcast %5 : vector<1x128xf32> to vector<128x128xf32>
    %35 = arith.addf %33, %34 : vector<128x128xf32>
    %c0_20 = arith.constant 0 : index
    %c0_21 = arith.constant 0 : index
    %c0_22 = arith.constant 0 : index
    %36 = vector.load %arg8[%c0_20, %c0_21, %c0_22] : memref<8x128x128xf32, #tpu.memory_space<vmem>>, vector<1x128x128xf32>
    %37 = vector.shape_cast %36 : vector<1x128x128xf32> to vector<128x128xf32>
    %38 = vector.shape_cast %35 : vector<128x128xf32> to vector<1x128x128xf32>
    tpu.vector_store %arg8[%c0_20, %c0_21, %c0_22], %38 {strides = array<i32>} : memref<8x128x128xf32, #tpu.memory_space<vmem>>, vector<1x128x128xf32>,
    %c1 = arith.constant 1 : index
    %c0_23 = arith.constant 0 : index
    %c0_24 = arith.constant 0 : index
    %39 = vector.load %arg1[%c1, %c0_23, %c0_24] : memref<8x128x128xf32, #tpu.memory_space<vmem>>, vector<1x128x128xf32>
    %40 = vector.shape_cast %39 : vector<1x128x128xf32> to vector<128x128xf32>
    %cst_25 = arith.constant dense<0.000000e+00> : vector<128x128xf32>
    %41 = tpu.matmul %40, %0, %cst_25 {dimension_numbers = #tpu.dot_dimension_numbers<[1], [0], [0], [1], [0, 0, 1, 1], [], []>} : vector<128x128xf32>, vector<128x128xf32>, vector<128x128xf32> -> vector<128x128xf32>
    %42 = vector.broadcast %2 : vector<1x128xf32> to vector<128x128xf32>
    %43 = arith.addf %41, %42 : vector<128x128xf32>
    %cst_26 = arith.constant dense<0.000000e+00> : vector<128x128xf32>
    %44 = tpu.matmul %1, %43, %cst_26 {dimension_numbers = #tpu.dot_dimension_numbers<[1], [0], [0], [1], [0, 0, 1, 1], [], []>} : vector<128x128xf32>, vector<128x128xf32>, vector<128x128xf32> -> vector<128x128xf32>
    %45 = vector.broadcast %3 : vector<128x1xf32> to vector<128x128xf32>
    %46 = arith.addf %44, %45 : vector<128x128xf32>
    %cst_27 = arith.constant dense<0.000000e+00> : vector<128xf32>
    %47 = vector.multi_reduction <add>, %46, %cst_27 [1] : vector<128x128xf32> to vector<128xf32>
    %48 = vector.shape_cast %47 : vector<128xf32> to vector<128x1xf32>
    %cst_28 = arith.constant 1.280000e+02 : f32
    %49 = vector.broadcast %cst_28 : f32 to vector<128x1xf32>
    %50 = arith.divf %48, %49 : vector<128x1xf32>
    %51 = vector.broadcast %50 : vector<128x1xf32> to vector<128x128xf32>
    %52 = arith.subf %46, %51 : vector<128x128xf32>
    %53 = arith.mulf %52, %52 : vector<128x128xf32>
    %cst_29 = arith.constant dense<0.000000e+00> : vector<128xf32>
    %54 = vector.multi_reduction <add>, %53, %cst_29 [1] : vector<128x128xf32> to vector<128xf32>
    %55 = vector.shape_cast %54 : vector<128xf32> to vector<128x1xf32>
    %cst_30 = arith.constant 1.280000e+02 : f32
    %56 = vector.broadcast %cst_30 : f32 to vector<128x1xf32>
    %57 = arith.divf %55, %56 : vector<128x1xf32>
    %58 = vector.broadcast %50 : vector<128x1xf32> to vector<128x128xf32>
    %59 = arith.subf %46, %58 : vector<128x128xf32>
    %cst_31 = arith.constant 9.99999974E-6 : f32
    %60 = vector.broadcast %cst_31 : f32 to vector<128x1xf32>
    %61 = arith.addf %57, %60 : vector<128x1xf32>
    %62 = math.rsqrt %61 : vector<128x1xf32>
    %63 = vector.broadcast %62 : vector<128x1xf32> to vector<128x128xf32>
    %64 = arith.mulf %59, %63 : vector<128x128xf32>
    %65 = vector.broadcast %4 : vector<1x128xf32> to vector<128x128xf32>
    %66 = arith.mulf %64, %65 : vector<128x128xf32>
    %67 = vector.broadcast %5 : vector<1x128xf32> to vector<128x128xf32>
    %68 = arith.addf %66, %67 : vector<128x128xf32>
    %c1_32 = arith.constant 1 : index
    %c0_33 = arith.constant 0 : index
    %c0_34 = arith.constant 0 : index
    %69 = vector.load %arg8[%c1_32, %c0_33, %c0_34] : memref<8x128x128xf32, #tpu.memory_space<vmem>>, vector<1x128x128xf32>
    %70 = vector.shape_cast %69 : vector<1x128x128xf32> to vector<128x128xf32>
    %71 = vector.shape_cast %68 : vector<128x128xf32> to vector<1x128x128xf32>
    tpu.vector_store %arg8[%c1_32, %c0_33, %c0_34], %71 {strides = array<i32>} : memref<8x128x128xf32, #tpu.memory_space<vmem>>, vector<1x128x128xf32>,
    %c2 = arith.constant 2 : index
    %c0_35 = arith.constant 0 : index
    %c0_36 = arith.constant 0 : index
    %72 = vector.load %arg1[%c2, %c0_35, %c0_36] : memref<8x128x128xf32, #tpu.memory_space<vmem>>, vector<1x128x128xf32>
    %73 = vector.shape_cast %72 : vector<1x128x128xf32> to vector<128x128xf32>
    %cst_37 = arith.constant dense<0.000000e+00> : vector<128x128xf32>
    %74 = tpu.matmul %73, %0, %cst_37 {dimension_numbers = #tpu.dot_dimension_numbers<[1], [0], [0], [1], [0, 0, 1, 1], [], []>} : vector<128x128xf32>, vector<128x128xf32>, vector<128x128xf32> -> vector<128x128xf32>
    %75 = vector.broadcast %2 : vector<1x128xf32> to vector<128x128xf32>
    %76 = arith.addf %74, %75 : vector<128x128xf32>
    %cst_38 = arith.constant dense<0.000000e+00> : vector<128x128xf32>
    %77 = tpu.matmul %1, %76, %cst_38 {dimension_numbers = #tpu.dot_dimension_numbers<[1], [0], [0], [1], [0, 0, 1, 1], [], []>} : vector<128x128xf32>, vector<128x128xf32>, vector<128x128xf32> -> vector<128x128xf32>
    %78 = vector.broadcast %3 : vector<128x1xf32> to vector<128x128xf32>
    %79 = arith.addf %77, %78 : vector<128x128xf32>
    %cst_39 = arith.constant dense<0.000000e+00> : vector<128xf32>
    %80 = vector.multi_reduction <add>, %79, %cst_39 [1] : vector<128x128xf32> to vector<128xf32>
    %81 = vector.shape_cast %80 : vector<128xf32> to vector<128x1xf32>
    %cst_40 = arith.constant 1.280000e+02 : f32
    %82 = vector.broadcast %cst_40 : f32 to vector<128x1xf32>
    %83 = arith.divf %81, %82 : vector<128x1xf32>
    %84 = vector.broadcast %83 : vector<128x1xf32> to vector<128x128xf32>
    %85 = arith.subf %79, %84 : vector<128x128xf32>
    %86 = arith.mulf %85, %85 : vector<128x128xf32>
    %cst_41 = arith.constant dense<0.000000e+00> : vector<128xf32>
    %87 = vector.multi_reduction <add>, %86, %cst_41 [1] : vector<128x128xf32> to vector<128xf32>
    %88 = vector.shape_cast %87 : vector<128xf32> to vector<128x1xf32>
    %cst_42 = arith.constant 1.280000e+02 : f32
    %89 = vector.broadcast %cst_42 : f32 to vector<128x1xf32>
    %90 = arith.divf %88, %89 : vector<128x1xf32>
    %91 = vector.broadcast %83 : vector<128x1xf32> to vector<128x128xf32>
    %92 = arith.subf %79, %91 : vector<128x128xf32>
    %cst_43 = arith.constant 9.99999974E-6 : f32
    %93 = vector.broadcast %cst_43 : f32 to vector<128x1xf32>
    %94 = arith.addf %90, %93 : vector<128x1xf32>
    %95 = math.rsqrt %94 : vector<128x1xf32>
    %96 = vector.broadcast %95 : vector<128x1xf32> to vector<128x128xf32>
    %97 = arith.mulf %92, %96 : vector<128x128xf32>
    %98 = vector.broadcast %4 : vector<1x128xf32> to vector<128x128xf32>
    %99 = arith.mulf %97, %98 : vector<128x128xf32>
    %100 = vector.broadcast %5 : vector<1x128xf32> to vector<128x128xf32>
    %101 = arith.addf %99, %100 : vector<128x128xf32>
    %c2_44 = arith.constant 2 : index
    %c0_45 = arith.constant 0 : index
    %c0_46 = arith.constant 0 : index
    %102 = vector.load %arg8[%c2_44, %c0_45, %c0_46] : memref<8x128x128xf32, #tpu.memory_space<vmem>>, vector<1x128x128xf32>
    %103 = vector.shape_cast %102 : vector<1x128x128xf32> to vector<128x128xf32>
    %104 = vector.shape_cast %101 : vector<128x128xf32> to vector<1x128x128xf32>
    tpu.vector_store %arg8[%c2_44, %c0_45, %c0_46], %104 {strides = array<i32>} : memref<8x128x128xf32, #tpu.memory_space<vmem>>, vector<1x128x128xf32>,
    %c3 = arith.constant 3 : index
    %c0_47 = arith.constant 0 : index
    %c0_48 = arith.constant 0 : index
    %105 = vector.load %arg1[%c3, %c0_47, %c0_48] : memref<8x128x128xf32, #tpu.memory_space<vmem>>, vector<1x128x128xf32>
    %106 = vector.shape_cast %105 : vector<1x128x128xf32> to vector<128x128xf32>
    %cst_49 = arith.constant dense<0.000000e+00> : vector<128x128xf32>
    %107 = tpu.matmul %106, %0, %cst_49 {dimension_numbers = #tpu.dot_dimension_numbers<[1], [0], [0], [1], [0, 0, 1, 1], [], []>} : vector<128x128xf32>, vector<128x128xf32>, vector<128x128xf32> -> vector<128x128xf32>
    %108 = vector.broadcast %2 : vector<1x128xf32> to vector<128x128xf32>
    %109 = arith.addf %107, %108 : vector<128x128xf32>
    %cst_50 = arith.constant dense<0.000000e+00> : vector<128x128xf32>
    %110 = tpu.matmul %1, %109, %cst_50 {dimension_numbers = #tpu.dot_dimension_numbers<[1], [0], [0], [1], [0, 0, 1, 1], [], []>} : vector<128x128xf32>, vector<128x128xf32>, vector<128x128xf32> -> vector<128x128xf32>
    %111 = vector.broadcast %3 : vector<128x1xf32> to vector<128x128xf32>
    %112 = arith.addf %110, %111 : vector<128x128xf32>
    %cst_51 = arith.constant dense<0.000000e+00> : vector<128xf32>
    %113 = vector.multi_reduction <add>, %112, %cst_51 [1] : vector<128x128xf32> to vector<128xf32>
    %114 = vector.shape_cast %113 : vector<128xf32> to vector<128x1xf32>
    %cst_52 = arith.constant 1.280000e+02 : f32
    %115 = vector.broadcast %cst_52 : f32 to vector<128x1xf32>
    %116 = arith.divf %114, %115 : vector<128x1xf32>
    %117 = vector.broadcast %116 : vector<128x1xf32> to vector<128x128xf32>
    %118 = arith.subf %112, %117 : vector<128x128xf32>
    %119 = arith.mulf %118, %118 : vector<128x128xf32>
    %cst_53 = arith.constant dense<0.000000e+00> : vector<128xf32>
    %120 = vector.multi_reduction <add>, %119, %cst_53 [1] : vector<128x128xf32> to vector<128xf32>
    %121 = vector.shape_cast %120 : vector<128xf32> to vector<128x1xf32>
    %cst_54 = arith.constant 1.280000e+02 : f32
    %122 = vector.broadcast %cst_54 : f32 to vector<128x1xf32>
    %123 = arith.divf %121, %122 : vector<128x1xf32>
    %124 = vector.broadcast %116 : vector<128x1xf32> to vector<128x128xf32>
    %125 = arith.subf %112, %124 : vector<128x128xf32>
    %cst_55 = arith.constant 9.99999974E-6 : f32
    %126 = vector.broadcast %cst_55 : f32 to vector<128x1xf32>
    %127 = arith.addf %123, %126 : vector<128x1xf32>
    %128 = math.rsqrt %127 : vector<128x1xf32>
    %129 = vector.broadcast %128 : vector<128x1xf32> to vector<128x128xf32>
    %130 = arith.mulf %125, %129 : vector<128x128xf32>
    %131 = vector.broadcast %4 : vector<1x128xf32> to vector<128x128xf32>
    %132 = arith.mulf %130, %131 : vector<128x128xf32>
    %133 = vector.broadcast %5 : vector<1x128xf32> to vector<128x128xf32>
    %134 = arith.addf %132, %133 : vector<128x128xf32>
    %c3_56 = arith.constant 3 : index
    %c0_57 = arith.constant 0 : index
    %c0_58 = arith.constant 0 : index
    %135 = vector.load %arg8[%c3_56, %c0_57, %c0_58] : memref<8x128x128xf32, #tpu.memory_space<vmem>>, vector<1x128x128xf32>
    %136 = vector.shape_cast %135 : vector<1x128x128xf32> to vector<128x128xf32>
    %137 = vector.shape_cast %134 : vector<128x128xf32> to vector<1x128x128xf32>
    tpu.vector_store %arg8[%c3_56, %c0_57, %c0_58], %137 {strides = array<i32>} : memref<8x128x128xf32, #tpu.memory_space<vmem>>, vector<1x128x128xf32>,
    %c4 = arith.constant 4 : index
    %c0_59 = arith.constant 0 : index
    %c0_60 = arith.constant 0 : index
    %138 = vector.load %arg1[%c4, %c0_59, %c0_60] : memref<8x128x128xf32, #tpu.memory_space<vmem>>, vector<1x128x128xf32>
    %139 = vector.shape_cast %138 : vector<1x128x128xf32> to vector<128x128xf32>
    %cst_61 = arith.constant dense<0.000000e+00> : vector<128x128xf32>
    %140 = tpu.matmul %139, %0, %cst_61 {dimension_numbers = #tpu.dot_dimension_numbers<[1], [0], [0], [1], [0, 0, 1, 1], [], []>} : vector<128x128xf32>, vector<128x128xf32>, vector<128x128xf32> -> vector<128x128xf32>
    %141 = vector.broadcast %2 : vector<1x128xf32> to vector<128x128xf32>
    %142 = arith.addf %140, %141 : vector<128x128xf32>
    %cst_62 = arith.constant dense<0.000000e+00> : vector<128x128xf32>
    %143 = tpu.matmul %1, %142, %cst_62 {dimension_numbers = #tpu.dot_dimension_numbers<[1], [0], [0], [1], [0, 0, 1, 1], [], []>} : vector<128x128xf32>, vector<128x128xf32>, vector<128x128xf32> -> vector<128x128xf32>
    %144 = vector.broadcast %3 : vector<128x1xf32> to vector<128x128xf32>
    %145 = arith.addf %143, %144 : vector<128x128xf32>
    %cst_63 = arith.constant dense<0.000000e+00> : vector<128xf32>
    %146 = vector.multi_reduction <add>, %145, %cst_63 [1] : vector<128x128xf32> to vector<128xf32>
    %147 = vector.shape_cast %146 : vector<128xf32> to vector<128x1xf32>
    %cst_64 = arith.constant 1.280000e+02 : f32
    %148 = vector.broadcast %cst_64 : f32 to vector<128x1xf32>
    %149 = arith.divf %147, %148 : vector<128x1xf32>
    %150 = vector.broadcast %149 : vector<128x1xf32> to vector<128x128xf32>
    %151 = arith.subf %145, %150 : vector<128x128xf32>
    %152 = arith.mulf %151, %151 : vector<128x128xf32>
    %cst_65 = arith.constant dense<0.000000e+00> : vector<128xf32>
    %153 = vector.multi_reduction <add>, %152, %cst_65 [1] : vector<128x128xf32> to vector<128xf32>
    %154 = vector.shape_cast %153 : vector<128xf32> to vector<128x1xf32>
    %cst_66 = arith.constant 1.280000e+02 : f32
    %155 = vector.broadcast %cst_66 : f32 to vector<128x1xf32>
    %156 = arith.divf %154, %155 : vector<128x1xf32>
    %157 = vector.broadcast %149 : vector<128x1xf32> to vector<128x128xf32>
    %158 = arith.subf %145, %157 : vector<128x128xf32>
    %cst_67 = arith.constant 9.99999974E-6 : f32
    %159 = vector.broadcast %cst_67 : f32 to vector<128x1xf32>
    %160 = arith.addf %156, %159 : vector<128x1xf32>
    %161 = math.rsqrt %160 : vector<128x1xf32>
    %162 = vector.broadcast %161 : vector<128x1xf32> to vector<128x128xf32>
    %163 = arith.mulf %158, %162 : vector<128x128xf32>
    %164 = vector.broadcast %4 : vector<1x128xf32> to vector<128x128xf32>
    %165 = arith.mulf %163, %164 : vector<128x128xf32>
    %166 = vector.broadcast %5 : vector<1x128xf32> to vector<128x128xf32>
    %167 = arith.addf %165, %166 : vector<128x128xf32>
    %c4_68 = arith.constant 4 : index
    %c0_69 = arith.constant 0 : index
    %c0_70 = arith.constant 0 : index
    %168 = vector.load %arg8[%c4_68, %c0_69, %c0_70] : memref<8x128x128xf32, #tpu.memory_space<vmem>>, vector<1x128x128xf32>
    %169 = vector.shape_cast %168 : vector<1x128x128xf32> to vector<128x128xf32>
    %170 = vector.shape_cast %167 : vector<128x128xf32> to vector<1x128x128xf32>
    tpu.vector_store %arg8[%c4_68, %c0_69, %c0_70], %170 {strides = array<i32>} : memref<8x128x128xf32, #tpu.memory_space<vmem>>, vector<1x128x128xf32>,
    %c5 = arith.constant 5 : index
    %c0_71 = arith.constant 0 : index
    %c0_72 = arith.constant 0 : index
    %171 = vector.load %arg1[%c5, %c0_71, %c0_72] : memref<8x128x128xf32, #tpu.memory_space<vmem>>, vector<1x128x128xf32>
    %172 = vector.shape_cast %171 : vector<1x128x128xf32> to vector<128x128xf32>
    %cst_73 = arith.constant dense<0.000000e+00> : vector<128x128xf32>
    %173 = tpu.matmul %172, %0, %cst_73 {dimension_numbers = #tpu.dot_dimension_numbers<[1], [0], [0], [1], [0, 0, 1, 1], [], []>} : vector<128x128xf32>, vector<128x128xf32>, vector<128x128xf32> -> vector<128x128xf32>
    %174 = vector.broadcast %2 : vector<1x128xf32> to vector<128x128xf32>
    %175 = arith.addf %173, %174 : vector<128x128xf32>
    %cst_74 = arith.constant dense<0.000000e+00> : vector<128x128xf32>
    %176 = tpu.matmul %1, %175, %cst_74 {dimension_numbers = #tpu.dot_dimension_numbers<[1], [0], [0], [1], [0, 0, 1, 1], [], []>} : vector<128x128xf32>, vector<128x128xf32>, vector<128x128xf32> -> vector<128x128xf32>
    %177 = vector.broadcast %3 : vector<128x1xf32> to vector<128x128xf32>
    %178 = arith.addf %176, %177 : vector<128x128xf32>
    %cst_75 = arith.constant dense<0.000000e+00> : vector<128xf32>
    %179 = vector.multi_reduction <add>, %178, %cst_75 [1] : vector<128x128xf32> to vector<128xf32>
    %180 = vector.shape_cast %179 : vector<128xf32> to vector<128x1xf32>
    %cst_76 = arith.constant 1.280000e+02 : f32
    %181 = vector.broadcast %cst_76 : f32 to vector<128x1xf32>
    %182 = arith.divf %180, %181 : vector<128x1xf32>
    %183 = vector.broadcast %182 : vector<128x1xf32> to vector<128x128xf32>
    %184 = arith.subf %178, %183 : vector<128x128xf32>
    %185 = arith.mulf %184, %184 : vector<128x128xf32>
    %cst_77 = arith.constant dense<0.000000e+00> : vector<128xf32>
    %186 = vector.multi_reduction <add>, %185, %cst_77 [1] : vector<128x128xf32> to vector<128xf32>
    %187 = vector.shape_cast %186 : vector<128xf32> to vector<128x1xf32>
    %cst_78 = arith.constant 1.280000e+02 : f32
    %188 = vector.broadcast %cst_78 : f32 to vector<128x1xf32>
    %189 = arith.divf %187, %188 : vector<128x1xf32>
    %190 = vector.broadcast %182 : vector<128x1xf32> to vector<128x128xf32>
    %191 = arith.subf %178, %190 : vector<128x128xf32>
    %cst_79 = arith.constant 9.99999974E-6 : f32
    %192 = vector.broadcast %cst_79 : f32 to vector<128x1xf32>
    %193 = arith.addf %189, %192 : vector<128x1xf32>
    %194 = math.rsqrt %193 : vector<128x1xf32>
    %195 = vector.broadcast %194 : vector<128x1xf32> to vector<128x128xf32>
    %196 = arith.mulf %191, %195 : vector<128x128xf32>
    %197 = vector.broadcast %4 : vector<1x128xf32> to vector<128x128xf32>
    %198 = arith.mulf %196, %197 : vector<128x128xf32>
    %199 = vector.broadcast %5 : vector<1x128xf32> to vector<128x128xf32>
    %200 = arith.addf %198, %199 : vector<128x128xf32>
    %c5_80 = arith.constant 5 : index
    %c0_81 = arith.constant 0 : index
    %c0_82 = arith.constant 0 : index
    %201 = vector.load %arg8[%c5_80, %c0_81, %c0_82] : memref<8x128x128xf32, #tpu.memory_space<vmem>>, vector<1x128x128xf32>
    %202 = vector.shape_cast %201 : vector<1x128x128xf32> to vector<128x128xf32>
    %203 = vector.shape_cast %200 : vector<128x128xf32> to vector<1x128x128xf32>
    tpu.vector_store %arg8[%c5_80, %c0_81, %c0_82], %203 {strides = array<i32>} : memref<8x128x128xf32, #tpu.memory_space<vmem>>, vector<1x128x128xf32>,
    %c6 = arith.constant 6 : index
    %c0_83 = arith.constant 0 : index
    %c0_84 = arith.constant 0 : index
    %204 = vector.load %arg1[%c6, %c0_83, %c0_84] : memref<8x128x128xf32, #tpu.memory_space<vmem>>, vector<1x128x128xf32>
    %205 = vector.shape_cast %204 : vector<1x128x128xf32> to vector<128x128xf32>
    %cst_85 = arith.constant dense<0.000000e+00> : vector<128x128xf32>
    %206 = tpu.matmul %205, %0, %cst_85 {dimension_numbers = #tpu.dot_dimension_numbers<[1], [0], [0], [1], [0, 0, 1, 1], [], []>} : vector<128x128xf32>, vector<128x128xf32>, vector<128x128xf32> -> vector<128x128xf32>
    %207 = vector.broadcast %2 : vector<1x128xf32> to vector<128x128xf32>
    %208 = arith.addf %206, %207 : vector<128x128xf32>
    %cst_86 = arith.constant dense<0.000000e+00> : vector<128x128xf32>
    %209 = tpu.matmul %1, %208, %cst_86 {dimension_numbers = #tpu.dot_dimension_numbers<[1], [0], [0], [1], [0, 0, 1, 1], [], []>} : vector<128x128xf32>, vector<128x128xf32>, vector<128x128xf32> -> vector<128x128xf32>
    %210 = vector.broadcast %3 : vector<128x1xf32> to vector<128x128xf32>
    %211 = arith.addf %209, %210 : vector<128x128xf32>
    %cst_87 = arith.constant dense<0.000000e+00> : vector<128xf32>
    %212 = vector.multi_reduction <add>, %211, %cst_87 [1] : vector<128x128xf32> to vector<128xf32>
    %213 = vector.shape_cast %212 : vector<128xf32> to vector<128x1xf32>
    %cst_88 = arith.constant 1.280000e+02 : f32
    %214 = vector.broadcast %cst_88 : f32 to vector<128x1xf32>
    %215 = arith.divf %213, %214 : vector<128x1xf32>
    %216 = vector.broadcast %215 : vector<128x1xf32> to vector<128x128xf32>
    %217 = arith.subf %211, %216 : vector<128x128xf32>
    %218 = arith.mulf %217, %217 : vector<128x128xf32>
    %cst_89 = arith.constant dense<0.000000e+00> : vector<128xf32>
    %219 = vector.multi_reduction <add>, %218, %cst_89 [1] : vector<128x128xf32> to vector<128xf32>
    %220 = vector.shape_cast %219 : vector<128xf32> to vector<128x1xf32>
    %cst_90 = arith.constant 1.280000e+02 : f32
    %221 = vector.broadcast %cst_90 : f32 to vector<128x1xf32>
    %222 = arith.divf %220, %221 : vector<128x1xf32>
    %223 = vector.broadcast %215 : vector<128x1xf32> to vector<128x128xf32>
    %224 = arith.subf %211, %223 : vector<128x128xf32>
    %cst_91 = arith.constant 9.99999974E-6 : f32
    %225 = vector.broadcast %cst_91 : f32 to vector<128x1xf32>
    %226 = arith.addf %222, %225 : vector<128x1xf32>
    %227 = math.rsqrt %226 : vector<128x1xf32>
    %228 = vector.broadcast %227 : vector<128x1xf32> to vector<128x128xf32>
    %229 = arith.mulf %224, %228 : vector<128x128xf32>
    %230 = vector.broadcast %4 : vector<1x128xf32> to vector<128x128xf32>
    %231 = arith.mulf %229, %230 : vector<128x128xf32>
    %232 = vector.broadcast %5 : vector<1x128xf32> to vector<128x128xf32>
    %233 = arith.addf %231, %232 : vector<128x128xf32>
    %c6_92 = arith.constant 6 : index
    %c0_93 = arith.constant 0 : index
    %c0_94 = arith.constant 0 : index
    %234 = vector.load %arg8[%c6_92, %c0_93, %c0_94] : memref<8x128x128xf32, #tpu.memory_space<vmem>>, vector<1x128x128xf32>
    %235 = vector.shape_cast %234 : vector<1x128x128xf32> to vector<128x128xf32>
    %236 = vector.shape_cast %233 : vector<128x128xf32> to vector<1x128x128xf32>
    tpu.vector_store %arg8[%c6_92, %c0_93, %c0_94], %236 {strides = array<i32>} : memref<8x128x128xf32, #tpu.memory_space<vmem>>, vector<1x128x128xf32>,
    %c7 = arith.constant 7 : index
    %c0_95 = arith.constant 0 : index
    %c0_96 = arith.constant 0 : index
    %237 = vector.load %arg1[%c7, %c0_95, %c0_96] : memref<8x128x128xf32, #tpu.memory_space<vmem>>, vector<1x128x128xf32>
    %238 = vector.shape_cast %237 : vector<1x128x128xf32> to vector<128x128xf32>
    %cst_97 = arith.constant dense<0.000000e+00> : vector<128x128xf32>
    %239 = tpu.matmul %238, %0, %cst_97 {dimension_numbers = #tpu.dot_dimension_numbers<[1], [0], [0], [1], [0, 0, 1, 1], [], []>} : vector<128x128xf32>, vector<128x128xf32>, vector<128x128xf32> -> vector<128x128xf32>
    %240 = vector.broadcast %2 : vector<1x128xf32> to vector<128x128xf32>
    %241 = arith.addf %239, %240 : vector<128x128xf32>
    %cst_98 = arith.constant dense<0.000000e+00> : vector<128x128xf32>
    %242 = tpu.matmul %1, %241, %cst_98 {dimension_numbers = #tpu.dot_dimension_numbers<[1], [0], [0], [1], [0, 0, 1, 1], [], []>} : vector<128x128xf32>, vector<128x128xf32>, vector<128x128xf32> -> vector<128x128xf32>
    %243 = vector.broadcast %3 : vector<128x1xf32> to vector<128x128xf32>
    %244 = arith.addf %242, %243 : vector<128x128xf32>
    %cst_99 = arith.constant dense<0.000000e+00> : vector<128xf32>
    %245 = vector.multi_reduction <add>, %244, %cst_99 [1] : vector<128x128xf32> to vector<128xf32>
    %246 = vector.shape_cast %245 : vector<128xf32> to vector<128x1xf32>
    %cst_100 = arith.constant 1.280000e+02 : f32
    %247 = vector.broadcast %cst_100 : f32 to vector<128x1xf32>
    %248 = arith.divf %246, %247 : vector<128x1xf32>
    %249 = vector.broadcast %248 : vector<128x1xf32> to vector<128x128xf32>
    %250 = arith.subf %244, %249 : vector<128x128xf32>
    %251 = arith.mulf %250, %250 : vector<128x128xf32>
    %cst_101 = arith.constant dense<0.000000e+00> : vector<128xf32>
    %252 = vector.multi_reduction <add>, %251, %cst_101 [1] : vector<128x128xf32> to vector<128xf32>
    %253 = vector.shape_cast %252 : vector<128xf32> to vector<128x1xf32>
    %cst_102 = arith.constant 1.280000e+02 : f32
    %254 = vector.broadcast %cst_102 : f32 to vector<128x1xf32>
    %255 = arith.divf %253, %254 : vector<128x1xf32>
    %256 = vector.broadcast %248 : vector<128x1xf32> to vector<128x128xf32>
    %257 = arith.subf %244, %256 : vector<128x128xf32>
    %cst_103 = arith.constant 9.99999974E-6 : f32
    %258 = vector.broadcast %cst_103 : f32 to vector<128x1xf32>
    %259 = arith.addf %255, %258 : vector<128x1xf32>
    %260 = math.rsqrt %259 : vector<128x1xf32>
    %261 = vector.broadcast %260 : vector<128x1xf32> to vector<128x128xf32>
    %262 = arith.mulf %257, %261 : vector<128x128xf32>
    %263 = vector.broadcast %4 : vector<1x128xf32> to vector<128x128xf32>
    %264 = arith.mulf %262, %263 : vector<128x128xf32>
    %265 = vector.broadcast %5 : vector<1x128xf32> to vector<128x128xf32>
    %266 = arith.addf %264, %265 : vector<128x128xf32>
    %c7_104 = arith.constant 7 : index
    %c0_105 = arith.constant 0 : index
    %c0_106 = arith.constant 0 : index
    %267 = vector.load %arg8[%c7_104, %c0_105, %c0_106] : memref<8x128x128xf32, #tpu.memory_space<vmem>>, vector<1x128x128xf32>
    %268 = vector.shape_cast %267 : vector<1x128x128xf32> to vector<128x128xf32>
    %269 = vector.shape_cast %266 : vector<128x128xf32> to vector<1x128x128xf32>
    tpu.vector_store %arg8[%c7_104, %c0_105, %c0_106], %269 {strides = array<i32>} : memref<8x128x128xf32, #tpu.memory_space<vmem>>, vector<1x128x128xf32>,
    return
  }
  func.func @transform_0(%arg0: i32) -> (i32, i32, i32) {
    %c0_i32 = arith.constant 0 : i32
    %c0_i32_0 = arith.constant 0 : i32
    %c0_i32_1 = arith.constant 0 : i32
    return %arg0, %c0_i32, %c0_i32_0 : i32, i32, i32
  }
  func.func @transform_1(%arg0: i32) -> (i32, i32) {
    %c0_i32 = arith.constant 0 : i32
    %c0_i32_0 = arith.constant 0 : i32
    %c0_i32_1 = arith.constant 0 : i32
    return %c0_i32, %c0_i32_0 : i32, i32
  }
  func.func @transform_2(%arg0: i32) -> (i32, i32) {
    %c0_i32 = arith.constant 0 : i32
    %c0_i32_0 = arith.constant 0 : i32
    %c0_i32_1 = arith.constant 0 : i32
    return %c0_i32, %c0_i32_0 : i32, i32
  }
  func.func @transform_3(%arg0: i32) -> (i32, i32) {
    %c0_i32 = arith.constant 0 : i32
    %c0_i32_0 = arith.constant 0 : i32
    %c0_i32_1 = arith.constant 0 : i32
    return %c0_i32, %c0_i32_0 : i32, i32
  }
  func.func @transform_4(%arg0: i32) -> (i32, i32) {
    %c0_i32 = arith.constant 0 : i32
    %c0_i32_0 = arith.constant 0 : i32
    %c0_i32_1 = arith.constant 0 : i32
    return %c0_i32, %c0_i32_0 : i32, i32
  }
  func.func @transform_5(%arg0: i32) -> (i32, i32) {
    %c0_i32 = arith.constant 0 : i32
    %c0_i32_0 = arith.constant 0 : i32
    %c0_i32_1 = arith.constant 0 : i32
    return %c0_i32, %c0_i32_0 : i32, i32
  }
  func.func @transform_6(%arg0: i32) -> (i32, i32) {
    %c0_i32 = arith.constant 0 : i32
    %c0_i32_0 = arith.constant 0 : i32
    %c0_i32_1 = arith.constant 0 : i32
    return %c0_i32, %c0_i32_0 : i32, i32
  }
  func.func @transform_7(%arg0: i32) -> (i32, i32, i32) {
    %c0_i32 = arith.constant 0 : i32
    %c0_i32_0 = arith.constant 0 : i32
    %c0_i32_1 = arith.constant 0 : i32
    return %arg0, %c0_i32, %c0_i32_0 : i32, i32, i32
  }
}

</mosaic_0001>

<bundles_post_ra>
// kernel: patch_embed_forward.1
= control target key start
LH: loop header
LB: loop body
LE: loop exit
PB: predicated region body
PF: predicated region fallthrough
CT: control target
= control target key end

     0   :  { %12 = vsyncpa [#allocation3], 0  ;;  %s10381_s0 = inlined_call_operand.vmem [shape: f32[32,128,128], index: 0, kind: input, shape index: {}]   ;;  %s10382_s1 = inlined_call_operand.vmem [shape: f32[128,128], index: 1, kind: input, shape index: {}]   ;;  %s10383_s2 = inlined_call_operand.vmem [shape: f32[1,128], index: 2, kind: input, shape index: {}]   ;;  %s10384_s3 = inlined_call_operand.vmem [shape: f32[128,128], index: 3, kind: input, shape index: {}]   ;;  %s10385_s4 = inlined_call_operand.vmem [shape: f32[128,1], index: 4, kind: input, shape index: {}]   ;;  %s10386_s5 = inlined_call_operand.vmem [shape: f32[1,128], index: 5, kind: input, shape index: {}]   ;;  %s10387_s6 = inlined_call_operand.vmem [shape: f32[1,128], index: 6, kind: input, shape index: {}]   ;;  %s10388_s7 = inlined_call_operand.hbm [shape: f32[32,128,128], index: 7, kind: output, shape index: {}]  }
   0x1   :  { %14 = vsyncpa [#allocation3 + $0x1], 0  ;;  %s7359_s24 = smov 0   ;;  %s7361_s25 = smov 0  }
   0x2   :  { %s7363_s26 = smov 0   ;;  %s7365_s27 = smov 0  }
   0x3 LB: > { %s7380_s28 = sadd.s32 4294967295, %s7313_s27   ;;  %s4764_s29 = sadd.s32 4294967294, %s7313_s27   ;;  %s7313_s27 = sphi %s7365_s27, %s10975_s27   ;;  %s7309_s26 = sphi %s7363_s26, %s10974_s26   ;;  %s7305_s25 = sphi %s7361_s25, %s10973_s25   ;;  %s7301_s24 = sphi %s7359_s24, %s10972_s24  }
   0x4   : > { %s7384_s30 = sadd.s32 1, %s7313_s27   ;;  %s179_s8 = sadd.s32 1, %s7309_s26 }
   0x5   : > { %s176_s9 = ssub.s32 %s7313_s27, %s7384_s30  ;;  %p189_p0 = scmp.ne.s32.totalorder %s7309_s26, %s7305_s25 }
   0x6   : > { %p177_p1 = scmp.eq.s32.totalorder %s176_s9, 0  ;;  %p190_p2 = scmp.eq.s32.totalorder %s7380_s28, 3 }
   0x7   : > { %p195_p3 = scmp.ne.s32.totalorder %s7305_s25, %s7301_s24  ;;  %p196_p4 = scmp.eq.s32.totalorder %s4764_s29, 3 }
   0x8   : > { %s7395_s10 = scalar_select %p177_p1, %s7309_s26, %s179_s8  }
   0x9   : > { %p7397_p5 = por %p190_p2, %p189_p0  ;;  %p7401_p6 = por %p196_p4, %p195_p3 }
   0xa   : > { %p4767_p7 = scmp.ge.s32.totalorder %s7313_s27, 1  ;;  %p242_p8 = scmp.lt.s32.totalorder %s7313_s27, 5 }
   0xc   : > { %p243_p9 = pnand %p4767_p7, %p242_p8 }
   0xe   : > { %246 = sbr.rel (%p243_p9) target bundleno = 1212 (0x4bc), region = 48 }
  0x15   : > { %v283_v0 = vld [vmem:[%s10382_s1] sm:$0xff]  ;;  %v284_v1 = vld [vmem:[%s10382_s1 + $0x8] sm:$0xff]  ;;  %v285_v2 = vld [vmem:[%s10382_s1 + $0x10] sm:$0xff]  ;;  %s4769_s19 = sshll.u32 %s7380_s28, 3  ;;  %s5007_s21 = sshll.u32 %s7380_s28, 14 }
  0x16   : > { %v7417_v3 = vpack.c.bf16 %v284_v1, %v283_v0  ;;  %v286_v4 = vld [vmem:[%s10382_s1 + $0x18] sm:$0xff]  ;;  %p276_p10 = scmp.lt.s32.totalorder %s4769_s19, 31  ;;  %v287_v6 = vld [vmem:[%s10382_s1 + $0x20] sm:$0xff]  ;;  %v288_v7 = vld [vmem:[%s10382_s1 + $0x28] sm:$0xff]  ;;  %s10333_s8 = scalar_lea.hbm %s10388_s7, %s5007_s21 }
  0x17   : > { %v7422_v5 = vpack.c.bf16 %v286_v4, %v285_v2  ;;  %v7433_v8 = vpack.c.bf16 %v288_v7, %v287_v6  ;;  %v289_v9 = vld [vmem:[%s10382_s1 + $0x30] sm:$0xff]  ;;  %v290_v10 = vld [vmem:[%s10382_s1 + $0x38] sm:$0xff]  ;;  %v291_v13 = vld [vmem:[%s10382_s1 + $0x40] sm:$0xff]  ;;  %s7316_s13 = smov [#allocation2]  }
  0x18   : > { %6417 = vmatprep.subr.bf16.mxu0 %v7417_v3  ;;  %s10977_s19 = smov (!%p276_p10, %s4769_s19), 31  ;;  %v7449_v12 = vpack.c.bf16 %v290_v10, %v289_v9  ;;  %v292_v14 = vld [vmem:[%s10382_s1 + $0x48] sm:$0xff]  ;;  %v293_v16 = vld [vmem:[%s10382_s1 + $0x50] sm:$0xff]  ;;  %v294_v17 = vld [vmem:[%s10382_s1 + $0x58] sm:$0xff]  ;;  %s7255_s14 = sshll.u32 %s7316_s13, 4  ;;  %s7256_s14 = int_to_ptr.vmem [resolvable:$false] %s7255_s14 }
  0x19   : > { %6419 = vmatpush3.bf16.msra.mxu0 %v7417_v3  ;;  %s5005_s9 = sshll.u32 %s10977_s19, 7  ;;  %v7459_v15 = vpack.c.bf16 %v292_v14, %v291_v13  ;;  %v7469_v18 = vpack.c.bf16 %v294_v17, %v293_v16  ;;  %v295_v19 = vld [vmem:[%s10382_s1 + $0x60] sm:$0xff]  ;;  %v296_v20 = vld [vmem:[%s10382_s1 + $0x68] sm:$0xff]  ;;  %v297_v22 = vld [vmem:[%s10382_s1 + $0x70] sm:$0xff]  ;;  %s7257_s15 = scalar_lea.vmem %s7256_s14, 32768 }
  0x1a   : > { %6421 = vmatprep.subr.bf16.mxu0 %v7422_v5  ;;  %s7444_s20 = scalar_lea.vmem %s10381_s0, %s5005_s9  ;;  %v7479_v21 = vpack.c.bf16 %v296_v20, %v295_v19  ;;  %v298_v23 = vld [vmem:[%s10382_s1 + $0x78] sm:$0xff] }
  0x1b   : > { %v334_v11 = vld [vmem:[%s7444_s20] sm:$0xff]  ;;  %v7489_v24 = vpack.c.bf16 %v298_v23, %v297_v22  ;;  %v335_v25 = vld [vmem:[%s7444_s20 + $0x8] sm:$0xff]  ;;  %v336_v26 = vld [vmem:[%s7444_s20 + $0x10] sm:$0xff] }
  0x1c   : > { %5552 = vmatprep.mubr.f32.mxu0 %v334_v11  ;;  %v337_v27 = vld [vmem:[%s7444_s20 + $0x18] sm:$0xff]  ;;  %v338_v28 = vld [vmem:[%s7444_s20 + $0x20] sm:$0xff]  ;;  %v339_v29 = vld [vmem:[%s7444_s20 + $0x28] sm:$0xff] }
  0x1d   : > { %6423 = vmatpush3.bf16.msra.mxu0 %v7422_v5  ;;  %v340_v30 = vld [vmem:[%s7444_s20 + $0x30] sm:$0xff]  ;;  %v341_v31 = vld [vmem:[%s7444_s20 + $0x38] sm:$0xff]  ;;  %v342_v32 = vld [vmem:[%s7444_s20 + $0x40] sm:$0xff] }
  0x1e   : > { %6425 = vmatprep.subr.bf16.mxu0 %v7433_v8  ;;  %v343_v33 = vld [vmem:[%s7444_s20 + $0x48] sm:$0xff]  ;;  %v344_v34 = vld [vmem:[%s7444_s20 + $0x50] sm:$0xff]  ;;  %v345_v35 = vld [vmem:[%s7444_s20 + $0x58] sm:$0xff] }
  0x1f   : > { %v346_v36 = vld [vmem:[%s7444_s20 + $0x60] sm:$0xff]  ;;  %v347_v37 = vld [vmem:[%s7444_s20 + $0x68] sm:$0xff]  ;;  %v348_v38 = vld [vmem:[%s7444_s20 + $0x70] sm:$0xff] }
  0x20   : > { %v349_v39 = vld [vmem:[%s7444_s20 + $0x78] sm:$0xff]  ;;  %v4775_v40 = vld [vmem:[%s7444_s20 + $0x80] sm:$0xff]  ;;  %v4776_v41 = vld [vmem:[%s7444_s20 + $0x88] sm:$0xff] }
  0x21   : > { %6427 = vmatpush3.bf16.msra.mxu0 %v7433_v8  ;;  %v4777_v42 = vld [vmem:[%s7444_s20 + $0x90] sm:$0xff]  ;;  %v4778_v43 = vld [vmem:[%s7444_s20 + $0x98] sm:$0xff]  ;;  %v4779_v44 = vld [vmem:[%s7444_s20 + $0xa0] sm:$0xff] }
  0x22   : > { %6429 = vmatprep.subr.bf16.mxu0 %v7449_v12  ;;  %v4780_v45 = vld [vmem:[%s7444_s20 + $0xa8] sm:$0xff]  ;;  %v4781_v46 = vld [vmem:[%s7444_s20 + $0xb0] sm:$0xff]  ;;  %v4782_v47 = vld [vmem:[%s7444_s20 + $0xb8] sm:$0xff] }
  0x23   : > { %v4783_v48 = vld [vmem:[%s7444_s20 + $0xc0] sm:$0xff]  ;;  %v4784_v49 = vld [vmem:[%s7444_s20 + $0xc8] sm:$0xff]  ;;  %v4785_v50 = vld [vmem:[%s7444_s20 + $0xd0] sm:$0xff] }
  0x24   : > { %v4786_v51 = vld [vmem:[%s7444_s20 + $0xd8] sm:$0xff]  ;;  %v4787_v52 = vld [vmem:[%s7444_s20 + $0xe0] sm:$0xff]  ;;  %v4788_v53 = vld [vmem:[%s7444_s20 + $0xe8] sm:$0xff] }
  0x25   : > { %6431 = vmatpush3.bf16.msra.mxu0 %v7449_v12  ;;  %v4789_v54 = vld [vmem:[%s7444_s20 + $0xf0] sm:$0xff]  ;;  %v4790_v55 = vld [vmem:[%s7444_s20 + $0xf8] sm:$0xff]  ;;  %v4807_v56 = vld [vmem:[%s7444_s20 + $0x100] sm:$0xff] }
  0x26   : > { %6433 = vmatprep.subr.bf16.mxu0 %v7459_v15  ;;  %v4808_v57 = vld [vmem:[%s7444_s20 + $0x108] sm:$0xff]  ;;  %v4809_v58 = vld [vmem:[%s7444_s20 + $0x110] sm:$0xff]  ;;  %v4810_v59 = vld [vmem:[%s7444_s20 + $0x118] sm:$0xff] }
  0x27   : > { %v4811_v60 = vld [vmem:[%s7444_s20 + $0x120] sm:$0xff]  ;;  %v4812_v61 = vld [vmem:[%s7444_s20 + $0x128] sm:$0xff]  ;;  %v4813_v62 = vld [vmem:[%s7444_s20 + $0x130] sm:$0xff] }
  0x28   : > { %v4814_v63 = vld [vmem:[%s7444_s20 + $0x138] sm:$0xff]  ;;  %v4815_v0 = vld [vmem:[%s7444_s20 + $0x140] sm:$0xff]  ;;  %v4816_v1 = vld [vmem:[%s7444_s20 + $0x148] sm:$0xff] }
  0x29   : > { %6435 = vmatpush3.bf16.msra.mxu0 %v7459_v15  ;;  %v4817_v2 = vld [vmem:[%s7444_s20 + $0x150] sm:$0xff]  ;;  %v4818_v4 = vld [vmem:[%s7444_s20 + $0x158] sm:$0xff]  ;;  %v4819_v6 = vld [vmem:[%s7444_s20 + $0x160] sm:$0xff] }
  0x2a   : > { %6437 = vmatprep.subr.bf16.mxu0 %v7469_v18  ;;  %v4820_v7 = vld [vmem:[%s7444_s20 + $0x168] sm:$0xff]  ;;  %v4821_v9 = vld [vmem:[%s7444_s20 + $0x170] sm:$0xff]  ;;  %v4822_v10 = vld [vmem:[%s7444_s20 + $0x178] sm:$0xff] }
  0x2b   : > { %v4839_v11 = vld [vmem:[%s7444_s20 + $0x180] sm:$0xff]  ;;  %v4840_v13 = vld [vmem:[%s7444_s20 + $0x188] sm:$0xff]  ;;  %v4841_v14 = vld [vmem:[%s7444_s20 + $0x190] sm:$0xff] }
  0x2c   : > { %v4842_v16 = vld [vmem:[%s7444_s20 + $0x198] sm:$0xff]  ;;  %v4843_v17 = vld [vmem:[%s7444_s20 + $0x1a0] sm:$0xff]  ;;  %v4844_v19 = vld [vmem:[%s7444_s20 + $0x1a8] sm:$0xff] }
  0x2d   : > { %6439 = vmatpush3.bf16.msra.mxu0 %v7469_v18  ;;  %v4845_v20 = vld [vmem:[%s7444_s20 + $0x1b0] sm:$0xff]  ;;  %v4846_v22 = vld [vmem:[%s7444_s20 + $0x1b8] sm:$0xff]  ;;  %v4847_v23 = vld [vmem:[%s7444_s20 + $0x1c0] sm:$0xff] }
  0x2e   : > { %6441 = vmatprep.subr.bf16.mxu0 %v7479_v21 }
  0x31   : > { %6443 = vmatpush3.bf16.msra.mxu0 %v7479_v21 }
  0x32   : > { %6445 = vmatprep.subr.bf16.mxu0 %v7489_v24 }
  0x35   : > { %6447 = vmatpush3.bf16.msra.mxu0 %v7489_v24 }
  0x36   : > { %6481 = vmatprep.subr.bf16.mxu0 %v7417_v3 }
  0x38   : > { %5553 = vmatmul.mubr.f32.vlgmr.msra.gmra.mrb[0].mxu0 %v335_v25  ;;  %v4848_v25 = vld [vmem:[%s7444_s20 + $0x1c8] sm:$0xff] }
  0x39   : > { %6483 = vmatpush3.bf16.msra.mxu0 %v7417_v3  ;;  %5555 = vmatprep.mubr.f32.mxu0 %v336_v26  ;;  %v4849_v26 = vld [vmem:[%s7444_s20 + $0x1d0] sm:$0xff] }
  0x3a   : > { %6485 = vmatprep.subr.bf16.mxu0 %v7422_v5 }
  0x3c   : > { %5556 = vmatmul.mubr.f32.gmra.mrb[2].mxu0 %v337_v27  ;;  %v4850_v27 = vld [vmem:[%s7444_s20 + $0x1d8] sm:$0xff] }
  0x3d   : > { %6487 = vmatpush3.bf16.msra.mxu0 %v7422_v5  ;;  %5558 = vmatprep.mubr.f32.mxu0 %v338_v28  ;;  %v4851_v28 = vld [vmem:[%s7444_s20 + $0x1e0] sm:$0xff] }
  0x3e   : > { %6489 = vmatprep.subr.bf16.mxu0 %v7433_v8 }
  0x40   : > { %5559 = vmatmul.mubr.f32.gmra.mrb[4].mxu0 %v339_v29  ;;  %v4852_v29 = vld [vmem:[%s7444_s20 + $0x1e8] sm:$0xff] }
  0x41   : > { %6491 = vmatpush3.bf16.msra.mxu0 %v7433_v8  ;;  %5561 = vmatprep.mubr.f32.mxu0 %v340_v30  ;;  %v4853_v30 = vld [vmem:[%s7444_s20 + $0x1f0] sm:$0xff] }
  0x42   : > { %6493 = vmatprep.subr.bf16.mxu0 %v7449_v12 }
  0x44   : > { %5562 = vmatmul.mubr.f32.gmra.mrb[6].mxu0 %v341_v31  ;;  %v7620_v31 = vld [vmem:[%s10384_s3] sm:$0xff] }
  0x45   : > { %6495 = vmatpush3.bf16.msra.mxu0 %v7449_v12  ;;  %5564 = vmatprep.mubr.f32.mxu0 %v342_v32  ;;  %v4854_v32 = vld [vmem:[%s7444_s20 + $0x1f8] sm:$0xff] }
  0x46   : > { %6497 = vmatprep.subr.bf16.mxu0 %v7459_v15  ;;  %5608 = vmatprep.mubr.f32.mxu1 %v7620_v31 }
  0x48   : > { %5565 = vmatmul.mubr.f32.gmra.mrb[8].mxu0 %v343_v33  ;;  %v4871_v33 = vld [vmem:[%s7444_s20 + $0x200] sm:$0xff] }
  0x49   : > { %6499 = vmatpush3.bf16.msra.mxu0 %v7459_v15  ;;  %5567 = vmatprep.mubr.f32.mxu0 %v344_v34  ;;  %v4872_v34 = vld [vmem:[%s7444_s20 + $0x208] sm:$0xff] }
  0x4a   : > { %6501 = vmatprep.subr.bf16.mxu0 %v7469_v18 }
  0x4c   : > { %5568 = vmatmul.mubr.f32.gmra.mrb[10].mxu0 %v345_v35  ;;  %v4873_v35 = vld [vmem:[%s7444_s20 + $0x210] sm:$0xff] }
  0x4d   : > { %6503 = vmatpush3.bf16.msra.mxu0 %v7469_v18  ;;  %5570 = vmatprep.mubr.f32.mxu0 %v346_v36  ;;  %v4874_v36 = vld [vmem:[%s7444_s20 + $0x218] sm:$0xff] }
  0x4e   : > { %6505 = vmatprep.subr.bf16.mxu0 %v7479_v21 }
  0x50   : > { %5571 = vmatmul.mubr.f32.gmra.mrb[12].mxu0 %v347_v37  ;;  %v4875_v37 = vld [vmem:[%s7444_s20 + $0x220] sm:$0xff] }
  0x51   : > { %6507 = vmatpush3.bf16.msra.mxu0 %v7479_v21  ;;  %5573 = vmatprep.mubr.f32.mxu0 %v348_v38  ;;  %v4876_v38 = vld [vmem:[%s7444_s20 + $0x228] sm:$0xff] }
  0x52   : > { %6509 = vmatprep.subr.bf16.mxu0 %v7489_v24 }
  0x54   : > { %5574 = vmatmul.mubr.f32.gmra.mrb[14].mxu0 %v349_v39  ;;  %v4877_v39 = vld [vmem:[%s7444_s20 + $0x230] sm:$0xff] }
  0x55   : > { %6511 = vmatpush3.bf16.msra.mxu0 %v7489_v24  ;;  %5664 = vmatprep.mubr.f32.mxu0 %v4775_v40  ;;  %v4878_v40 = vld [vmem:[%s7444_s20 + $0x238] sm:$0xff] }
  0x56   : > { %6545 = vmatprep.subr.bf16.mxu0 %v7417_v3 }
  0x58   : > { %5665 = vmatmul.mubr.f32.vlgmr.msra.gmra.mrb[16].mxu0 %v4776_v41  ;;  %v4879_v41 = vld [vmem:[%s7444_s20 + $0x240] sm:$0xff] }
  0x59   : > { %6547 = vmatpush3.bf16.msra.mxu0 %v7417_v3  ;;  %5667 = vmatprep.mubr.f32.mxu0 %v4777_v42  ;;  %v4880_v42 = vld [vmem:[%s7444_s20 + $0x248] sm:$0xff] }
  0x5a   : > { %6549 = vmatprep.subr.bf16.mxu0 %v7422_v5 }
  0x5c   : > { %5668 = vmatmul.mubr.f32.gmra.mrb[18].mxu0 %v4778_v43  ;;  %v4881_v43 = vld [vmem:[%s7444_s20 + $0x250] sm:$0xff] }
  0x5d   : > { %6551 = vmatpush3.bf16.msra.mxu0 %v7422_v5  ;;  %5670 = vmatprep.mubr.f32.mxu0 %v4779_v44  ;;  %v4882_v44 = vld [vmem:[%s7444_s20 + $0x258] sm:$0xff] }
  0x5e   : > { %6553 = vmatprep.subr.bf16.mxu0 %v7433_v8 }
  0x60   : > { %5671 = vmatmul.mubr.f32.gmra.mrb[20].mxu0 %v4780_v45  ;;  %v4883_v45 = vld [vmem:[%s7444_s20 + $0x260] sm:$0xff] }
  0x61   : > { %6555 = vmatpush3.bf16.msra.mxu0 %v7433_v8  ;;  %5673 = vmatprep.mubr.f32.mxu0 %v4781_v46  ;;  %v4884_v46 = vld [vmem:[%s7444_s20 + $0x268] sm:$0xff] }
  0x62   : > { %6557 = vmatprep.subr.bf16.mxu0 %v7449_v12 }
  0x64   : > { %5674 = vmatmul.mubr.f32.gmra.mrb[22].mxu0 %v4782_v47  ;;  %v4885_v47 = vld [vmem:[%s7444_s20 + $0x270] sm:$0xff] }
  0x65   : > { %6559 = vmatpush3.bf16.msra.mxu0 %v7449_v12  ;;  %5676 = vmatprep.mubr.f32.mxu0 %v4783_v48  ;;  %v4886_v48 = vld [vmem:[%s7444_s20 + $0x278] sm:$0xff] }
  0x66   : > { %6561 = vmatprep.subr.bf16.mxu0 %v7459_v15 }
  0x68   : > { %5677 = vmatmul.mubr.f32.gmra.mrb[24].mxu0 %v4784_v49  ;;  %v4903_v49 = vld [vmem:[%s7444_s20 + $0x280] sm:$0xff] }
  0x69   : > { %6563 = vmatpush3.bf16.msra.mxu0 %v7459_v15  ;;  %5679 = vmatprep.mubr.f32.mxu0 %v4785_v50  ;;  %v4904_v50 = vld [vmem:[%s7444_s20 + $0x288] sm:$0xff] }
  0x6a   : > { %6565 = vmatprep.subr.bf16.mxu0 %v7469_v18 }
  0x6c   : > { %5680 = vmatmul.mubr.f32.gmra.mrb[26].mxu0 %v4786_v51  ;;  %v4905_v51 = vld [vmem:[%s7444_s20 + $0x290] sm:$0xff] }
  0x6d   : > { %6567 = vmatpush3.bf16.msra.mxu0 %v7469_v18  ;;  %5682 = vmatprep.mubr.f32.mxu0 %v4787_v52  ;;  %v4906_v52 = vld [vmem:[%s7444_s20 + $0x298] sm:$0xff] }
  0x6e   : > { %6569 = vmatprep.subr.bf16.mxu0 %v7479_v21 }
  0x70   : > { %5683 = vmatmul.mubr.f32.gmra.mrb[28].mxu0 %v4788_v53  ;;  %v4907_v53 = vld [vmem:[%s7444_s20 + $0x2a0] sm:$0xff] }
  0x71   : > { %6571 = vmatpush3.bf16.msra.mxu0 %v7479_v21  ;;  %5685 = vmatprep.mubr.f32.mxu0 %v4789_v54  ;;  %v4908_v54 = vld [vmem:[%s7444_s20 + $0x2a8] sm:$0xff] }
  0x72   : > { %6573 = vmatprep.subr.bf16.mxu0 %v7489_v24 }
  0x74   : > { %5686 = vmatmul.mubr.f32.gmra.mrb[30].mxu0 %v4790_v55  ;;  %v4909_v55 = vld [vmem:[%s7444_s20 + $0x2b0] sm:$0xff] }
  0x75   : > { %6575 = vmatpush3.bf16.msra.mxu0 %v7489_v24  ;;  %5776 = vmatprep.mubr.f32.mxu0 %v4807_v56  ;;  %v4910_v56 = vld [vmem:[%s7444_s20 + $0x2b8] sm:$0xff] }
  0x76   : > { %6609 = vmatprep.subr.bf16.mxu0 %v7417_v3 }
  0x78   : > { %5777 = vmatmul.mubr.f32.vlgmr.msra.gmra.mrb[32].mxu0 %v4808_v57  ;;  %v4911_v57 = vld [vmem:[%s7444_s20 + $0x2c0] sm:$0xff] }
  0x79   : > { %6611 = vmatpush3.bf16.msra.mxu0 %v7417_v3  ;;  %5779 = vmatprep.mubr.f32.mxu0 %v4809_v58  ;;  %v4912_v58 = vld [vmem:[%s7444_s20 + $0x2c8] sm:$0xff] }
  0x7a   : > { %6613 = vmatprep.subr.bf16.mxu0 %v7422_v5 }
  0x7c   : > { %5780 = vmatmul.mubr.f32.gmra.mrb[34].mxu0 %v4810_v59  ;;  %v4913_v59 = vld [vmem:[%s7444_s20 + $0x2d0] sm:$0xff] }
  0x7d   : > { %6615 = vmatpush3.bf16.msra.mxu0 %v7422_v5  ;;  %5782 = vmatprep.mubr.f32.mxu0 %v4811_v60  ;;  %v4914_v60 = vld [vmem:[%s7444_s20 + $0x2d8] sm:$0xff] }
  0x7e   : > { %6617 = vmatprep.subr.bf16.mxu0 %v7433_v8 }
  0x80   : > { %5783 = vmatmul.mubr.f32.gmra.mrb[36].mxu0 %v4812_v61  ;;  %v318_v61 = vld [vmem:[%s10385_s4 + $0x10] sm:$0xff] }
  0x81   : > { %6619 = vmatpush3.bf16.msra.mxu0 %v7433_v8  ;;  %5785 = vmatprep.mubr.f32.mxu0 %v4813_v62  ;;  %v316_v62 = vld [vmem:[%s10385_s4] sm:$0xff] }
  0x82   : > { %6621 = vmatprep.subr.bf16.mxu0 %v7449_v12 }
  0x84   : > { %5786 = vmatmul.mubr.f32.gmra.mrb[38].mxu0 %v4814_v63  ;;  %v4915_v63 = vld [vmem:[%s7444_s20 + $0x2e0] sm:$0xff] }
  0x85   : > { %6623 = vmatpush3.bf16.msra.mxu0 %v7449_v12  ;;  %5788 = vmatprep.mubr.f32.mxu0 %v4815_v0  ;;  %v7315_v0 = vmov 0  }
  0x86   : > { %6625 = vmatprep.subr.bf16.mxu0 %v7459_v15  ;;  %6971 = vset.pattern.permute.xlu1 %v7315_v0 }
  0x87   : > { %6970 = vset.pattern.permute.xlu0 %v7315_v0  ;;  %513 = vperm.xlu1 %6971, %v318_v61  }
  0x88   : > { %5789 = vmatmul.mubr.f32.gmra.mrb[40].mxu0 %v4816_v1  ;;  %503 = vperm.xlu0 %6970, %v316_v62   ;;  %v4916_v1 = vld [vmem:[%s7444_s20 + $0x2e8] sm:$0xff] }
  0x89   : > { %6627 = vmatpush3.bf16.msra.mxu0 %v7459_v15  ;;  %5791 = vmatprep.mubr.f32.mxu0 %v4817_v2  ;;  %v319_v2 = vld [vmem:[%s10385_s4 + $0x18] sm:$0xff] }
  0x8a   : > { %6629 = vmatprep.subr.bf16.mxu0 %v7469_v18 }
  0x8b   : > { %518 = vperm.xlu1 %6971, %v319_v2   ;;  %v4973_v2 = vld [vmem:[%s7444_s20 + $0x3b0] sm:$0xff] }
  0x8c   : > { %5792 = vmatmul.mubr.f32.gmra.mrb[42].mxu0 %v4818_v4  ;;  %v317_v4 = vld [vmem:[%s10385_s4 + $0x8] sm:$0xff] }
  0x8d   : > { %6631 = vmatpush3.bf16.msra.mxu0 %v7469_v18  ;;  %5794 = vmatprep.mubr.f32.mxu0 %v4819_v6  ;;  %v4917_v6 = vld [vmem:[%s7444_s20 + $0x2f0] sm:$0xff] }
  0x8e   : > { %6633 = vmatprep.subr.bf16.mxu0 %v7479_v21  ;;  %508 = vperm.xlu0 %6970, %v317_v4  }
  0x90   : > { %5795 = vmatmul.mubr.f32.gmra.mrb[44].mxu0 %v4820_v7  ;;  %v4918_v7 = vld [vmem:[%s7444_s20 + $0x2f8] sm:$0xff] }
  0x91   : > { %6635 = vmatpush3.bf16.msra.mxu0 %v7479_v21  ;;  %5797 = vmatprep.mubr.f32.mxu0 %v4821_v9  ;;  %v321_v9 = vld [vmem:[%s10385_s4 + $0x28] sm:$0xff] }
  0x92   : > { %6637 = vmatprep.subr.bf16.mxu0 %v7489_v24  ;;  %528 = vperm.xlu1 %6971, %v321_v9  }
  0x94   : > { %5798 = vmatmul.mubr.f32.gmra.mrb[46].mxu0 %v4822_v10  ;;  %v320_v10 = vld [vmem:[%s10385_s4 + $0x20] sm:$0xff] }
  0x95   : > { %6639 = vmatpush3.bf16.msra.mxu0 %v7489_v24  ;;  %5888 = vmatprep.mubr.f32.mxu0 %v4839_v11  ;;  %v4935_v11 = vld [vmem:[%s7444_s20 + $0x300] sm:$0xff] }
  0x96   : > { %6673 = vmatprep.subr.bf16.mxu0 %v7417_v3  ;;  %523 = vperm.xlu0 %6970, %v320_v10  }
  0x98   : > { %5889 = vmatmul.mubr.f32.vlgmr.msra.gmra.mrb[48].mxu0 %v4840_v13  ;;  %v4936_v13 = vld [vmem:[%s7444_s20 + $0x308] sm:$0xff] }
  0x99   : > { %6675 = vmatpush3.bf16.msra.mxu0 %v7417_v3  ;;  %5891 = vmatprep.mubr.f32.mxu0 %v4841_v14  ;;  %v323_v14 = vld [vmem:[%s10385_s4 + $0x38] sm:$0xff] }
  0x9a   : > { %6677 = vmatprep.subr.bf16.mxu0 %v7422_v5  ;;  %538 = vperm.xlu1 %6971, %v323_v14  }
  0x9c   : > { %5892 = vmatmul.mubr.f32.gmra.mrb[50].mxu0 %v4842_v16  ;;  %v322_v16 = vld [vmem:[%s10385_s4 + $0x30] sm:$0xff] }
  0x9d   : > { %6679 = vmatpush3.bf16.msra.mxu0 %v7422_v5  ;;  %5894 = vmatprep.mubr.f32.mxu0 %v4843_v17  ;;  %v4937_v17 = vld [vmem:[%s7444_s20 + $0x310] sm:$0xff] }
  0x9e   : > { %6681 = vmatprep.subr.bf16.mxu0 %v7433_v8  ;;  %533 = vperm.xlu0 %6970, %v322_v16  }
  0xa0   : > { %5895 = vmatmul.mubr.f32.gmra.mrb[52].mxu0 %v4844_v19  ;;  %v4938_v19 = vld [vmem:[%s7444_s20 + $0x318] sm:$0xff] }
  0xa1   : > { %6683 = vmatpush3.bf16.msra.mxu0 %v7433_v8  ;;  %5897 = vmatprep.mubr.f32.mxu0 %v4845_v20  ;;  %v325_v20 = vld [vmem:[%s10385_s4 + $0x48] sm:$0xff] }
  0xa2   : > { %6685 = vmatprep.subr.bf16.mxu0 %v7449_v12  ;;  %548 = vperm.xlu1 %6971, %v325_v20  }
  0xa4   : > { %5898 = vmatmul.mubr.f32.gmra.mrb[54].mxu0 %v4846_v22  ;;  %v324_v22 = vld [vmem:[%s10385_s4 + $0x40] sm:$0xff] }
  0xa5   : > { %6687 = vmatpush3.bf16.msra.mxu0 %v7449_v12  ;;  %5900 = vmatprep.mubr.f32.mxu0 %v4847_v23  ;;  %v4939_v23 = vld [vmem:[%s7444_s20 + $0x320] sm:$0xff] }
  0xa6   : > { %6689 = vmatprep.subr.bf16.mxu0 %v7459_v15  ;;  %543 = vperm.xlu0 %6970, %v324_v22   ;;  %v4976_v22 = vld [vmem:[%s7444_s20 + $0x3c8] sm:$0xff] }
  0xa8   : > { %5901 = vmatmul.mubr.f32.gmra.mrb[56].mxu0 %v4848_v25  ;;  %v327_v25 = vld [vmem:[%s10385_s4 + $0x58] sm:$0xff] }
  0xa9   : > { %6691 = vmatpush3.bf16.msra.mxu0 %v7459_v15  ;;  %5903 = vmatprep.mubr.f32.mxu0 %v4849_v26  ;;  %v326_v26 = vld [vmem:[%s10385_s4 + $0x50] sm:$0xff] }
  0xaa   : > { %6693 = vmatprep.subr.bf16.mxu0 %v7469_v18  ;;  %558 = vperm.xlu1 %6971, %v327_v25  }
  0xab   : > { %553 = vperm.xlu0 %6970, %v326_v26  }
  0xac   : > { %5904 = vmatmul.mubr.f32.gmra.mrb[58].mxu0 %v4850_v27  ;;  %v4941_v27 = vld [vmem:[%s7444_s20 + $0x330] sm:$0xff] }
  0xad   : > { %6695 = vmatpush3.bf16.msra.mxu0 %v7469_v18  ;;  %5906 = vmatprep.mubr.f32.mxu0 %v4851_v28  ;;  %v329_v28 = vld [vmem:[%s10385_s4 + $0x68] sm:$0xff] }
  0xae   : > { %6697 = vmatprep.subr.bf16.mxu0 %v7479_v21  ;;  %568 = vperm.xlu1 %6971, %v329_v28   ;;  %v4978_v28 = vld [vmem:[%s7444_s20 + $0x3d8] sm:$0xff] }
  0xb0   : > { %5907 = vmatmul.mubr.f32.gmra.mrb[60].mxu0 %v4852_v29  ;;  %v328_v29 = vld [vmem:[%s10385_s4 + $0x60] sm:$0xff] }
  0xb1   : > { %6699 = vmatpush3.bf16.msra.mxu0 %v7479_v21  ;;  %5909 = vmatprep.mubr.f32.mxu0 %v4853_v30  ;;  %v4943_v30 = vld [vmem:[%s7444_s20 + $0x340] sm:$0xff] }
  0xb2   : > { %6701 = vmatprep.subr.bf16.mxu0 %v7489_v24  ;;  %563 = vperm.xlu0 %6970, %v328_v29   ;;  %v4979_v29 = vld [vmem:[%s7444_s20 + $0x3e0] sm:$0xff] }
  0xb4   : > { %5910 = vmatmul.mubr.f32.gmra.mrb[62].mxu0 %v4854_v32  ;;  %v331_v32 = vld [vmem:[%s10385_s4 + $0x78] sm:$0xff] }
  0xb5   : > { %6703 = vmatpush3.bf16.msra.mxu0 %v7489_v24  ;;  %6000 = vmatprep.mubr.f32.mxu0 %v4871_v33  ;;  %v330_v33 = vld [vmem:[%s10385_s4 + $0x70] sm:$0xff] }
  0xb6   : > { %6737 = vmatprep.subr.bf16.mxu0 %v7417_v3  ;;  %578 = vperm.xlu1 %6971, %v331_v32  }
  0xb7   : > { %573 = vperm.xlu0 %6970, %v330_v33  }
  0xb8   : > { %6001 = vmatmul.mubr.f32.vlgmr.msra.gmra.mrb[64].mxu0 %v4872_v34  ;;  %v4945_v34 = vld [vmem:[%s7444_s20 + $0x350] sm:$0xff] }
  0xb9   : > { %6739 = vmatpush3.bf16.msra.mxu0 %v7417_v3  ;;  %6003 = vmatprep.mubr.f32.mxu0 %v4873_v35  ;;  %v4946_v35 = vld [vmem:[%s7444_s20 + $0x358] sm:$0xff] }
  0xba   : > { %6741 = vmatprep.subr.bf16.mxu0 %v7422_v5 }
  0xbc   : > { %6004 = vmatmul.mubr.f32.gmra.mrb[66].mxu0 %v4874_v36  ;;  %v4947_v36 = vld [vmem:[%s7444_s20 + $0x360] sm:$0xff] }
  0xbd   : > { %6743 = vmatpush3.bf16.msra.mxu0 %v7422_v5  ;;  %6006 = vmatprep.mubr.f32.mxu0 %v4875_v37 }
  0xbe   : > { %6745 = vmatprep.subr.bf16.mxu0 %v7433_v8 }
  0xc0   : > { %6007 = vmatmul.mubr.f32.gmra.mrb[68].mxu0 %v4876_v38 }
  0xc1   : > { %6747 = vmatpush3.bf16.msra.mxu0 %v7433_v8  ;;  %6009 = vmatprep.mubr.f32.mxu0 %v4877_v39 }
  0xc2   : > { %6749 = vmatprep.subr.bf16.mxu0 %v7449_v12 }
  0xc4   : > { %6010 = vmatmul.mubr.f32.gmra.mrb[70].mxu0 %v4878_v40 }
  0xc5   : > { %6751 = vmatpush3.bf16.msra.mxu0 %v7449_v12  ;;  %6012 = vmatprep.mubr.f32.mxu0 %v4879_v41 }
  0xc6   : > { %6753 = vmatprep.subr.bf16.mxu0 %v7459_v15 }
  0xc8   : > { %6013 = vmatmul.mubr.f32.gmra.mrb[72].mxu0 %v4880_v42 }
  0xc9   : > { %6755 = vmatpush3.bf16.msra.mxu0 %v7459_v15  ;;  %6015 = vmatprep.mubr.f32.mxu0 %v4881_v43  ;;  %v4949_v43 = vld [vmem:[%s7444_s20 + $0x370] sm:$0xff] }
  0xca   : > { %6757 = vmatprep.subr.bf16.mxu0 %v7469_v18 }
  0xcc   : > { %6016 = vmatmul.mubr.f32.gmra.mrb[74].mxu0 %v4882_v44 }
  0xcd   : > { %6759 = vmatpush3.bf16.msra.mxu0 %v7469_v18  ;;  %6018 = vmatprep.mubr.f32.mxu0 %v4883_v45 }
  0xce   : > { %6761 = vmatprep.subr.bf16.mxu0 %v7479_v21 }
  0xd0   : > { %6019 = vmatmul.mubr.f32.gmra.mrb[76].mxu0 %v4884_v46 }
  0xd1   : > { %6763 = vmatpush3.bf16.msra.mxu0 %v7479_v21  ;;  %6021 = vmatprep.mubr.f32.mxu0 %v4885_v47  ;;  %v4950_v47 = vld [vmem:[%s7444_s20 + $0x378] sm:$0xff] }
  0xd2   : > { %6765 = vmatprep.subr.bf16.mxu0 %v7489_v24 }
  0xd4   : > { %6022 = vmatmul.mubr.f32.gmra.mrb[78].mxu0 %v4886_v48 }
  0xd5   : > { %6767 = vmatpush3.bf16.msra.mxu0 %v7489_v24  ;;  %6112 = vmatprep.mubr.f32.mxu0 %v4903_v49  ;;  %v4967_v49 = vld [vmem:[%s7444_s20 + $0x380] sm:$0xff] }
  0xd6   : > { %6801 = vmatprep.subr.bf16.mxu0 %v7417_v3 }
  0xd8   : > { %6113 = vmatmul.mubr.f32.vlgmr.msra.gmra.mrb[80].mxu0 %v4904_v50 }
  0xd9   : > { %6803 = vmatpush3.bf16.msra.mxu0 %v7417_v3  ;;  %6115 = vmatprep.mubr.f32.mxu0 %v4905_v51 }
  0xda   : > { %6805 = vmatprep.subr.bf16.mxu0 %v7422_v5 }
  0xdc   : > { %6116 = vmatmul.mubr.f32.gmra.mrb[82].mxu0 %v4906_v52 }
  0xdd   : > { %6807 = vmatpush3.bf16.msra.mxu0 %v7422_v5  ;;  %6118 = vmatprep.mubr.f32.mxu0 %v4907_v53  ;;  %v4969_v53 = vld [vmem:[%s7444_s20 + $0x390] sm:$0xff] }
  0xde   : > { %6809 = vmatprep.subr.bf16.mxu0 %v7433_v8 }
  0xe0   : > { %6119 = vmatmul.mubr.f32.gmra.mrb[84].mxu0 %v4908_v54 }
  0xe1   : > { %6811 = vmatpush3.bf16.msra.mxu0 %v7433_v8  ;;  %6121 = vmatprep.mubr.f32.mxu0 %v4909_v55 }
  0xe2   : > { %6813 = vmatprep.subr.bf16.mxu0 %v7449_v12 }
  0xe4   : > { %6122 = vmatmul.mubr.f32.gmra.mrb[86].mxu0 %v4910_v56 }
  0xe5   : > { %6815 = vmatpush3.bf16.msra.mxu0 %v7449_v12  ;;  %6124 = vmatprep.mubr.f32.mxu0 %v4911_v57 }
  0xe6   : > { %6817 = vmatprep.subr.bf16.mxu0 %v7459_v15 }
  0xe8   : > { %6125 = vmatmul.mubr.f32.gmra.mrb[88].mxu0 %v4912_v58 }
  0xe9   : > { %6819 = vmatpush3.bf16.msra.mxu0 %v7459_v15  ;;  %6127 = vmatprep.mubr.f32.mxu0 %v4913_v59  ;;  %v4970_v59 = vld [vmem:[%s7444_s20 + $0x398] sm:$0xff] }
  0xea   : > { %6821 = vmatprep.subr.bf16.mxu0 %v7469_v18 }
  0xec   : > { %6128 = vmatmul.mubr.f32.gmra.mrb[90].mxu0 %v4914_v60  ;;  %v4971_v60 = vld [vmem:[%s7444_s20 + $0x3a0] sm:$0xff] }
  0xed   : > { %6823 = vmatpush3.bf16.msra.mxu0 %v7469_v18  ;;  %6130 = vmatprep.mubr.f32.mxu0 %v4915_v63 }
  0xee   : > { %6825 = vmatprep.subr.bf16.mxu0 %v7479_v21 }
  0xf0   : > { %6131 = vmatmul.mubr.f32.gmra.mrb[92].mxu0 %v4916_v1  ;;  %v4972_v1 = vld [vmem:[%s7444_s20 + $0x3a8] sm:$0xff] }
  0xf1   : > { %6827 = vmatpush3.bf16.msra.mxu0 %v7479_v21  ;;  %6133 = vmatprep.mubr.f32.mxu0 %v4917_v6 }
  0xf2   : > { %6829 = vmatprep.subr.bf16.mxu0 %v7489_v24 }
  0xf4   : > { %6134 = vmatmul.mubr.f32.gmra.mrb[94].mxu0 %v4918_v7 }
  0xf5   : > { %6831 = vmatpush3.bf16.msra.mxu0 %v7489_v24  ;;  %6224 = vmatprep.mubr.f32.mxu0 %v4935_v11  ;;  %v4974_v11 = vld [vmem:[%s7444_s20 + $0x3b8] sm:$0xff] }
  0xf6   : > { %6865 = vmatprep.subr.bf16.mxu0 %v7417_v3 }
  0xf8   : > { %6225 = vmatmul.mubr.f32.vlgmr.msra.gmra.mrb[96].mxu0 %v4936_v13  ;;  %v4975_v13 = vld [vmem:[%s7444_s20 + $0x3c0] sm:$0xff] }
  0xf9   : > { %6867 = vmatpush3.bf16.msra.mxu0 %v7417_v3  ;;  %6227 = vmatprep.mubr.f32.mxu0 %v4937_v17  ;;  %v4940_v3 = vld [vmem:[%s7444_s20 + $0x328] sm:$0xff] }
  0xfa   : > { %6869 = vmatprep.subr.bf16.mxu0 %v7422_v5 }
  0xfc   : > { %6228 = vmatmul.mubr.f32.gmra.mrb[98].mxu0 %v4938_v19 }
  0xfd   : > { %6871 = vmatpush3.bf16.msra.mxu0 %v7422_v5  ;;  %6230 = vmatprep.mubr.f32.mxu0 %v4939_v23  ;;  %v4942_v5 = vld [vmem:[%s7444_s20 + $0x338] sm:$0xff]  ;;  %v4977_v23 = vld [vmem:[%s7444_s20 + $0x3d0] sm:$0xff] }
  0xfe   : > { %6873 = vmatprep.subr.bf16.mxu0 %v7433_v8 }
 0x100   : > { %6231 = vmatmul.mubr.f32.gmra.mrb[100].mxu0 %v4940_v3 }
 0x101   : > { %6875 = vmatpush3.bf16.msra.mxu0 %v7433_v8  ;;  %6233 = vmatprep.mubr.f32.mxu0 %v4941_v27  ;;  %v4944_v8 = vld [vmem:[%s7444_s20 + $0x348] sm:$0xff] }
 0x102   : > { %6877 = vmatprep.subr.bf16.mxu0 %v7449_v12 }
 0x104   : > { %6234 = vmatmul.mubr.f32.gmra.mrb[102].mxu0 %v4942_v5 }
 0x105   : > { %6879 = vmatpush3.bf16.msra.mxu0 %v7449_v12  ;;  %6236 = vmatprep.mubr.f32.mxu0 %v4943_v30  ;;  %v7763_v12 = vld [vmem:[%s10383_s2] ss:$0 sm:$0xff] }
 0x106   : > { %6881 = vmatprep.subr.bf16.mxu0 %v7459_v15 }
 0x108   : > { %6237 = vmatmul.mubr.f32.gmra.mrb[104].mxu0 %v4944_v8 }
 0x109   : > { %6883 = vmatpush3.bf16.msra.mxu0 %v7459_v15  ;;  %6239 = vmatprep.mubr.f32.mxu0 %v4945_v34  ;;  %v4948_v15 = vld [vmem:[%s7444_s20 + $0x368] sm:$0xff] }
 0x10a   : > { %6885 = vmatprep.subr.bf16.mxu0 %v7469_v18 }
 0x10b   : > { %v5554_v37 = vpop.f32.mrb[0].mxu0 }
 0x10c   : > { %v428_v38 = vadd.f32 %v5554_v37, %v7763_v12  ;;  %v422_v39 = vpop.f32.mrb[1].mxu0  ;;  %6240 = vmatmul.mubr.f32.gmra.mrb[106].mxu0 %v4946_v35  ;;  %v4980_v35 = vld [vmem:[%s7444_s20 + $0x3e8] sm:$0xff] }
 0x10d   : > { %v423_v40 = vadd.f32 %v7763_v12, %v422_v39  ;;  %6887 = vmatpush3.bf16.msra.mxu0 %v7469_v18  ;;  %6242 = vmatprep.mubr.f32.mxu0 %v4947_v36  ;;  %v7811_v36 = vld [vmem:[%s10384_s3 + $0x8] sm:$0xff]  ;;  %v4981_v39 = vld [vmem:[%s7444_s20 + $0x3f0] sm:$0xff] }
 0x10e   : > { %6889 = vmatprep.subr.bf16.mxu0 %v7479_v21 }
 0x10f   : > { %v5557_v41 = vpop.f32.mrb[2].mxu0  ;;  %v6448_v42 = vpack.c.bf16 %v428_v38, %v423_v40 }
 0x110   : > { %v438_v44 = vadd.f32 %v5557_v41, %v7763_v12  ;;  %v432_v45 = vpop.f32.mrb[3].mxu0  ;;  %6243 = vmatmul.mubr.f32.gmra.mrb[108].mxu0 %v4948_v15  ;;  %v7818_v41 = vld [vmem:[%s10384_s3 + $0x10] sm:$0xff] }
 0x111   : > { %v433_v46 = vadd.f32 %v7763_v12, %v432_v45  ;;  %6449 = vmatprep.subr.bf16.mxu1 %v6448_v42  ;;  %6891 = vmatpush3.bf16.msra.mxu0 %v7479_v21  ;;  %v4968_v21 = vld [vmem:[%s7444_s20 + $0x388] sm:$0xff] }
 0x112   : > { %6451 = vmatpush3.bf16.msra.mxu1 %v6448_v42  ;;  %6245 = vmatprep.mubr.f32.mxu0 %v4949_v43  ;;  %v4982_v43 = vld [vmem:[%s7444_s20 + $0x3f8] sm:$0xff]  ;;  %s272_s20 = sand.u32 1, %s7305_s25  }
 0x113   : > { %v6452_v18 = vpack.c.bf16 %v438_v44, %v433_v46  ;;  %v5560_v48 = vpop.f32.mrb[4].mxu0  ;;  %6893 = vmatprep.subr.bf16.mxu0 %v7489_v24  ;;  %v7826_v44 = vld [vmem:[%s10384_s3 + $0x18] sm:$0xff]  ;;  %s4768_s16 = sshll.u32 %s272_s20, 10  ;;  %s10340_s9 = scalar_lea.sflag [#allocation3], %s272_s20 }
 0x114   : > { %v448_v50 = vadd.f32 %v5560_v48, %v7763_v12  ;;  %v442_v51 = vpop.f32.mrb[5].mxu0  ;;  %6246 = vmatmul.mubr.f32.gmra.mrb[110].mxu0 %v4950_v47  ;;  %v7832_v47 = vld [vmem:[%s10384_s3 + $0x20] sm:$0xff]  ;;  %s9162_s19 = scalar_lea.vmem [#allocation2], %s4768_s16 }
 0x115   : > { %v443_v52 = vadd.f32 %v7763_v12, %v442_v51  ;;  %6453 = vmatprep.subr.bf16.mxu1 %v6452_v18  ;;  %6895 = vmatpush3.bf16.msra.mxu0 %v7489_v24  ;;  %s4702_s22 = sshll.u32 %s9162_s19, 4  ;;  %s10335_s22 = int_to_ptr.vmem [resolvable:$true] %s4702_s22 }
 0x116   : > { %6455 = vmatpush3.bf16.msra.mxu1 %v6452_v18  ;;  %6336 = vmatprep.mubr.f32.mxu0 %v4967_v49  ;;  %s7251_s28 = scalar_lea.vmem %s10335_s22, 16384  ;;  %p7258_p0 = scmp.lt.s32.totalorder %s10335_s22, %s7256_s14 }
 0x117   : > { %v6456_v54 = vpack.c.bf16 %v448_v50, %v443_v52  ;;  %v5563_v55 = vpop.f32.mrb[6].mxu0  ;;  %v7841_v50 = vld [vmem:[%s10384_s3 + $0x28] sm:$0xff]  ;;  %p7252_p11 = scmp.ne.s32.totalorder %s10335_s22, %s7251_s28  ;;  %p7259_p1 = scmp.lt.s32.totalorder %s7257_s15, %s7251_s28 }
 0x118   : > { %v458_v56 = vadd.f32 %v5563_v55, %v7763_v12  ;;  %v452_v57 = vpop.f32.mrb[7].mxu0  ;;  %6337 = vmatmul.mubr.f32.vlgmr.msra.gmra.mrb[112].mxu0 %v4968_v21  ;;  %v7846_v21 = vld [vmem:[%s10384_s3 + $0x30] sm:$0xff] }
 0x119   : > { %v453_v58 = vadd.f32 %v7763_v12, %v452_v57  ;;  %6457 = vmatprep.subr.bf16.mxu1 %v6456_v54  ;;  %6339 = vmatprep.mubr.f32.mxu0 %v4969_v53  ;;  %p7253_p12 = pnand %p7252_p11, %p7397_p5  ;;  %p7260_p2 = por %p7259_p1, %p7258_p0 }
 0x11a   : > { %6459 = vmatpush3.bf16.msra.mxu1 %v6456_v54 }
 0x11b   : > { %v6460_v24 = vpack.c.bf16 %v458_v56, %v453_v58  ;;  %v5566_v61 = vpop.f32.mrb[8].mxu0  ;;  %v7855_v56 = vld [vmem:[%s10384_s3 + $0x38] sm:$0xff]  ;;  %p7254_p13 = pneg %p7253_p12 }
 0x11c   : > { %v468_v62 = vadd.f32 %v5566_v61, %v7763_v12  ;;  %v462_v63 = vpop.f32.mrb[9].mxu0  ;;  %6340 = vmatmul.mubr.f32.gmra.mrb[114].mxu0 %v4970_v59  ;;  %v7860_v59 = vld [vmem:[%s10384_s3 + $0x40] sm:$0xff] }
 0x11d   : > { %v463_v0 = vadd.f32 %v7763_v12, %v462_v63  ;;  %6461 = vmatprep.subr.bf16.mxu1 %v6460_v24  ;;  %6342 = vmatprep.mubr.f32.mxu0 %v4971_v60  ;;  %p7261_p3 = pnand %p7260_p2, %p7254_p13 }
 0x11e   : > { %6463 = vmatpush3.bf16.msra.mxu1 %v6460_v24 }
 0x11f   : > { %v6464_v4 = vpack.c.bf16 %v468_v62, %v463_v0  ;;  %v5569_v6 = vpop.f32.mrb[10].mxu0  ;;  %v7869_v62 = vld [vmem:[%s10384_s3 + $0x48] sm:$0xff] }
 0x120   : > { %v478_v7 = vadd.f32 %v5569_v6, %v7763_v12  ;;  %v472_v9 = vpop.f32.mrb[11].mxu0  ;;  %6343 = vmatmul.mubr.f32.gmra.mrb[116].mxu0 %v4972_v1  ;;  %v7874_v1 = vld [vmem:[%s10384_s3 + $0x50] sm:$0xff] }
 0x121   : > { %v473_v10 = vadd.f32 %v7763_v12, %v472_v9  ;;  %6465 = vmatprep.subr.bf16.mxu1 %v6464_v4  ;;  %6345 = vmatprep.mubr.f32.mxu0 %v4973_v2 }
 0x122   : > { %6467 = vmatpush3.bf16.msra.mxu1 %v6464_v4 }
 0x123   : > { %v6468_v14 = vpack.c.bf16 %v478_v7, %v473_v10  ;;  %v5572_v16 = vpop.f32.mrb[12].mxu0  ;;  %v7883_v7 = vld [vmem:[%s10384_s3 + $0x58] sm:$0xff] }
 0x124   : > { %v488_v17 = vadd.f32 %v5572_v16, %v7763_v12  ;;  %v482_v19 = vpop.f32.mrb[13].mxu0  ;;  %6346 = vmatmul.mubr.f32.gmra.mrb[118].mxu0 %v4974_v11  ;;  %v7888_v11 = vld [vmem:[%s10384_s3 + $0x60] sm:$0xff] }
 0x125   : > { %v483_v20 = vadd.f32 %v7763_v12, %v482_v19  ;;  %6469 = vmatprep.subr.bf16.mxu1 %v6468_v14  ;;  %6348 = vmatprep.mubr.f32.mxu0 %v4975_v13 }
 0x126   : > { %6471 = vmatpush3.bf16.msra.mxu1 %v6468_v14 }
 0x127   : > { %v6472_v3 = vpack.c.bf16 %v488_v17, %v483_v20  ;;  %v5575_v25 = vpop.f32.mrb[14].mxu0  ;;  %v7897_v17 = vld [vmem:[%s10384_s3 + $0x68] sm:$0xff] }
 0x128   : > { %v498_v26 = vadd.f32 %v5575_v25, %v7763_v12  ;;  %v492_v27 = vpop.f32.mrb[15].mxu0  ;;  %6349 = vmatmul.mubr.f32.gmra.mrb[120].mxu0 %v4976_v22  ;;  %v7902_v22 = vld [vmem:[%s10384_s3 + $0x70] sm:$0xff] }
 0x129   : > { %v493_v5 = vadd.f32 %v7763_v12, %v492_v27  ;;  %6473 = vmatprep.subr.bf16.mxu1 %v6472_v3  ;;  %6351 = vmatprep.mubr.f32.mxu0 %v4977_v23 }
 0x12a   : > { %6475 = vmatpush3.bf16.msra.mxu1 %v6472_v3 }
 0x12b   : > { %v6476_v30 = vpack.c.bf16 %v498_v26, %v493_v5  ;;  %v5666_v8 = vpop.f32.mrb[16].mxu0  ;;  %v7911_v26 = vld [vmem:[%s10384_s3 + $0x78] sm:$0xff] }
 0x12c   : > { %v1052_v32 = vadd.f32 %v5666_v8, %v7763_v12  ;;  %v1046_v33 = vpop.f32.mrb[17].mxu0  ;;  %6352 = vmatmul.mubr.f32.gmra.mrb[122].mxu0 %v4978_v28 }
 0x12d   : > { %v1047_v34 = vadd.f32 %v7763_v12, %v1046_v33  ;;  %6477 = vmatprep.subr.bf16.mxu1 %v6476_v30  ;;  %6354 = vmatprep.mubr.f32.mxu0 %v4979_v29 }
 0x12e   : > { %6479 = vmatpush3.bf16.msra.mxu1 %v6476_v30 }
 0x12f   : > { %v6512_v37 = vpack.c.bf16 %v1052_v32, %v1047_v34  ;;  %v5669_v38 = vpop.f32.mrb[18].mxu0 }
 0x130   : > { %v1062_v40 = vadd.f32 %v5669_v38, %v7763_v12  ;;  %v1056_v15 = vpop.f32.mrb[19].mxu0  ;;  %6355 = vmatmul.mubr.f32.gmra.mrb[124].mxu0 %v4980_v35 }
 0x131   : > { %v1057_v42 = vadd.f32 %v7763_v12, %v1056_v15  ;;  %5609 = vmatmul.mubr.f32.vlgmr.msra.gmra.mrb[0].mxu1 %v7811_v36  ;;  %6513 = vmatprep.subr.bf16.mxu1 %v6512_v37 }
 0x132   : > { %6515 = vmatpush3.bf16.msra.mxu1 %v6512_v37  ;;  %6357 = vmatprep.mubr.f32.mxu0 %v4981_v39 }
 0x133   : > { %v6516_v45 = vpack.c.bf16 %v1062_v40, %v1057_v42  ;;  %v5672_v46 = vpop.f32.mrb[20].mxu0  ;;  %5611 = vmatprep.mubr.f32.mxu1 %v7818_v41 }
 0x134   : > { %v1072_v18 = vadd.f32 %v5672_v46, %v7763_v12  ;;  %v1066_v48 = vpop.f32.mrb[21].mxu0  ;;  %6358 = vmatmul.mubr.f32.gmra.mrb[126].mxu0 %v4982_v43 }
 0x135   : > { %v1067_v49 = vadd.f32 %v7763_v12, %v1066_v48  ;;  %5612 = vmatmul.mubr.f32.gmra.mrb[2].mxu1 %v7826_v44  ;;  %6517 = vmatprep.subr.bf16.mxu1 %v6516_v45 }
 0x136   : > { %6519 = vmatpush3.bf16.msra.mxu1 %v6516_v45  ;;  %5614 = vmatprep.mubr.f32.mxu1 %v7832_v47 }
 0x137   : > { %v6520_v51 = vpack.c.bf16 %v1072_v18, %v1067_v49  ;;  %v5675_v52 = vpop.f32.mrb[22].mxu0 }
 0x138   : > { %v1082_v53 = vadd.f32 %v5675_v52, %v7763_v12  ;;  %v1076_v54 = vpop.f32.mrb[23].mxu0 }
 0x139   : > { %v1077_v55 = vadd.f32 %v7763_v12, %v1076_v54  ;;  %5615 = vmatmul.mubr.f32.gmra.mrb[4].mxu1 %v7841_v50  ;;  %6521 = vmatprep.subr.bf16.mxu1 %v6520_v51 }
 0x13a   : > { %6523 = vmatpush3.bf16.msra.mxu1 %v6520_v51  ;;  %5617 = vmatprep.mubr.f32.mxu1 %v7846_v21 }
 0x13b   : > { %v6524_v57 = vpack.c.bf16 %v1082_v53, %v1077_v55  ;;  %v5678_v58 = vpop.f32.mrb[24].mxu0 }
 0x13c   : > { %v1092_v60 = vadd.f32 %v5678_v58, %v7763_v12  ;;  %v1086_v24 = vpop.f32.mrb[25].mxu0 }
 0x13d   : > { %v1087_v61 = vadd.f32 %v7763_v12, %v1086_v24  ;;  %5618 = vmatmul.mubr.f32.gmra.mrb[6].mxu1 %v7855_v56  ;;  %6525 = vmatprep.subr.bf16.mxu1 %v6524_v57 }
 0x13e   : > { %6527 = vmatpush3.bf16.msra.mxu1 %v6524_v57  ;;  %5620 = vmatprep.mubr.f32.mxu1 %v7860_v59 }
 0x13f   : > { %v6528_v63 = vpack.c.bf16 %v1092_v60, %v1087_v61  ;;  %v5681_v0 = vpop.f32.mrb[26].mxu0 }
 0x140   : > { %v1102_v2 = vadd.f32 %v5681_v0, %v7763_v12  ;;  %v1096_v4 = vpop.f32.mrb[27].mxu0 }
 0x141   : > { %v1097_v6 = vadd.f32 %v7763_v12, %v1096_v4  ;;  %5621 = vmatmul.mubr.f32.gmra.mrb[8].mxu1 %v7869_v62  ;;  %6529 = vmatprep.subr.bf16.mxu1 %v6528_v63 }
 0x142   : > { %6531 = vmatpush3.bf16.msra.mxu1 %v6528_v63  ;;  %5623 = vmatprep.mubr.f32.mxu1 %v7874_v1 }
 0x143   : > { %v6532_v9 = vpack.c.bf16 %v1102_v2, %v1097_v6  ;;  %v5684_v10 = vpop.f32.mrb[28].mxu0 }
 0x144   : > { %v1112_v13 = vadd.f32 %v5684_v10, %v7763_v12  ;;  %v1106_v14 = vpop.f32.mrb[29].mxu0 }
 0x145   : > { %v1107_v16 = vadd.f32 %v7763_v12, %v1106_v14  ;;  %5624 = vmatmul.mubr.f32.gmra.mrb[10].mxu1 %v7883_v7  ;;  %6533 = vmatprep.subr.bf16.mxu1 %v6532_v9 }
 0x146   : > { %6535 = vmatpush3.bf16.msra.mxu1 %v6532_v9  ;;  %5626 = vmatprep.mubr.f32.mxu1 %v7888_v11 }
 0x147   : > { %v6536_v19 = vpack.c.bf16 %v1112_v13, %v1107_v16  ;;  %v5687_v20 = vpop.f32.mrb[30].mxu0 }
 0x148   : > { %v1122_v23 = vadd.f32 %v5687_v20, %v7763_v12  ;;  %v1116_v3 = vpop.f32.mrb[31].mxu0 }
 0x149   : > { %v1117_v25 = vadd.f32 %v7763_v12, %v1116_v3  ;;  %5627 = vmatmul.mubr.f32.gmra.mrb[12].mxu1 %v7897_v17  ;;  %6537 = vmatprep.subr.bf16.mxu1 %v6536_v19 }
 0x14a   : > { %6539 = vmatpush3.bf16.msra.mxu1 %v6536_v19  ;;  %5629 = vmatprep.mubr.f32.mxu1 %v7902_v22 }
 0x14b   : > { %v6540_v27 = vpack.c.bf16 %v1122_v23, %v1117_v25  ;;  %v5778_v5 = vpop.f32.mrb[32].mxu0 }
 0x14c   : > { %v1584_v28 = vadd.f32 %v5778_v5, %v7763_v12  ;;  %v1578_v29 = vpop.f32.mrb[33].mxu0 }
 0x14d   : > { %v1579_v30 = vadd.f32 %v7763_v12, %v1578_v29  ;;  %5630 = vmatmul.mubr.f32.gmra.mrb[14].mxu1 %v7911_v26  ;;  %6541 = vmatprep.subr.bf16.mxu1 %v6540_v27 }
 0x14e   : > { %6543 = vmatpush3.bf16.msra.mxu1 %v6540_v27  ;;  %5720 = vmatprep.mubr.f32.mxu1 %v7620_v31 }
 0x14f   : > { %v6576_v8 = vpack.c.bf16 %v1584_v28, %v1579_v30  ;;  %v5781_v32 = vpop.f32.mrb[34].mxu0 }
 0x150   : > { %v1594_v33 = vadd.f32 %v5781_v32, %v7763_v12  ;;  %v1588_v34 = vpop.f32.mrb[35].mxu0 }
 0x151   : > { %v1589_v35 = vadd.f32 %v7763_v12, %v1588_v34  ;;  %5721 = vmatmul.mubr.f32.vlgmr.msra.gmra.mrb[16].mxu1 %v7811_v36  ;;  %6577 = vmatprep.subr.bf16.mxu1 %v6576_v8 }
 0x152   : > { %6579 = vmatpush3.bf16.msra.mxu1 %v6576_v8  ;;  %5723 = vmatprep.mubr.f32.mxu1 %v7818_v41 }
 0x153   : > { %v6580_v37 = vpack.c.bf16 %v1594_v33, %v1589_v35  ;;  %v5784_v38 = vpop.f32.mrb[36].mxu0 }
 0x154   : > { %v1604_v39 = vadd.f32 %v5784_v38, %v7763_v12  ;;  %v1598_v40 = vpop.f32.mrb[37].mxu0 }
 0x155   : > { %v1599_v15 = vadd.f32 %v7763_v12, %v1598_v40  ;;  %5724 = vmatmul.mubr.f32.gmra.mrb[18].mxu1 %v7826_v44  ;;  %6581 = vmatprep.subr.bf16.mxu1 %v6580_v37 }
 0x156   : > { %6583 = vmatpush3.bf16.msra.mxu1 %v6580_v37  ;;  %5726 = vmatprep.mubr.f32.mxu1 %v7832_v47 }
 0x157   : > { %v6584_v42 = vpack.c.bf16 %v1604_v39, %v1599_v15  ;;  %v5787_v43 = vpop.f32.mrb[38].mxu0 }
 0x158   : > { %v1614_v45 = vadd.f32 %v5787_v43, %v7763_v12  ;;  %v1608_v46 = vpop.f32.mrb[39].mxu0 }
 0x159   : > { %v1609_v18 = vadd.f32 %v7763_v12, %v1608_v46  ;;  %5727 = vmatmul.mubr.f32.gmra.mrb[20].mxu1 %v7841_v50  ;;  %6585 = vmatprep.subr.bf16.mxu1 %v6584_v42 }
 0x15a   : > { %6587 = vmatpush3.bf16.msra.mxu1 %v6584_v42  ;;  %5729 = vmatprep.mubr.f32.mxu1 %v7846_v21 }
 0x15b   : > { %v6588_v48 = vpack.c.bf16 %v1614_v45, %v1609_v18  ;;  %v5790_v49 = vpop.f32.mrb[40].mxu0 }
 0x15c   : > { %v1624_v51 = vadd.f32 %v5790_v49, %v7763_v12  ;;  %v1618_v52 = vpop.f32.mrb[41].mxu0 }
 0x15d   : > { %v1619_v53 = vadd.f32 %v7763_v12, %v1618_v52  ;;  %5730 = vmatmul.mubr.f32.gmra.mrb[22].mxu1 %v7855_v56  ;;  %6589 = vmatprep.subr.bf16.mxu1 %v6588_v48 }
 0x15e   : > { %6591 = vmatpush3.bf16.msra.mxu1 %v6588_v48  ;;  %5732 = vmatprep.mubr.f32.mxu1 %v7860_v59 }
 0x15f   : > { %v6592_v54 = vpack.c.bf16 %v1624_v51, %v1619_v53  ;;  %v5793_v55 = vpop.f32.mrb[42].mxu0 }
 0x160   : > { %v1634_v57 = vadd.f32 %v5793_v55, %v7763_v12  ;;  %v1628_v58 = vpop.f32.mrb[43].mxu0 }
 0x161   : > { %v1629_v60 = vadd.f32 %v7763_v12, %v1628_v58  ;;  %5733 = vmatmul.mubr.f32.gmra.mrb[24].mxu1 %v7869_v62  ;;  %6593 = vmatprep.subr.bf16.mxu1 %v6592_v54 }
 0x162   : > { %6595 = vmatpush3.bf16.msra.mxu1 %v6592_v54  ;;  %5735 = vmatprep.mubr.f32.mxu1 %v7874_v1 }
 0x163   : > { %v6596_v24 = vpack.c.bf16 %v1634_v57, %v1629_v60  ;;  %v5796_v61 = vpop.f32.mrb[44].mxu0 }
 0x164   : > { %v1644_v63 = vadd.f32 %v5796_v61, %v7763_v12  ;;  %v1638_v0 = vpop.f32.mrb[45].mxu0 }
 0x165   : > { %v1639_v2 = vadd.f32 %v7763_v12, %v1638_v0  ;;  %5736 = vmatmul.mubr.f32.gmra.mrb[26].mxu1 %v7883_v7  ;;  %6597 = vmatprep.subr.bf16.mxu1 %v6596_v24 }
 0x166   : > { %6599 = vmatpush3.bf16.msra.mxu1 %v6596_v24  ;;  %5738 = vmatprep.mubr.f32.mxu1 %v7888_v11 }
 0x167   : > { %v6600_v4 = vpack.c.bf16 %v1644_v63, %v1639_v2  ;;  %v5799_v6 = vpop.f32.mrb[46].mxu0 }
 0x168   : > { %v1654_v9 = vadd.f32 %v5799_v6, %v7763_v12  ;;  %v1648_v10 = vpop.f32.mrb[47].mxu0 }
 0x169   : > { %v1649_v13 = vadd.f32 %v7763_v12, %v1648_v10  ;;  %5739 = vmatmul.mubr.f32.gmra.mrb[28].mxu1 %v7897_v17  ;;  %6601 = vmatprep.subr.bf16.mxu1 %v6600_v4 }
 0x16a   : > { %6603 = vmatpush3.bf16.msra.mxu1 %v6600_v4  ;;  %5741 = vmatprep.mubr.f32.mxu1 %v7902_v22 }
 0x16b   : > { %v6604_v14 = vpack.c.bf16 %v1654_v9, %v1649_v13  ;;  %v5890_v16 = vpop.f32.mrb[48].mxu0 }
 0x16c   : > { %v2116_v19 = vadd.f32 %v5890_v16, %v7763_v12  ;;  %v2110_v20 = vpop.f32.mrb[49].mxu0 }
 0x16d   : > { %v2111_v23 = vadd.f32 %v7763_v12, %v2110_v20  ;;  %5742 = vmatmul.mubr.f32.gmra.mrb[30].mxu1 %v7911_v26  ;;  %6605 = vmatprep.subr.bf16.mxu1 %v6604_v14 }
 0x16e   : > { %6607 = vmatpush3.bf16.msra.mxu1 %v6604_v14  ;;  %5832 = vmatprep.mubr.f32.mxu1 %v7620_v31 }
 0x16f   : > { %v6640_v3 = vpack.c.bf16 %v2116_v19, %v2111_v23  ;;  %v5893_v25 = vpop.f32.mrb[50].mxu0 }
 0x170   : > { %v2126_v27 = vadd.f32 %v5893_v25, %v7763_v12  ;;  %v2120_v5 = vpop.f32.mrb[51].mxu0 }
 0x171   : > { %v2121_v28 = vadd.f32 %v7763_v12, %v2120_v5  ;;  %5833 = vmatmul.mubr.f32.vlgmr.msra.gmra.mrb[32].mxu1 %v7811_v36  ;;  %6641 = vmatprep.subr.bf16.mxu1 %v6640_v3 }
 0x172   : > { %6643 = vmatpush3.bf16.msra.mxu1 %v6640_v3  ;;  %5835 = vmatprep.mubr.f32.mxu1 %v7818_v41 }
 0x173   : > { %v6644_v29 = vpack.c.bf16 %v2126_v27, %v2121_v28  ;;  %v5896_v30 = vpop.f32.mrb[52].mxu0 }
 0x174   : > { %v2136_v8 = vadd.f32 %v5896_v30, %v7763_v12  ;;  %v2130_v32 = vpop.f32.mrb[53].mxu0 }
 0x175   : > { %v2131_v33 = vadd.f32 %v7763_v12, %v2130_v32  ;;  %5836 = vmatmul.mubr.f32.gmra.mrb[34].mxu1 %v7826_v44  ;;  %6645 = vmatprep.subr.bf16.mxu1 %v6644_v29 }
 0x176   : > { %6647 = vmatpush3.bf16.msra.mxu1 %v6644_v29  ;;  %5838 = vmatprep.mubr.f32.mxu1 %v7832_v47 }
 0x177   : > { %v6648_v34 = vpack.c.bf16 %v2136_v8, %v2131_v33  ;;  %v5899_v35 = vpop.f32.mrb[54].mxu0 }
 0x178   : > { %v2146_v37 = vadd.f32 %v5899_v35, %v7763_v12  ;;  %v2140_v38 = vpop.f32.mrb[55].mxu0 }
 0x179   : > { %v2141_v39 = vadd.f32 %v7763_v12, %v2140_v38  ;;  %5839 = vmatmul.mubr.f32.gmra.mrb[36].mxu1 %v7841_v50  ;;  %6649 = vmatprep.subr.bf16.mxu1 %v6648_v34 }
 0x17a   : > { %6651 = vmatpush3.bf16.msra.mxu1 %v6648_v34  ;;  %5841 = vmatprep.mubr.f32.mxu1 %v7846_v21 }
 0x17b   : > { %v6652_v40 = vpack.c.bf16 %v2146_v37, %v2141_v39  ;;  %v5902_v15 = vpop.f32.mrb[56].mxu0 }
 0x17c   : > { %v2156_v42 = vadd.f32 %v5902_v15, %v7763_v12  ;;  %v2150_v43 = vpop.f32.mrb[57].mxu0 }
 0x17d   : > { %v2151_v45 = vadd.f32 %v7763_v12, %v2150_v43  ;;  %5842 = vmatmul.mubr.f32.gmra.mrb[38].mxu1 %v7855_v56  ;;  %6653 = vmatprep.subr.bf16.mxu1 %v6652_v40 }
 0x17e   : > { %6655 = vmatpush3.bf16.msra.mxu1 %v6652_v40  ;;  %5844 = vmatprep.mubr.f32.mxu1 %v7860_v59 }
 0x17f   : > { %v6656_v46 = vpack.c.bf16 %v2156_v42, %v2151_v45  ;;  %v5905_v18 = vpop.f32.mrb[58].mxu0 }
 0x180   : > { %v2166_v48 = vadd.f32 %v5905_v18, %v7763_v12  ;;  %v2160_v49 = vpop.f32.mrb[59].mxu0 }
 0x181   : > { %v2161_v51 = vadd.f32 %v7763_v12, %v2160_v49  ;;  %5845 = vmatmul.mubr.f32.gmra.mrb[40].mxu1 %v7869_v62  ;;  %6657 = vmatprep.subr.bf16.mxu1 %v6656_v46 }
 0x182   : > { %6659 = vmatpush3.bf16.msra.mxu1 %v6656_v46  ;;  %5847 = vmatprep.mubr.f32.mxu1 %v7874_v1 }
 0x183   : > { %v6660_v52 = vpack.c.bf16 %v2166_v48, %v2161_v51  ;;  %v5908_v53 = vpop.f32.mrb[60].mxu0 }
 0x184   : > { %v2176_v54 = vadd.f32 %v5908_v53, %v7763_v12  ;;  %v2170_v55 = vpop.f32.mrb[61].mxu0 }
 0x185   : > { %v2171_v57 = vadd.f32 %v7763_v12, %v2170_v55  ;;  %5848 = vmatmul.mubr.f32.gmra.mrb[42].mxu1 %v7883_v7  ;;  %6661 = vmatprep.subr.bf16.mxu1 %v6660_v52 }
 0x186   : > { %6663 = vmatpush3.bf16.msra.mxu1 %v6660_v52  ;;  %5850 = vmatprep.mubr.f32.mxu1 %v7888_v11 }
 0x187   : > { %v6664_v58 = vpack.c.bf16 %v2176_v54, %v2171_v57  ;;  %v5911_v60 = vpop.f32.mrb[62].mxu0 }
 0x188   : > { %v2186_v24 = vadd.f32 %v5911_v60, %v7763_v12  ;;  %v2180_v61 = vpop.f32.mrb[63].mxu0 }
 0x189   : > { %v2181_v63 = vadd.f32 %v7763_v12, %v2180_v61  ;;  %5851 = vmatmul.mubr.f32.gmra.mrb[44].mxu1 %v7897_v17  ;;  %6665 = vmatprep.subr.bf16.mxu1 %v6664_v58 }
 0x18a   : > { %6667 = vmatpush3.bf16.msra.mxu1 %v6664_v58  ;;  %5853 = vmatprep.mubr.f32.mxu1 %v7902_v22 }
 0x18b   : > { %v6668_v0 = vpack.c.bf16 %v2186_v24, %v2181_v63  ;;  %v6002_v2 = vpop.f32.mrb[64].mxu0  ;;  %v8015_v24 = vld [vmem:[%s10384_s3] sm:$0xff] }
 0x18c   : > { %v2648_v4 = vadd.f32 %v6002_v2, %v7763_v12  ;;  %v2642_v6 = vpop.f32.mrb[65].mxu0 }
 0x18d   : > { %v2643_v9 = vadd.f32 %v7763_v12, %v2642_v6  ;;  %5854 = vmatmul.mubr.f32.gmra.mrb[46].mxu1 %v7911_v26  ;;  %6669 = vmatprep.subr.bf16.mxu1 %v6668_v0 }
 0x18e   : > { %6671 = vmatpush3.bf16.msra.mxu1 %v6668_v0  ;;  %5944 = vmatprep.mubr.f32.mxu1 %v7620_v31 }
 0x18f   : > { %v6704_v10 = vpack.c.bf16 %v2648_v4, %v2643_v9  ;;  %v6005_v13 = vpop.f32.mrb[66].mxu0 }
 0x190   : > { %v2658_v14 = vadd.f32 %v6005_v13, %v7763_v12  ;;  %v2652_v16 = vpop.f32.mrb[67].mxu0 }
 0x191   : > { %v2653_v19 = vadd.f32 %v7763_v12, %v2652_v16  ;;  %5945 = vmatmul.mubr.f32.vlgmr.msra.gmra.mrb[48].mxu1 %v7811_v36  ;;  %6705 = vmatprep.subr.bf16.mxu1 %v6704_v10 }
 0x192   : > { %6707 = vmatpush3.bf16.msra.mxu1 %v6704_v10  ;;  %5947 = vmatprep.mubr.f32.mxu1 %v7818_v41 }
 0x193   : > { %v6708_v20 = vpack.c.bf16 %v2658_v14, %v2653_v19  ;;  %v6008_v23 = vpop.f32.mrb[68].mxu0 }
 0x194   : > { %v2668_v3 = vadd.f32 %v6008_v23, %v7763_v12  ;;  %v2662_v25 = vpop.f32.mrb[69].mxu0 }
 0x195   : > { %v2663_v31 = vadd.f32 %v7763_v12, %v2662_v25  ;;  %5948 = vmatmul.mubr.f32.gmra.mrb[50].mxu1 %v7826_v44  ;;  %6709 = vmatprep.subr.bf16.mxu1 %v6708_v20 }
 0x196   : > { %6711 = vmatpush3.bf16.msra.mxu1 %v6708_v20  ;;  %5950 = vmatprep.mubr.f32.mxu1 %v7832_v47 }
 0x197   : > { %v6712_v27 = vpack.c.bf16 %v2668_v3, %v2663_v31  ;;  %v6011_v5 = vpop.f32.mrb[70].mxu0 }
 0x198   : > { %v2678_v28 = vadd.f32 %v6011_v5, %v7763_v12  ;;  %v2672_v29 = vpop.f32.mrb[71].mxu0 }
 0x199   : > { %v2673_v30 = vadd.f32 %v7763_v12, %v2672_v29  ;;  %5951 = vmatmul.mubr.f32.gmra.mrb[52].mxu1 %v7841_v50  ;;  %6713 = vmatprep.subr.bf16.mxu1 %v6712_v27 }
 0x19a   : > { %6715 = vmatpush3.bf16.msra.mxu1 %v6712_v27  ;;  %5953 = vmatprep.mubr.f32.mxu1 %v7846_v21 }
 0x19b   : > { %v6716_v8 = vpack.c.bf16 %v2678_v28, %v2673_v30  ;;  %v6014_v32 = vpop.f32.mrb[72].mxu0 }
 0x19c   : > { %v2688_v33 = vadd.f32 %v6014_v32, %v7763_v12  ;;  %v2682_v34 = vpop.f32.mrb[73].mxu0 }
 0x19d   : > { %v2683_v35 = vadd.f32 %v7763_v12, %v2682_v34  ;;  %5954 = vmatmul.mubr.f32.gmra.mrb[54].mxu1 %v7855_v56  ;;  %6717 = vmatprep.subr.bf16.mxu1 %v6716_v8 }
 0x19e   : > { %6719 = vmatpush3.bf16.msra.mxu1 %v6716_v8  ;;  %5956 = vmatprep.mubr.f32.mxu1 %v7860_v59 }
 0x19f   : > { %v6720_v37 = vpack.c.bf16 %v2688_v33, %v2683_v35  ;;  %v6017_v38 = vpop.f32.mrb[74].mxu0 }
 0x1a0   : > { %v2698_v39 = vadd.f32 %v6017_v38, %v7763_v12  ;;  %v2692_v40 = vpop.f32.mrb[75].mxu0 }
 0x1a1   : > { %v2693_v15 = vadd.f32 %v7763_v12, %v2692_v40  ;;  %5957 = vmatmul.mubr.f32.gmra.mrb[56].mxu1 %v7869_v62  ;;  %6721 = vmatprep.subr.bf16.mxu1 %v6720_v37 }
 0x1a2   : > { %6723 = vmatpush3.bf16.msra.mxu1 %v6720_v37  ;;  %5959 = vmatprep.mubr.f32.mxu1 %v7874_v1 }
 0x1a3   : > { %v6724_v42 = vpack.c.bf16 %v2698_v39, %v2693_v15  ;;  %v6020_v43 = vpop.f32.mrb[76].mxu0 }
 0x1a4   : > { %v2708_v45 = vadd.f32 %v6020_v43, %v7763_v12  ;;  %v2702_v46 = vpop.f32.mrb[77].mxu0 }
 0x1a5   : > { %v2703_v18 = vadd.f32 %v7763_v12, %v2702_v46  ;;  %5960 = vmatmul.mubr.f32.gmra.mrb[58].mxu1 %v7883_v7  ;;  %6725 = vmatprep.subr.bf16.mxu1 %v6724_v42 }
 0x1a6   : > { %6727 = vmatpush3.bf16.msra.mxu1 %v6724_v42  ;;  %5962 = vmatprep.mubr.f32.mxu1 %v7888_v11 }
 0x1a7   : > { %v6728_v48 = vpack.c.bf16 %v2708_v45, %v2703_v18  ;;  %v6023_v49 = vpop.f32.mrb[78].mxu0 }
 0x1a8   : > { %v2718_v51 = vadd.f32 %v6023_v49, %v7763_v12  ;;  %v2712_v52 = vpop.f32.mrb[79].mxu0 }
 0x1a9   : > { %v2713_v53 = vadd.f32 %v7763_v12, %v2712_v52  ;;  %5963 = vmatmul.mubr.f32.gmra.mrb[60].mxu1 %v7897_v17  ;;  %6729 = vmatprep.subr.bf16.mxu1 %v6728_v48 }
 0x1aa   : > { %6731 = vmatpush3.bf16.msra.mxu1 %v6728_v48  ;;  %5965 = vmatprep.mubr.f32.mxu1 %v7902_v22 }
 0x1ab   : > { %v6732_v54 = vpack.c.bf16 %v2718_v51, %v2713_v53  ;;  %v6114_v55 = vpop.f32.mrb[80].mxu0 }
 0x1ac   : > { %v3180_v57 = vadd.f32 %v6114_v55, %v7763_v12  ;;  %v3174_v58 = vpop.f32.mrb[81].mxu0 }
 0x1ad   : > { %v3175_v60 = vadd.f32 %v7763_v12, %v3174_v58  ;;  %5966 = vmatmul.mubr.f32.gmra.mrb[62].mxu1 %v7911_v26  ;;  %6733 = vmatprep.subr.bf16.mxu1 %v6732_v54 }
 0x1ae   : > { %6735 = vmatpush3.bf16.msra.mxu1 %v6732_v54  ;;  %6056 = vmatprep.mubr.f32.mxu1 %v8015_v24 }
 0x1af   : > { %v6768_v61 = vpack.c.bf16 %v3180_v57, %v3175_v60  ;;  %v6117_v63 = vpop.f32.mrb[82].mxu0 }
 0x1b0   : > { %v3190_v0 = vadd.f32 %v6117_v63, %v7763_v12  ;;  %v3184_v2 = vpop.f32.mrb[83].mxu0 }
 0x1b1   : > { %v3185_v4 = vadd.f32 %v7763_v12, %v3184_v2  ;;  %6057 = vmatmul.mubr.f32.vlgmr.msra.gmra.mrb[64].mxu1 %v7811_v36  ;;  %6769 = vmatprep.subr.bf16.mxu1 %v6768_v61 }
 0x1b2   : > { %6771 = vmatpush3.bf16.msra.mxu1 %v6768_v61  ;;  %6059 = vmatprep.mubr.f32.mxu1 %v7818_v41 }
 0x1b3   : > { %v6772_v6 = vpack.c.bf16 %v3190_v0, %v3185_v4  ;;  %v6120_v9 = vpop.f32.mrb[84].mxu0 }
 0x1b4   : > { %v3200_v10 = vadd.f32 %v6120_v9, %v7763_v12  ;;  %v3194_v13 = vpop.f32.mrb[85].mxu0 }
 0x1b5   : > { %v3195_v14 = vadd.f32 %v7763_v12, %v3194_v13  ;;  %6060 = vmatmul.mubr.f32.gmra.mrb[66].mxu1 %v7826_v44  ;;  %6773 = vmatprep.subr.bf16.mxu1 %v6772_v6 }
 0x1b6   : > { %6775 = vmatpush3.bf16.msra.mxu1 %v6772_v6  ;;  %6062 = vmatprep.mubr.f32.mxu1 %v7832_v47 }
 0x1b7   : > { %v6776_v16 = vpack.c.bf16 %v3200_v10, %v3195_v14  ;;  %v6123_v19 = vpop.f32.mrb[86].mxu0 }
 0x1b8   : > { %v3210_v20 = vadd.f32 %v6123_v19, %v7763_v12  ;;  %v3204_v23 = vpop.f32.mrb[87].mxu0 }
 0x1b9   : > { %v3205_v3 = vadd.f32 %v7763_v12, %v3204_v23  ;;  %6063 = vmatmul.mubr.f32.gmra.mrb[68].mxu1 %v7841_v50  ;;  %6777 = vmatprep.subr.bf16.mxu1 %v6776_v16 }
 0x1ba   : > { %6779 = vmatpush3.bf16.msra.mxu1 %v6776_v16  ;;  %6065 = vmatprep.mubr.f32.mxu1 %v7846_v21  ;;  %v8065_v16 = vld [vmem:[%s10383_s2] ss:$0 sm:$0xff] }
 0x1bb   : > { %v6780_v25 = vpack.c.bf16 %v3210_v20, %v3205_v3  ;;  %v6126_v31 = vpop.f32.mrb[88].mxu0 }
 0x1bc   : > { %v3220_v27 = vadd.f32 %v6126_v31, %v7763_v12  ;;  %v3214_v5 = vpop.f32.mrb[89].mxu0 }
 0x1bd   : > { %v3215_v28 = vadd.f32 %v7763_v12, %v3214_v5  ;;  %6066 = vmatmul.mubr.f32.gmra.mrb[70].mxu1 %v7855_v56  ;;  %6781 = vmatprep.subr.bf16.mxu1 %v6780_v25 }
 0x1be   : > { %6783 = vmatpush3.bf16.msra.mxu1 %v6780_v25  ;;  %6068 = vmatprep.mubr.f32.mxu1 %v7860_v59 }
 0x1bf   : > { %v6784_v29 = vpack.c.bf16 %v3220_v27, %v3215_v28  ;;  %v6129_v30 = vpop.f32.mrb[90].mxu0 }
 0x1c0   : > { %v3230_v8 = vadd.f32 %v6129_v30, %v7763_v12  ;;  %v3224_v32 = vpop.f32.mrb[91].mxu0 }
 0x1c1   : > { %v3225_v33 = vadd.f32 %v7763_v12, %v3224_v32  ;;  %6069 = vmatmul.mubr.f32.gmra.mrb[72].mxu1 %v7869_v62  ;;  %6785 = vmatprep.subr.bf16.mxu1 %v6784_v29 }
 0x1c2   : > { %6787 = vmatpush3.bf16.msra.mxu1 %v6784_v29  ;;  %6071 = vmatprep.mubr.f32.mxu1 %v7874_v1 }
 0x1c3   : > { %v6788_v34 = vpack.c.bf16 %v3230_v8, %v3225_v33  ;;  %v6132_v35 = vpop.f32.mrb[92].mxu0 }
 0x1c4   : > { %v3240_v37 = vadd.f32 %v6132_v35, %v7763_v12  ;;  %v3234_v38 = vpop.f32.mrb[93].mxu0 }
 0x1c5   : > { %v3235_v39 = vadd.f32 %v7763_v12, %v3234_v38  ;;  %6072 = vmatmul.mubr.f32.gmra.mrb[74].mxu1 %v7883_v7  ;;  %6789 = vmatprep.subr.bf16.mxu1 %v6788_v34 }
 0x1c6   : > { %6791 = vmatpush3.bf16.msra.mxu1 %v6788_v34  ;;  %6074 = vmatprep.mubr.f32.mxu1 %v7888_v11 }
 0x1c7   : > { %v6792_v40 = vpack.c.bf16 %v3240_v37, %v3235_v39  ;;  %v6135_v15 = vpop.f32.mrb[94].mxu0 }
 0x1c8   : > { %v3250_v42 = vadd.f32 %v6135_v15, %v7763_v12  ;;  %v3244_v43 = vpop.f32.mrb[95].mxu0 }
 0x1c9   : > { %v3245_v45 = vadd.f32 %v7763_v12, %v3244_v43  ;;  %6075 = vmatmul.mubr.f32.gmra.mrb[76].mxu1 %v7897_v17  ;;  %6793 = vmatprep.subr.bf16.mxu1 %v6792_v40 }
 0x1ca   : > { %6795 = vmatpush3.bf16.msra.mxu1 %v6792_v40  ;;  %6077 = vmatprep.mubr.f32.mxu1 %v7902_v22 }
 0x1cb   : > { %v6796_v46 = vpack.c.bf16 %v3250_v42, %v3245_v45  ;;  %v6226_v18 = vpop.f32.mrb[96].mxu0 }
 0x1cc   : > { %v3712_v48 = vadd.f32 %v6226_v18, %v7763_v12  ;;  %v3706_v49 = vpop.f32.mrb[97].mxu0 }
 0x1cd   : > { %v3707_v51 = vadd.f32 %v7763_v12, %v3706_v49  ;;  %6078 = vmatmul.mubr.f32.gmra.mrb[78].mxu1 %v7911_v26  ;;  %6797 = vmatprep.subr.bf16.mxu1 %v6796_v46 }
 0x1ce   : > { %6799 = vmatpush3.bf16.msra.mxu1 %v6796_v46  ;;  %6168 = vmatprep.mubr.f32.mxu1 %v8015_v24 }
 0x1cf   : > { %v6832_v52 = vpack.c.bf16 %v3712_v48, %v3707_v51  ;;  %v6229_v53 = vpop.f32.mrb[98].mxu0 }
 0x1d0   : > { %v3722_v54 = vadd.f32 %v6229_v53, %v7763_v12  ;;  %v3716_v55 = vpop.f32.mrb[99].mxu0 }
 0x1d1   : > { %v3717_v57 = vadd.f32 %v7763_v12, %v3716_v55  ;;  %6169 = vmatmul.mubr.f32.vlgmr.msra.gmra.mrb[80].mxu1 %v7811_v36  ;;  %6833 = vmatprep.subr.bf16.mxu1 %v6832_v52  ;;  %v8095_v55 = vpop.permute.xlu0 %503 }
 0x1d2   : > { %6835 = vmatpush3.bf16.msra.mxu1 %v6832_v52  ;;  %6171 = vmatprep.mubr.f32.mxu1 %v7818_v41 }
 0x1d3   : > { %v6836_v58 = vpack.c.bf16 %v3722_v54, %v3717_v57  ;;  %v6232_v60 = vpop.f32.mrb[100].mxu0 }
 0x1d4   : > { %v3732_v61 = vadd.f32 %v6232_v60, %v7763_v12  ;;  %v3726_v63 = vpop.f32.mrb[101].mxu0 }
 0x1d5   : > { %v3727_v0 = vadd.f32 %v7763_v12, %v3726_v63  ;;  %6172 = vmatmul.mubr.f32.gmra.mrb[82].mxu1 %v7826_v44  ;;  %6837 = vmatprep.subr.bf16.mxu1 %v6836_v58 }
 0x1d6   : > { %6839 = vmatpush3.bf16.msra.mxu1 %v6836_v58  ;;  %6174 = vmatprep.mubr.f32.mxu1 %v7832_v47 }
 0x1d7   : > { %v6840_v2 = vpack.c.bf16 %v3732_v61, %v3727_v0  ;;  %v6235_v4 = vpop.f32.mrb[102].mxu0 }
 0x1d8   : > { %v3742_v6 = vadd.f32 %v6235_v4, %v7763_v12  ;;  %v3736_v9 = vpop.f32.mrb[103].mxu0 }
 0x1d9   : > { %v3737_v10 = vadd.f32 %v7763_v12, %v3736_v9  ;;  %6175 = vmatmul.mubr.f32.gmra.mrb[84].mxu1 %v7841_v50  ;;  %6841 = vmatprep.subr.bf16.mxu1 %v6840_v2 }
 0x1da   : > { %6843 = vmatpush3.bf16.msra.mxu1 %v6840_v2  ;;  %6177 = vmatprep.mubr.f32.mxu1 %v7846_v21  ;;  %v8104_v2 = vpop.permute.xlu0 %508 }
 0x1db   : > { %v6844_v13 = vpack.c.bf16 %v3742_v6, %v3737_v10  ;;  %v6238_v14 = vpop.f32.mrb[104].mxu0 }
 0x1dc   : > { %v3752_v19 = vadd.f32 %v8065_v16, %v6238_v14  ;;  %v3746_v20 = vpop.f32.mrb[105].mxu0 }
 0x1dd   : > { %v3747_v23 = vadd.f32 %v8065_v16, %v3746_v20  ;;  %6178 = vmatmul.mubr.f32.gmra.mrb[86].mxu1 %v7855_v56  ;;  %6845 = vmatprep.subr.bf16.mxu1 %v6844_v13 }
 0x1de   : > { %6847 = vmatpush3.bf16.msra.mxu1 %v6844_v13  ;;  %6180 = vmatprep.mubr.f32.mxu1 %v7860_v59 }
 0x1df   : > { %v6848_v12 = vpack.c.bf16 %v3752_v19, %v3747_v23  ;;  %v6241_v3 = vpop.f32.mrb[106].mxu0 }
 0x1e0   : > { %v3762_v25 = vadd.f32 %v8065_v16, %v6241_v3  ;;  %v3756_v31 = vpop.f32.mrb[107].mxu0 }
 0x1e1   : > { %v3757_v27 = vadd.f32 %v8065_v16, %v3756_v31  ;;  %6181 = vmatmul.mubr.f32.gmra.mrb[88].mxu1 %v7869_v62  ;;  %6849 = vmatprep.subr.bf16.mxu1 %v6848_v12 }
 0x1e2   : > { %6851 = vmatpush3.bf16.msra.mxu1 %v6848_v12  ;;  %6183 = vmatprep.mubr.f32.mxu1 %v7874_v1 }
 0x1e3   : > { %v6852_v5 = vpack.c.bf16 %v3762_v25, %v3757_v27  ;;  %v6244_v28 = vpop.f32.mrb[108].mxu0 }
 0x1e4   : > { %v3772_v29 = vadd.f32 %v8065_v16, %v6244_v28  ;;  %v3766_v30 = vpop.f32.mrb[109].mxu0 }
 0x1e5   : > { %v3767_v8 = vadd.f32 %v8065_v16, %v3766_v30  ;;  %6184 = vmatmul.mubr.f32.gmra.mrb[90].mxu1 %v7883_v7  ;;  %6853 = vmatprep.subr.bf16.mxu1 %v6852_v5 }
 0x1e6   : > { %6855 = vmatpush3.bf16.msra.mxu1 %v6852_v5  ;;  %6186 = vmatprep.mubr.f32.mxu1 %v7888_v11 }
 0x1e7   : > { %v6856_v32 = vpack.c.bf16 %v3772_v29, %v3767_v8  ;;  %v6247_v33 = vpop.f32.mrb[110].mxu0 }
 0x1e8   : > { %v3782_v34 = vadd.f32 %v8065_v16, %v6247_v33  ;;  %v3776_v35 = vpop.f32.mrb[111].mxu0 }
 0x1e9   : > { %v3777_v37 = vadd.f32 %v8065_v16, %v3776_v35  ;;  %6187 = vmatmul.mubr.f32.gmra.mrb[92].mxu1 %v7897_v17  ;;  %6857 = vmatprep.subr.bf16.mxu1 %v6856_v32 }
 0x1ea   : > { %6859 = vmatpush3.bf16.msra.mxu1 %v6856_v32  ;;  %6189 = vmatprep.mubr.f32.mxu1 %v7902_v22 }
 0x1eb   : > { %v6860_v38 = vpack.c.bf16 %v3782_v34, %v3777_v37  ;;  %v6338_v39 = vpop.f32.mrb[112].mxu0 }
 0x1ec   : > { %v4244_v40 = vadd.f32 %v8065_v16, %v6338_v39  ;;  %v4238_v15 = vpop.f32.mrb[113].mxu0 }
 0x1ed   : > { %v4239_v42 = vadd.f32 %v8065_v16, %v4238_v15  ;;  %6190 = vmatmul.mubr.f32.gmra.mrb[94].mxu1 %v7911_v26  ;;  %6861 = vmatprep.subr.bf16.mxu1 %v6860_v38 }
 0x1ee   : > { %6863 = vmatpush3.bf16.msra.mxu1 %v6860_v38  ;;  %6280 = vmatprep.mubr.f32.mxu1 %v8015_v24 }
 0x1ef   : > { %v6896_v43 = vpack.c.bf16 %v4244_v40, %v4239_v42  ;;  %v6341_v45 = vpop.f32.mrb[114].mxu0 }
 0x1f0   : > { %v4254_v46 = vadd.f32 %v8065_v16, %v6341_v45  ;;  %v4248_v18 = vpop.f32.mrb[115].mxu0 }
 0x1f1   : > { %v4249_v48 = vadd.f32 %v8065_v16, %v4248_v18  ;;  %6281 = vmatmul.mubr.f32.vlgmr.msra.gmra.mrb[96].mxu1 %v7811_v36  ;;  %6897 = vmatprep.subr.bf16.mxu1 %v6896_v43 }
 0x1f2   : > { %6899 = vmatpush3.bf16.msra.mxu1 %v6896_v43  ;;  %6283 = vmatprep.mubr.f32.mxu1 %v7818_v41 }
 0x1f3   : > { %v6900_v49 = vpack.c.bf16 %v4254_v46, %v4249_v48  ;;  %v6344_v51 = vpop.f32.mrb[116].mxu0  ;;  %v7232_v46 = vld [vmem:[%s10384_s3 + $0x18] sm:$0xff] }
 0x1f4   : > { %v4264_v52 = vadd.f32 %v8065_v16, %v6344_v51  ;;  %v4258_v53 = vpop.f32.mrb[117].mxu0 }
 0x1f5   : > { %v4259_v54 = vadd.f32 %v8065_v16, %v4258_v53  ;;  %6284 = vmatmul.mubr.f32.gmra.mrb[98].mxu1 %v7826_v44  ;;  %6901 = vmatprep.subr.bf16.mxu1 %v6900_v49  ;;  %v8101_v44 = vpop.permute.xlu1 %513 }
 0x1f6   : > { %6903 = vmatpush3.bf16.msra.mxu1 %v6900_v49  ;;  %6286 = vmatprep.mubr.f32.mxu1 %v7832_v47  ;;  %v7233_v49 = vld [vmem:[%s10384_s3 + $0x20] sm:$0xff] }
 0x1f7   : > { %v6904_v36 = vpack.c.bf16 %v4264_v52, %v4259_v54  ;;  %v6347_v57 = vpop.f32.mrb[118].mxu0  ;;  %v7234_v54 = vld [vmem:[%s10384_s3 + $0x28] sm:$0xff] }
 0x1f8   : > { %v4274_v58 = vadd.f32 %v8065_v16, %v6347_v57  ;;  %v4268_v41 = vpop.f32.mrb[119].mxu0 }
 0x1f9   : > { %v4269_v60 = vadd.f32 %v8065_v16, %v4268_v41  ;;  %6287 = vmatmul.mubr.f32.gmra.mrb[100].mxu1 %v7841_v50  ;;  %6905 = vmatprep.subr.bf16.mxu1 %v6904_v36  ;;  %v8110_v10 = vpop.permute.xlu1 %518 }
 0x1fa   : > { %6907 = vmatpush3.bf16.msra.mxu1 %v6904_v36  ;;  %6289 = vmatprep.mubr.f32.mxu1 %v7846_v21  ;;  %10570 = vst [vmem:[#allocation5_spill] sm:$0xff] %v8110_v10 }
 0x1fb   : > { %v6908_v61 = vpack.c.bf16 %v4274_v58, %v4269_v60  ;;  %v6350_v63 = vpop.f32.mrb[120].mxu0  ;;  %v7235_v58 = vld [vmem:[%s10384_s3 + $0x30] sm:$0xff] }
 0x1fc   : > { %v4284_v47 = vadd.f32 %v8065_v16, %v6350_v63  ;;  %v4278_v0 = vpop.f32.mrb[121].mxu0  ;;  %v7236_v63 = vld [vmem:[%s10384_s3 + $0x38] sm:$0xff] }
 0x1fd   : > { %v4279_v4 = vadd.f32 %v8065_v16, %v4278_v0  ;;  %6290 = vmatmul.mubr.f32.gmra.mrb[102].mxu1 %v7855_v56  ;;  %6909 = vmatprep.subr.bf16.mxu1 %v6908_v61  ;;  %v8115_v56 = vpop.permute.xlu0 %523 }
 0x1fe   : > { %6911 = vmatpush3.bf16.msra.mxu1 %v6908_v61  ;;  %6292 = vmatprep.mubr.f32.mxu1 %v7860_v59  ;;  %10571 = vst [vmem:[#allocation6_spill] sm:$0xff] %v8115_v56 }
 0x1ff   : > { %v6912_v50 = vpack.c.bf16 %v4284_v47, %v4279_v4  ;;  %v6353_v6 = vpop.f32.mrb[122].mxu0  ;;  %v7237_v4 = vld [vmem:[%s10384_s3 + $0x40] sm:$0xff] }
 0x200   : > { %v4294_v21 = vadd.f32 %v8065_v16, %v6353_v6  ;;  %v4288_v9 = vpop.f32.mrb[123].mxu0 }
 0x201   : > { %v4289_v13 = vadd.f32 %v8065_v16, %v4288_v9  ;;  %6293 = vmatmul.mubr.f32.gmra.mrb[104].mxu1 %v7869_v62  ;;  %6913 = vmatprep.subr.bf16.mxu1 %v6912_v50 }
 0x202   : > { %6915 = vmatpush3.bf16.msra.mxu1 %v6912_v50  ;;  %6295 = vmatprep.mubr.f32.mxu1 %v7874_v1  ;;  %v8127_v1 = vpop.permute.xlu1 %528 }
 0x203   : > { %v6916_v14 = vpack.c.bf16 %v4294_v21, %v4289_v13  ;;  %v6356_v19 = vpop.f32.mrb[124].mxu0  ;;  %10572 = vst [vmem:[#allocation7_spill] sm:$0xff] %v8127_v1  ;;  %v7238_v13 = vld [vmem:[%s10384_s3 + $0x48] sm:$0xff] }
 0x204   : > { %v4304_v59 = vadd.f32 %v8065_v16, %v6356_v19  ;;  %v5610_v20 = vpop.f32.mrb[0].mxu1  ;;  %v4298_v23 = vpop.f32.mrb[125].mxu0 }
 0x205   : > { %v8119_v12 = vadd.f32 %v5610_v20, %v8104_v2  ;;  %v4299_v3 = vadd.f32 %v8065_v16, %v4298_v23  ;;  %v647_v25 = vpop.f32.mrb[1].mxu1  ;;  %6296 = vmatmul.mubr.f32.gmra.mrb[106].mxu1 %v7883_v7  ;;  %6917 = vmatprep.subr.bf16.mxu1 %v6916_v14  ;;  %v8132_v7 = vpop.permute.xlu0 %533 }
 0x206   : > { %v8124_v62 = vadd.f32 %v647_v25, %v8095_v55  ;;  %6919 = vmatpush3.bf16.msra.mxu1 %v6916_v14  ;;  %6298 = vmatprep.mubr.f32.mxu1 %v7888_v11  ;;  %v8141_v34 = vpop.permute.xlu1 %538  ;;  %v7240_v25 = vld [vmem:[%s10384_s3 + $0x58] sm:$0xff] }
 0x207   : > { %v6920_v31 = vpack.c.bf16 %v4304_v59, %v4299_v3  ;;  %v6359_v27 = vpop.f32.mrb[126].mxu0  ;;  %728 = vadd.xlane.f32.xlu1 %v8119_v12  ;;  %v7239_v59 = vld [vmem:[%s10384_s3 + $0x50] sm:$0xff] }
 0x208   : > { %v4314_v5 = vadd.f32 %v8065_v16, %v6359_v27  ;;  %v5613_v28 = vpop.f32.mrb[2].mxu1  ;;  %v4308_v29 = vpop.f32.mrb[127].mxu0  ;;  %726 = vadd.xlane.f32.xlu0 %v8124_v62 }
 0x209   : > { %v8135_v30 = vadd.f32 %v5613_v28, %v8110_v10  ;;  %v4309_v8 = vadd.f32 %v8065_v16, %v4308_v29  ;;  %v657_v11 = vpop.f32.mrb[3].mxu1  ;;  %6299 = vmatmul.mubr.f32.gmra.mrb[108].mxu1 %v7897_v17  ;;  %6921 = vmatprep.subr.bf16.mxu1 %v6920_v31  ;;  %v8151_v17 = vpop.permute.xlu0 %543 }
 0x20a   : > { %6923 = vmatpush3.bf16.msra.mxu1 %v6920_v31  ;;  %6301 = vmatprep.mubr.f32.mxu1 %v7902_v22  ;;  %v8145_v37 = vadd.f32 %v657_v11, %v8101_v44  ;;  %v8167_v15 = vpop.permute.xlu1 %548 }
 0x20b   : > { %v6924_v32 = vpack.c.bf16 %v4314_v5, %v4309_v8  ;;  %v7241_v5 = vld [vmem:[%s10384_s3 + $0x60] sm:$0xff]  ;;  %v7242_v8 = vld [vmem:[%s10384_s3 + $0x68] sm:$0xff] }
 0x20c   : > { %v5616_v33 = vpop.f32.mrb[4].mxu1  ;;  %732 = vadd.xlane.f32.xlu0 %v8135_v30 }
 0x20d   : > { %v667_v35 = vpop.f32.mrb[5].mxu1  ;;  %6302 = vmatmul.mubr.f32.gmra.mrb[110].mxu1 %v7911_v26  ;;  %6925 = vmatprep.subr.bf16.mxu1 %v6924_v32  ;;  %v7230_v26 = vld [vmem:[%s10384_s3 + $0x8] sm:$0xff]  ;;  %v8159_v39 = vadd.f32 %v5616_v33, %v8127_v1  ;;  %v8171_v43 = vpop.permute.xlu0 %553  ;;  %v7243_v33 = vld [vmem:[%s10384_s3 + $0x70] sm:$0xff] }
 0x20e   : > { %v8148_v16 = vadd.f32 %v667_v35, %v8115_v56  ;;  %6927 = vmatpush3.bf16.msra.mxu1 %v6924_v32  ;;  %6392 = vmatprep.mubr.f32.mxu1 %v8015_v24  ;;  %v7231_v24 = vld [vmem:[%s10384_s3 + $0x10] sm:$0xff]  ;;  %v8187_v52 = vpop.permute.xlu1 %558 }
 0x210   : > { %v5619_v22 = vpop.f32.mrb[6].mxu1  ;;  %734 = vadd.xlane.f32.xlu1 %v8148_v16  ;;  %730 = vadd.xlane.f32.xlu0 %v8145_v37 }
 0x211   : > { %v677_v38 = vpop.f32.mrb[7].mxu1  ;;  %6393 = vmatmul.mubr.f32.vlgmr.msra.gmra.mrb[112].mxu1 %v7230_v26  ;;  %v8177_v18 = vadd.f32 %v5619_v22, %v8141_v34  ;;  %v8201_v41 = vpop.permute.xlu0 %563 }
 0x212   : > { %v8162_v40 = vadd.f32 %v677_v38, %v8132_v7  ;;  %6395 = vmatprep.mubr.f32.mxu1 %v7231_v24  ;;  %v8217_v50 = vpop.permute.xlu1 %568  ;;  %v7244_v38 = vld [vmem:[%s10384_s3 + $0x78] sm:$0xff] }
 0x214   : > { %v5622_v42 = vpop.f32.mrb[8].mxu1  ;;  %738 = vadd.xlane.f32.xlu1 %v8162_v40  ;;  %736 = vadd.xlane.f32.xlu0 %v8159_v39 }
 0x215   : > { %v687_v45 = vpop.f32.mrb[9].mxu1  ;;  %6396 = vmatmul.mubr.f32.gmra.mrb[114].mxu1 %v7232_v46  ;;  %v8193_v36 = vadd.f32 %v5622_v42, %v8167_v15  ;;  %v8221_v21 = vpop.permute.xlu0 %573 }
 0x216   : > { %v8180_v48 = vadd.f32 %v687_v45, %v8151_v17  ;;  %6398 = vmatprep.mubr.f32.mxu1 %v7233_v49  ;;  %v8237_v23 = vpop.permute.xlu1 %578 }
 0x218   : > { %v5625_v51 = vpop.f32.mrb[10].mxu1  ;;  %742 = vadd.xlane.f32.xlu1 %v8180_v48  ;;  %740 = vadd.xlane.f32.xlu0 %v8177_v18 }
 0x219   : > { %v697_v53 = vpop.f32.mrb[11].mxu1  ;;  %6399 = vmatmul.mubr.f32.gmra.mrb[116].mxu1 %v7234_v54  ;;  %v8209_v47 = vadd.f32 %v5625_v51, %v8187_v52 }
 0x21a   : > { %v8196_v57 = vadd.f32 %v697_v53, %v8171_v43  ;;  %6401 = vmatprep.mubr.f32.mxu1 %v7235_v58 }
 0x21c   : > { %v5628_v60 = vpop.f32.mrb[12].mxu1  ;;  %746 = vadd.xlane.f32.xlu1 %v8196_v57  ;;  %744 = vadd.xlane.f32.xlu0 %v8193_v36 }
 0x21d   : > { %v707_v61 = vpop.f32.mrb[13].mxu1  ;;  %6402 = vmatmul.mubr.f32.gmra.mrb[118].mxu1 %v7236_v63  ;;  %v8227_v14 = vadd.f32 %v5628_v60, %v8217_v50 }
 0x21e   : > { %v8212_v0 = vadd.f32 %v707_v61, %v8201_v41  ;;  %6404 = vmatprep.mubr.f32.mxu1 %v7237_v4 }
 0x220   : > { %v5631_v6 = vpop.f32.mrb[14].mxu1  ;;  %750 = vadd.xlane.f32.xlu1 %v8212_v0  ;;  %748 = vadd.xlane.f32.xlu0 %v8209_v47 }
 0x221   : > { %v717_v9 = vpop.f32.mrb[15].mxu1  ;;  %6405 = vmatmul.mubr.f32.gmra.mrb[120].mxu1 %v7238_v13  ;;  %v8243_v31 = vadd.f32 %v5631_v6, %v8237_v23 }
 0x222   : > { %v8230_v19 = vadd.f32 %v717_v9, %v8221_v21  ;;  %6407 = vmatprep.mubr.f32.mxu1 %v7239_v59 }
 0x224   : > { %v5722_v20 = vpop.f32.mrb[16].mxu1  ;;  %754 = vadd.xlane.f32.xlu1 %v8230_v19  ;;  %752 = vadd.xlane.f32.xlu0 %v8227_v14 }
 0x225   : > { %v1191_v3 = vpop.f32.mrb[17].mxu1  ;;  %6408 = vmatmul.mubr.f32.gmra.mrb[122].mxu1 %v7240_v25  ;;  %v8257_v11 = vadd.f32 %v5722_v20, %v8104_v2 }
 0x226   : > { %v8246_v27 = vadd.f32 %v1191_v3, %v8095_v55  ;;  %6410 = vmatprep.mubr.f32.mxu1 %v7241_v5 }
 0x228   : > { %v5725_v28 = vpop.f32.mrb[18].mxu1  ;;  %1270 = vadd.xlane.f32.xlu1 %v8246_v27  ;;  %756 = vadd.xlane.f32.xlu0 %v8243_v31 }
 0x229   : > { %v1201_v29 = vpop.f32.mrb[19].mxu1  ;;  %6411 = vmatmul.mubr.f32.gmra.mrb[124].mxu1 %v7242_v8  ;;  %v8271_v26 = vadd.f32 %v5725_v28, %v8110_v10 }
 0x22a   : > { %v8260_v32 = vadd.f32 %v1201_v29, %v8101_v44  ;;  %6413 = vmatprep.mubr.f32.mxu1 %v7243_v33 }
 0x22c   : > { %v5728_v35 = vpop.f32.mrb[20].mxu1  ;;  %1274 = vadd.xlane.f32.xlu1 %v8260_v32  ;;  %1272 = vadd.xlane.f32.xlu0 %v8257_v11 }
 0x22d   : > { %v1211_v22 = vpop.f32.mrb[21].mxu1  ;;  %6414 = vmatmul.mubr.f32.gmra.mrb[126].mxu1 %v7244_v38  ;;  %v8279_v46 = vadd.f32 %v5728_v35, %v8127_v1 }
 0x22e   : > { %v8274_v24 = vadd.f32 %v1211_v22, %v8115_v56 }
 0x230   : > { %v5731_v42 = vpop.f32.mrb[22].mxu1  ;;  %1278 = vadd.xlane.f32.xlu1 %v8274_v24  ;;  %1276 = vadd.xlane.f32.xlu0 %v8271_v26 }
 0x231   : > { %v1221_v45 = vpop.f32.mrb[23].mxu1  ;;  %v8287_v54 = vadd.f32 %v5731_v42, %v8141_v34 }
 0x232   : > { %v8282_v49 = vadd.f32 %v1221_v45, %v8132_v7 }
 0x234   : > { %v5734_v51 = vpop.f32.mrb[24].mxu1  ;;  %1282 = vadd.xlane.f32.xlu1 %v8282_v49  ;;  %1280 = vadd.xlane.f32.xlu0 %v8279_v46 }
 0x235   : > { %v1231_v53 = vpop.f32.mrb[25].mxu1  ;;  %v8295_v63 = vadd.f32 %v5734_v51, %v8167_v15 }
 0x236   : > { %v8290_v58 = vadd.f32 %v1231_v53, %v8151_v17 }
 0x238   : > { %v5737_v60 = vpop.f32.mrb[26].mxu1  ;;  %1286 = vadd.xlane.f32.xlu1 %v8290_v58  ;;  %1284 = vadd.xlane.f32.xlu0 %v8287_v54 }
 0x239   : > { %v1241_v61 = vpop.f32.mrb[27].mxu1  ;;  %v8303_v13 = vadd.f32 %v5737_v60, %v8187_v52 }
 0x23a   : > { %v8298_v4 = vadd.f32 %v1241_v61, %v8171_v43 }
 0x23b   : > { %10574 = vst [vmem:[#allocation9_spill] sm:$0xff] %v8303_v13 }
 0x23c   : > { %10573 = vst [vmem:[#allocation8_spill] sm:$0xff] %v8298_v4  ;;  %v5740_v6 = vpop.f32.mrb[28].mxu1  ;;  %1290 = vadd.xlane.f32.xlu1 %v8298_v4  ;;  %1288 = vadd.xlane.f32.xlu0 %v8295_v63 }
 0x23d   : > { %v1251_v9 = vpop.f32.mrb[29].mxu1  ;;  %v8311_v25 = vadd.f32 %v5740_v6, %v8217_v50 }
 0x23e   : > { %v8306_v59 = vadd.f32 %v1251_v9, %v8201_v41 }
 0x23f   : > { %10576 = vst [vmem:[#allocation11_spill] sm:$0xff] %v8311_v25 }
 0x240   : > { %10575 = vst [vmem:[#allocation10_spill] sm:$0xff] %v8306_v59  ;;  %v5743_v20 = vpop.f32.mrb[30].mxu1  ;;  %1294 = vadd.xlane.f32.xlu1 %v8306_v59  ;;  %1292 = vadd.xlane.f32.xlu0 %v8303_v13 }
 0x241   : > { %v1261_v3 = vpop.f32.mrb[31].mxu1  ;;  %v8319_v8 = vadd.f32 %v5743_v20, %v8237_v23 }
 0x242   : > { %v8314_v5 = vadd.f32 %v1261_v3, %v8221_v21 }
 0x243   : > { %10578 = vst [vmem:[#allocation13_spill] sm:$0xff] %v8319_v8 }
 0x244   : > { %10577 = vst [vmem:[#allocation12_spill] sm:$0xff] %v8314_v5  ;;  %v5834_v28 = vpop.f32.mrb[32].mxu1  ;;  %1298 = vadd.xlane.f32.xlu1 %v8314_v5  ;;  %1296 = vadd.xlane.f32.xlu0 %v8311_v25 }
 0x245   : > { %v1723_v29 = vpop.f32.mrb[33].mxu1  ;;  %v8327_v38 = vadd.f32 %v5834_v28, %v8104_v2 }
 0x246   : > { %v8322_v33 = vadd.f32 %v1723_v29, %v8095_v55 }
 0x247   : > { %10580 = vst [vmem:[#allocation15_spill] sm:$0xff] %v8327_v38 }
 0x248   : > { %10579 = vst [vmem:[#allocation14_spill] sm:$0xff] %v8322_v33  ;;  %v5837_v35 = vpop.f32.mrb[34].mxu1  ;;  %1802 = vadd.xlane.f32.xlu1 %v8322_v33  ;;  %1300 = vadd.xlane.f32.xlu0 %v8319_v8 }
 0x249   : > { %v1733_v22 = vpop.f32.mrb[35].mxu1  ;;  %v8335_v53 = vadd.f32 %v5837_v35, %v8110_v10 }
 0x24a   : > { %v8330_v42 = vadd.f32 %v1733_v22, %v8101_v44 }
 0x24b   : > { %10582 = vst [vmem:[#allocation17_spill] sm:$0xff] %v8335_v53 }
 0x24c   : > { %10581 = vst [vmem:[#allocation16_spill] sm:$0xff] %v8330_v42  ;;  %v5840_v45 = vpop.f32.mrb[36].mxu1  ;;  %1806 = vadd.xlane.f32.xlu1 %v8330_v42  ;;  %1804 = vadd.xlane.f32.xlu0 %v8327_v38 }
 0x24d   : > { %v1743_v51 = vpop.f32.mrb[37].mxu1  ;;  %v8343_v9 = vadd.f32 %v5840_v45, %v8127_v1 }
 0x24e   : > { %v8338_v60 = vadd.f32 %v1743_v51, %v8115_v56 }
 0x24f   : > { %10584 = vst [vmem:[#allocation19_spill] sm:$0xff] %v8343_v9 }
 0x250   : > { %10583 = vst [vmem:[#allocation18_spill] sm:$0xff] %v8338_v60  ;;  %v5843_v61 = vpop.f32.mrb[38].mxu1  ;;  %1810 = vadd.xlane.f32.xlu1 %v8338_v60  ;;  %1808 = vadd.xlane.f32.xlu0 %v8335_v53 }
 0x251   : > { %v1753_v6 = vpop.f32.mrb[39].mxu1  ;;  %v8351_v29 = vadd.f32 %v5843_v61, %v8141_v34 }
 0x252   : > { %v8346_v20 = vadd.f32 %v1753_v6, %v8132_v7 }
 0x253   : > { %10586 = vst [vmem:[#allocation21_spill] sm:$0xff] %v8351_v29 }
 0x254   : > { %10585 = vst [vmem:[#allocation20_spill] sm:$0xff] %v8346_v20  ;;  %v5846_v3 = vpop.f32.mrb[40].mxu1  ;;  %1814 = vadd.xlane.f32.xlu1 %v8346_v20  ;;  %1812 = vadd.xlane.f32.xlu0 %v8343_v9 }
 0x255   : > { %v1763_v28 = vpop.f32.mrb[41].mxu1  ;;  %v8359_v51 = vadd.f32 %v5846_v3, %v8167_v15 }
 0x256   : > { %v8354_v35 = vadd.f32 %v1763_v28, %v8151_v17 }
 0x257   : > { %10588 = vst [vmem:[#allocation23_spill] sm:$0xff] %v8359_v51 }
 0x258   : > { %10587 = vst [vmem:[#allocation22_spill] sm:$0xff] %v8354_v35  ;;  %v5849_v22 = vpop.f32.mrb[42].mxu1  ;;  %1818 = vadd.xlane.f32.xlu1 %v8354_v35  ;;  %1816 = vadd.xlane.f32.xlu0 %v8351_v29 }
 0x259   : > { %v1773_v45 = vpop.f32.mrb[43].mxu1  ;;  %v8367_v28 = vadd.f32 %v5849_v22, %v8187_v52 }
 0x25a   : > { %v8362_v6 = vadd.f32 %v1773_v45, %v8171_v43 }
 0x25b   : > { %10590 = vst [vmem:[#allocation25_spill] sm:$0xff] %v8367_v28 }
 0x25c   : > { %10589 = vst [vmem:[#allocation24_spill] sm:$0xff] %v8362_v6  ;;  %v5852_v20 = vpop.f32.mrb[44].mxu1  ;;  %1822 = vadd.xlane.f32.xlu1 %v8362_v6  ;;  %1820 = vadd.xlane.f32.xlu0 %v8359_v51 }
 0x25d   : > { %v1783_v61 = vpop.f32.mrb[45].mxu1  ;;  %v8375_v45 = vadd.f32 %v5852_v20, %v8217_v50 }
 0x25e   : > { %v8370_v35 = vadd.f32 %v1783_v61, %v8201_v41 }
 0x25f   : > { %10592 = vst [vmem:[#allocation27_spill] sm:$0xff] %v8375_v45 }
 0x260   : > { %10591 = vst [vmem:[#allocation26_spill] sm:$0xff] %v8370_v35  ;;  %v5855_v29 = vpop.f32.mrb[46].mxu1  ;;  %1826 = vadd.xlane.f32.xlu1 %v8370_v35  ;;  %1824 = vadd.xlane.f32.xlu0 %v8367_v28 }
 0x261   : > { %v1793_v3 = vpop.f32.mrb[47].mxu1  ;;  %v8383_v61 = vadd.f32 %v5855_v29, %v8237_v23 }
 0x262   : > { %v8378_v6 = vadd.f32 %v1793_v3, %v8221_v21 }
 0x263   : > { %10594 = vst [vmem:[#allocation29_spill] sm:$0xff] %v8383_v61 }
 0x264   : > { %10593 = vst [vmem:[#allocation28_spill] sm:$0xff] %v8378_v6  ;;  %v5946_v51 = vpop.f32.mrb[48].mxu1  ;;  %1830 = vadd.xlane.f32.xlu1 %v8378_v6  ;;  %1828 = vadd.xlane.f32.xlu0 %v8375_v45 }
 0x265   : > { %v2255_v22 = vpop.f32.mrb[49].mxu1  ;;  %v8391_v3 = vadd.f32 %v5946_v51, %v8104_v2 }
 0x266   : > { %v8386_v35 = vadd.f32 %v2255_v22, %v8095_v55 }
 0x267   : > { %10596 = vst [vmem:[#allocation31_spill] sm:$0xff] %v8391_v3 }
 0x268   : > { %10595 = vst [vmem:[#allocation30_spill] sm:$0xff] %v8386_v35  ;;  %v5949_v28 = vpop.f32.mrb[50].mxu1  ;;  %2334 = vadd.xlane.f32.xlu1 %v8386_v35  ;;  %1832 = vadd.xlane.f32.xlu0 %v8383_v61 }
 0x269   : > { %v2265_v20 = vpop.f32.mrb[51].mxu1  ;;  %v8399_v22 = vadd.f32 %v5949_v28, %v8110_v10 }
 0x26a   : > { %v8394_v6 = vadd.f32 %v2265_v20, %v8101_v44 }
 0x26b   : > { %10598 = vst [vmem:[#allocation33_spill] sm:$0xff] %v8399_v22 }
 0x26c   : > { %10597 = vst [vmem:[#allocation32_spill] sm:$0xff] %v8394_v6  ;;  %v5952_v45 = vpop.f32.mrb[52].mxu1  ;;  %2338 = vadd.xlane.f32.xlu1 %v8394_v6  ;;  %2336 = vadd.xlane.f32.xlu0 %v8391_v3 }
 0x26d   : > { %v2275_v29 = vpop.f32.mrb[53].mxu1  ;;  %v8407_v20 = vadd.f32 %v5952_v45, %v8127_v1 }
 0x26e   : > { %v8402_v35 = vadd.f32 %v2275_v29, %v8115_v56 }
 0x26f   : > { %10600 = vst [vmem:[#allocation35_spill] sm:$0xff] %v8407_v20 }
 0x270   : > { %10599 = vst [vmem:[#allocation34_spill] sm:$0xff] %v8402_v35  ;;  %v5955_v61 = vpop.f32.mrb[54].mxu1  ;;  %2342 = vadd.xlane.f32.xlu1 %v8402_v35  ;;  %2340 = vadd.xlane.f32.xlu0 %v8399_v22 }
 0x271   : > { %v2285_v51 = vpop.f32.mrb[55].mxu1  ;;  %v8415_v29 = vadd.f32 %v5955_v61, %v8141_v34 }
 0x272   : > { %v8410_v6 = vadd.f32 %v2285_v51, %v8132_v7 }
 0x273   : > { %10602 = vst [vmem:[#allocation37_spill] sm:$0xff] %v8415_v29 }
 0x274   : > { %10601 = vst [vmem:[#allocation36_spill] sm:$0xff] %v8410_v6  ;;  %v5958_v3 = vpop.f32.mrb[56].mxu1  ;;  %2346 = vadd.xlane.f32.xlu1 %v8410_v6  ;;  %2344 = vadd.xlane.f32.xlu0 %v8407_v20 }
 0x275   : > { %v2295_v28 = vpop.f32.mrb[57].mxu1  ;;  %v8423_v51 = vadd.f32 %v5958_v3, %v8167_v15 }
 0x276   : > { %v8418_v35 = vadd.f32 %v2295_v28, %v8151_v17 }
 0x277   : > { %10604 = vst [vmem:[#allocation39_spill] sm:$0xff] %v8423_v51 }
 0x278   : > { %10603 = vst [vmem:[#allocation38_spill] sm:$0xff] %v8418_v35  ;;  %v5961_v22 = vpop.f32.mrb[58].mxu1  ;;  %2350 = vadd.xlane.f32.xlu1 %v8418_v35  ;;  %2348 = vadd.xlane.f32.xlu0 %v8415_v29 }
 0x279   : > { %v2305_v45 = vpop.f32.mrb[59].mxu1  ;;  %v8431_v28 = vadd.f32 %v5961_v22, %v8187_v52 }
 0x27a   : > { %v8426_v6 = vadd.f32 %v2305_v45, %v8171_v43 }
 0x27b   : > { %10606 = vst [vmem:[#allocation41_spill] sm:$0xff] %v8431_v28 }
 0x27c   : > { %10605 = vst [vmem:[#allocation40_spill] sm:$0xff] %v8426_v6  ;;  %v5964_v20 = vpop.f32.mrb[60].mxu1  ;;  %2354 = vadd.xlane.f32.xlu1 %v8426_v6  ;;  %2352 = vadd.xlane.f32.xlu0 %v8423_v51 }
 0x27d   : > { %v2315_v61 = vpop.f32.mrb[61].mxu1  ;;  %v8439_v45 = vadd.f32 %v5964_v20, %v8217_v50 }
 0x27e   : > { %v8434_v35 = vadd.f32 %v2315_v61, %v8201_v41 }
 0x27f   : > { %10608 = vst [vmem:[#allocation43_spill] sm:$0xff] %v8439_v45 }
 0x280   : > { %10607 = vst [vmem:[#allocation42_spill] sm:$0xff] %v8434_v35  ;;  %v5967_v29 = vpop.f32.mrb[62].mxu1  ;;  %2358 = vadd.xlane.f32.xlu1 %v8434_v35  ;;  %2356 = vadd.xlane.f32.xlu0 %v8431_v28 }
 0x281   : > { %v2325_v3 = vpop.f32.mrb[63].mxu1  ;;  %v8447_v61 = vadd.f32 %v5967_v29, %v8237_v23 }
 0x282   : > { %v8442_v6 = vadd.f32 %v2325_v3, %v8221_v21 }
 0x283   : > { %10610 = vst [vmem:[#allocation45_spill] sm:$0xff] %v8447_v61 }
 0x284   : > { %10609 = vst [vmem:[#allocation44_spill] sm:$0xff] %v8442_v6  ;;  %v6058_v51 = vpop.f32.mrb[64].mxu1  ;;  %2362 = vadd.xlane.f32.xlu1 %v8442_v6  ;;  %2360 = vadd.xlane.f32.xlu0 %v8439_v45 }
 0x285   : > { %v2787_v22 = vpop.f32.mrb[65].mxu1  ;;  %v8455_v3 = vadd.f32 %v6058_v51, %v8104_v2 }
 0x286   : > { %v8450_v35 = vadd.f32 %v2787_v22, %v8095_v55 }
 0x287   : > { %10612 = vst [vmem:[#allocation47_spill] sm:$0xff] %v8455_v3 }
 0x288   : > { %10611 = vst [vmem:[#allocation46_spill] sm:$0xff] %v8450_v35  ;;  %v6061_v28 = vpop.f32.mrb[66].mxu1  ;;  %2866 = vadd.xlane.f32.xlu1 %v8450_v35  ;;  %2364 = vadd.xlane.f32.xlu0 %v8447_v61 }
 0x289   : > { %v2797_v20 = vpop.f32.mrb[67].mxu1  ;;  %v8463_v22 = vadd.f32 %v6061_v28, %v8110_v10 }
 0x28a   : > { %v8458_v6 = vadd.f32 %v2797_v20, %v8101_v44 }
 0x28b   : > { %10614 = vst [vmem:[#allocation49_spill] sm:$0xff] %v8463_v22 }
 0x28c   : > { %10613 = vst [vmem:[#allocation48_spill] sm:$0xff] %v8458_v6  ;;  %v6064_v45 = vpop.f32.mrb[68].mxu1  ;;  %2870 = vadd.xlane.f32.xlu1 %v8458_v6  ;;  %2868 = vadd.xlane.f32.xlu0 %v8455_v3 }
 0x28d   : > { %v2807_v29 = vpop.f32.mrb[69].mxu1  ;;  %v8471_v20 = vadd.f32 %v6064_v45, %v8127_v1 }
 0x28e   : > { %v8466_v35 = vadd.f32 %v2807_v29, %v8115_v56 }
 0x28f   : > { %10616 = vst [vmem:[#allocation51_spill] sm:$0xff] %v8471_v20 }
 0x290   : > { %10615 = vst [vmem:[#allocation50_spill] sm:$0xff] %v8466_v35  ;;  %v6067_v61 = vpop.f32.mrb[70].mxu1  ;;  %2874 = vadd.xlane.f32.xlu1 %v8466_v35  ;;  %2872 = vadd.xlane.f32.xlu0 %v8463_v22 }
 0x291   : > { %v2817_v51 = vpop.f32.mrb[71].mxu1  ;;  %v8479_v60 = vadd.f32 %v6067_v61, %v8141_v34 }
 0x292   : > { %v8474_v6 = vadd.f32 %v2817_v51, %v8132_v7 }
 0x293   : > { %10618 = vst [vmem:[#allocation53_spill] sm:$0xff] %v8479_v60 }
 0x294   : > { %10617 = vst [vmem:[#allocation52_spill] sm:$0xff] %v8474_v6  ;;  %v729_v3 = vpop.xlane.xlu1 %728  ;;  %v6070_v9 = vpop.f32.mrb[72].mxu1  ;;  %2878 = vadd.xlane.f32.xlu1 %v8474_v6  ;;  %2876 = vadd.xlane.f32.xlu0 %v8471_v20 }
 0x295   : > { %v2827_v28 = vpop.f32.mrb[73].mxu1  ;;  %v727_v29 = vpop.xlane.xlu0 %726  ;;  %v760_v35 = vmul.f32 0.0078125, %v729_v3  ;;  %v8490_v42 = vadd.f32 %v6070_v9, %v8167_v15 }
 0x296   : > { %v8482_v22 = vadd.f32 %v2827_v28, %v8151_v17  ;;  %v759_v45 = vmul.f32 0.0078125, %v727_v29 }
 0x297   : > { %10621 = vst [vmem:[#allocation56_spill] sm:$0xff] %v8490_v42  ;;  %v8495_v3 = vsub.f32 %v8119_v12, %v760_v35 }
 0x298   : > { %10619 = vst [vmem:[#allocation54_spill] sm:$0xff] %v8482_v22  ;;  %v6073_v53 = vpop.f32.mrb[74].mxu1  ;;  %2882 = vadd.xlane.f32.xlu1 %v8482_v22  ;;  %2880 = vadd.xlane.f32.xlu0 %v8479_v60  ;;  %v8487_v51 = vsub.f32 %v8124_v62, %v759_v45 }
 0x299   : > { %v2837_v6 = vpop.f32.mrb[75].mxu1  ;;  %v733_v20 = vpop.xlane.xlu0 %732  ;;  %10622 = vst [vmem:[#allocation57_spill] sm:$0xff] %v8495_v3  ;;  %v792_v9 = vmul.f32 %v8495_v3, %v8495_v3 }
 0x29a   : > { %10620 = vst [vmem:[#allocation55_spill] sm:$0xff] %v8487_v51  ;;  %v791_v61 = vmul.f32 %v8487_v51, %v8487_v51  ;;  %v8499_v62 = vadd.f32 %v2837_v6, %v8171_v43  ;;  %v762_v45 = vmul.f32 0.0078125, %v733_v20 }
 0x29c   : > { %v6076_v28 = vpop.f32.mrb[76].mxu1  ;;  %2884 = vadd.xlane.f32.xlu0 %v8490_v42  ;;  %807 = vadd.xlane.f32.xlu1 %v791_v61  ;;  %10623 = vst [vmem:[#allocation58_spill] sm:$0xff] %v8499_v62  ;;  %v8508_v61 = vadd.f32 %v6073_v53, %v8187_v52  ;;  %v8511_v20 = vsub.f32 %v8135_v30, %v762_v45 }
 0x29d   : > { %v2847_v29 = vpop.f32.mrb[77].mxu1  ;;  %v735_v22 = vpop.xlane.xlu1 %734 }
 0x29e   : > { %v731_v60 = vpop.xlane.xlu0 %730  ;;  %10625 = vst [vmem:[#allocation60_spill] sm:$0xff] %v8508_v61  ;;  %10626 = vst [vmem:[#allocation61_spill] sm:$0xff] %v8511_v20  ;;  %v763_v51 = vmul.f32 0.0078125, %v735_v22  ;;  %v8519_v53 = vadd.f32 %v2847_v29, %v8201_v41 }
 0x29f   : > { %v761_v38 = vmul.f32 0.0078125, %v731_v60 }
 0x2a0   : > { %v6079_v33 = vpop.f32.mrb[78].mxu1  ;;  %809 = vadd.xlane.f32.xlu0 %v792_v9  ;;  %2886 = vadd.xlane.f32.xlu1 %v8499_v62  ;;  %10627 = vst [vmem:[#allocation62_spill] sm:$0xff] %v8519_v53  ;;  %v8522_v30 = vsub.f32 %v8148_v16, %v763_v51 }
 0x2a1   : > { %v2857_v12 = vpop.f32.mrb[79].mxu1  ;;  %v739_v35 = vpop.xlane.xlu1 %738  ;;  %v8505_v42 = vsub.f32 %v8145_v37, %v761_v38  ;;  %v794_v38 = vmul.f32 %v8511_v20, %v8511_v20 }
 0x2a2   : > { %v737_v6 = vpop.xlane.xlu0 %736  ;;  %10628 = vst [vmem:[#allocation63_spill] sm:$0xff] %v8522_v30  ;;  %v795_v29 = vmul.f32 %v8522_v30, %v8522_v30 }
 0x2a3   : > { %10624 = vst [vmem:[#allocation59_spill] sm:$0xff] %v8505_v42  ;;  %v793_v60 = vmul.f32 %v8505_v42, %v8505_v42  ;;  %v764_v8 = vmul.f32 0.0078125, %v737_v6  ;;  %v765_v42 = vmul.f32 0.0078125, %v739_v35 }
 0x2a4   : > { %v6170_v3 = vpop.f32.mrb[80].mxu1  ;;  %2888 = vadd.xlane.f32.xlu0 %v8508_v61  ;;  %v8528_v61 = vadd.f32 %v6076_v28, %v8217_v50 }
 0x2a5   : > { %811 = vadd.xlane.f32.xlu1 %v793_v60  ;;  %v3319_v9 = vpop.f32.mrb[81].mxu1  ;;  %v743_v62 = vpop.xlane.xlu1 %742  ;;  %v8531_v6 = vsub.f32 %v8159_v39, %v764_v8  ;;  %v8543_v39 = vadd.f32 %v2857_v12, %v8221_v21  ;;  %v8546_v8 = vsub.f32 %v8162_v40, %v765_v42 }
 0x2a6   : > { %v741_v37 = vpop.xlane.xlu0 %740  ;;  %10629 = vst [vmem:[#allocation64_spill] sm:$0xff] %v8528_v61  ;;  %v767_v30 = vmul.f32 0.0078125, %v743_v62 }
 0x2a7   : > { %10630 = vst [vmem:[#allocation65_spill] sm:$0xff] %v8531_v6  ;;  %v796_v28 = vmul.f32 %v8531_v6, %v8531_v6  ;;  %10631 = vst [vmem:[#allocation66_spill] sm:$0xff] %v8543_v39  ;;  %v797_v40 = vmul.f32 %v8546_v8, %v8546_v8 }
 0x2a8   : > { %v8524_v22 = vpop.f32.mrb[82].mxu1  ;;  %813 = vadd.xlane.f32.xlu0 %v794_v38  ;;  %10632 = vst [vmem:[#allocation67_spill] sm:$0xff] %v8546_v8  ;;  %v8576_v62 = vsub.f32 %v8180_v48, %v767_v30 }
 0x2a9   : > { %2890 = vadd.xlane.f32.xlu1 %v8519_v53  ;;  %v3329_v45 = vpop.f32.mrb[83].mxu1  ;;  %v747_v60 = vpop.xlane.xlu1 %746  ;;  %v766_v53 = vmul.f32 0.0078125, %v741_v37  ;;  %v8556_v37 = vadd.f32 %v6079_v33, %v8237_v23 }
 0x2aa   : > { %v745_v20 = vpop.xlane.xlu0 %744  ;;  %10636 = vst [vmem:[#allocation71_spill] sm:$0xff] %v8576_v62  ;;  %v769_v59 = vmul.f32 0.0078125, %v747_v60  ;;  %v799_v48 = vmul.f32 %v8576_v62, %v8576_v62 }
 0x2ab   : > { %10633 = vst [vmem:[#allocation68_spill] sm:$0xff] %v8556_v37  ;;  %v8559_v6 = vsub.f32 %v8177_v18, %v766_v53  ;;  %v768_v25 = vmul.f32 0.0078125, %v745_v20  ;;  %v8573_v53 = vadd.f32 %v3319_v9, %v8095_v55  ;;  %v8586_v20 = vadd.f32 %v6170_v3, %v8104_v2 }
 0x2ac   : > { %v8535_v16 = vpop.f32.mrb[84].mxu1  ;;  %2892 = vadd.xlane.f32.xlu0 %v8528_v61  ;;  %v8610_v60 = vsub.f32 %v8196_v57, %v769_v59 }
 0x2ad   : > { %815 = vadd.xlane.f32.xlu1 %v795_v29  ;;  %v8538_v51 = vpop.f32.mrb[85].mxu1  ;;  %v751_v38 = vpop.xlane.xlu1 %750  ;;  %10634 = vst [vmem:[#allocation69_spill] sm:$0xff] %v8559_v6  ;;  %v798_v18 = vmul.f32 %v8559_v6, %v8559_v6  ;;  %10635 = vst [vmem:[#allocation70_spill] sm:$0xff] %v8573_v53  ;;  %v8589_v6 = vsub.f32 %v8193_v36, %v768_v25  ;;  %v8607_v25 = vadd.f32 %v3329_v45, %v8101_v44 }
 0x2ae   : > { %v749_v5 = vpop.xlane.xlu0 %748  ;;  %10637 = vst [vmem:[#allocation72_spill] sm:$0xff] %v8586_v20  ;;  %10640 = vst [vmem:[#allocation75_spill] sm:$0xff] %v8610_v60  ;;  %v771_v57 = vmul.f32 0.0078125, %v751_v38  ;;  %v801_v59 = vmul.f32 %v8610_v60, %v8610_v60  ;;  %v8643_v38 = vadd.f32 %v8538_v51, %v8115_v56 }
 0x2af   : > { %10638 = vst [vmem:[#allocation73_spill] sm:$0xff] %v8589_v6  ;;  %v770_v3 = vmul.f32 0.0078125, %v749_v5  ;;  %v800_v36 = vmul.f32 %v8589_v6, %v8589_v6  ;;  %10639 = vst [vmem:[#allocation74_spill] sm:$0xff] %v8607_v25  ;;  %v8621_v5 = vadd.f32 %v8524_v22, %v8110_v10 }
 0x2b0   : > { %v8548_v35 = vpop.f32.mrb[86].mxu1  ;;  %817 = vadd.xlane.f32.xlu0 %v796_v28  ;;  %10643 = vst [vmem:[#allocation78_spill] sm:$0xff] %v8643_v38 }
 0x2b1   : > { %2894 = vadd.xlane.f32.xlu1 %v8543_v39  ;;  %v8551_v29 = vpop.f32.mrb[87].mxu1  ;;  %v8553_v61 = vpop.xlane.xlu1 %754  ;;  %10641 = vst [vmem:[#allocation76_spill] sm:$0xff] %v8621_v5  ;;  %v8624_v6 = vsub.f32 %v8209_v47, %v770_v3  ;;  %v8646_v3 = vsub.f32 %v8212_v0, %v771_v57 }
 0x2b2   : > { %v753_v12 = vpop.xlane.xlu0 %752  ;;  %v773_v0 = vmul.f32 0.0078125, %v8553_v61  ;;  %v8680_v61 = vadd.f32 %v8551_v29, %v8132_v7 }
 0x2b3   : > { %10642 = vst [vmem:[#allocation77_spill] sm:$0xff] %v8624_v6  ;;  %v772_v22 = vmul.f32 0.0078125, %v753_v12  ;;  %v802_v47 = vmul.f32 %v8624_v6, %v8624_v6  ;;  %10644 = vst [vmem:[#allocation79_spill] sm:$0xff] %v8646_v3  ;;  %v803_v57 = vmul.f32 %v8646_v3, %v8646_v3 }
 0x2b4   : > { %v8563_v42 = vpop.f32.mrb[88].mxu1  ;;  %2896 = vadd.xlane.f32.xlu0 %v8556_v37  ;;  %10647 = vst [vmem:[#allocation82_spill] sm:$0xff] %v8680_v61 }
 0x2b5   : > { %819 = vadd.xlane.f32.xlu1 %v797_v40  ;;  %v8566_v28 = vpop.f32.mrb[89].mxu1  ;;  %v8568_v39 = vpop.xlane.xlu1 %1270  ;;  %v8660_v6 = vsub.f32 %v8227_v14, %v772_v22  ;;  %v8683_v22 = vsub.f32 %v8230_v19, %v773_v0 }
 0x2b6   : > { %v757_v33 = vpop.xlane.xlu0 %756  ;;  %v1302_v19 = vmul.f32 0.0078125, %v8568_v39  ;;  %v8718_v39 = vadd.f32 %v8566_v28, %v8151_v17 }
 0x2b7   : > { %10646 = vst [vmem:[#allocation81_spill] sm:$0xff] %v8660_v6  ;;  %v804_v14 = vmul.f32 %v8660_v6, %v8660_v6  ;;  %10648 = vst [vmem:[#allocation83_spill] sm:$0xff] %v8683_v22  ;;  %v805_v0 = vmul.f32 %v8683_v22, %v8683_v22 }
 0x2b8   : > { %v8578_v8 = vpop.f32.mrb[90].mxu1  ;;  %821 = vadd.xlane.f32.xlu0 %v798_v18  ;;  %10653 = vst [vmem:[#allocation88_spill] sm:$0xff] %v8718_v39  ;;  %v8721_v22 = vsub.f32 %v8246_v27, %v1302_v19 }
 0x2b9   : > { %3398 = vadd.xlane.f32.xlu1 %v8573_v53  ;;  %v8581_v40 = vpop.f32.mrb[91].mxu1  ;;  %v8583_v37 = vpop.xlane.xlu1 %1274 }
 0x2ba   : > { %v8591_v9 = vpop.xlane.xlu0 %1272  ;;  %10654 = vst [vmem:[#allocation89_spill] sm:$0xff] %v8721_v22  ;;  %v1304_v27 = vmul.f32 0.0078125, %v8583_v37  ;;  %v1334_v19 = vmul.f32 %v8721_v22, %v8721_v22  ;;  %v8756_v37 = vadd.f32 %v8581_v40, %v8171_v43 }
 0x2bc   : > { %v8595_v30 = vpop.f32.mrb[92].mxu1  ;;  %3400 = vadd.xlane.f32.xlu0 %v8586_v20  ;;  %10659 = vst [vmem:[#allocation94_spill] sm:$0xff] %v8756_v37  ;;  %v8759_v22 = vsub.f32 %v8260_v32, %v1304_v27 }
 0x2bd   : > { %823 = vadd.xlane.f32.xlu1 %v799_v48  ;;  %v8598_v18 = vpop.f32.mrb[93].mxu1  ;;  %v8600_v53 = vpop.xlane.xlu1 %1278 }
 0x2be   : > { %v8602_v13 = vpop.xlane.xlu0 %1276  ;;  %10660 = vst [vmem:[#allocation95_spill] sm:$0xff] %v8759_v22  ;;  %v1306_v32 = vmul.f32 0.0078125, %v8600_v53  ;;  %v1336_v27 = vmul.f32 %v8759_v22, %v8759_v22  ;;  %v8794_v53 = vadd.f32 %v8598_v18, %v8201_v41 }
 0x2c0   : > { %v8612_v62 = vpop.f32.mrb[94].mxu1  ;;  %825 = vadd.xlane.f32.xlu0 %v800_v36  ;;  %10665 = vst [vmem:[#allocation100_spill] sm:$0xff] %v8794_v53  ;;  %v8797_v22 = vsub.f32 %v8274_v24, %v1306_v32 }
 0x2c1   : > { %3402 = vadd.xlane.f32.xlu1 %v8607_v25  ;;  %v8615_v48 = vpop.f32.mrb[95].mxu1  ;;  %v8617_v20 = vpop.xlane.xlu1 %1282 }
 0x2c2   : > { %v8626_v45 = vpop.xlane.xlu0 %1280  ;;  %10666 = vst [vmem:[#allocation101_spill] sm:$0xff] %v8797_v22  ;;  %v1308_v24 = vmul.f32 0.0078125, %v8617_v20  ;;  %v1338_v32 = vmul.f32 %v8797_v22, %v8797_v22  ;;  %v8832_v20 = vadd.f32 %v8615_v48, %v8221_v21 }
 0x2c4   : > { %v8630_v36 = vpop.f32.mrb[96].mxu1  ;;  %3404 = vadd.xlane.f32.xlu0 %v8621_v5  ;;  %v8657_v5 = vadd.f32 %v8535_v16, %v8127_v1  ;;  %v774_v16 = vmul.f32 0.0078125, %v757_v33  ;;  %10671 = vst [vmem:[#allocation106_spill] sm:$0xff] %v8832_v20  ;;  %v8835_v22 = vsub.f32 %v8282_v49, %v1308_v24 }
 0x2c5   : > { %827 = vadd.xlane.f32.xlu1 %v801_v59  ;;  %v8633_v25 = vpop.f32.mrb[97].mxu1  ;;  %v8635_v4 = vpop.xlane.xlu1 %1286 }
 0x2c6   : > { %v8637_v10 = vpop.xlane.xlu0 %1284  ;;  %10645 = vst [vmem:[#allocation80_spill] sm:$0xff] %v8657_v5  ;;  %v8697_v6 = vsub.f32 %v8243_v31, %v774_v16  ;;  %10672 = vst [vmem:[#allocation107_spill] sm:$0xff] %v8835_v22  ;;  %v1310_v49 = vmul.f32 0.0078125, %v8635_v4  ;;  %v1340_v24 = vmul.f32 %v8835_v22, %v8835_v22  ;;  %v8870_v4 = vadd.f32 %v8633_v25, %v8095_v55 }
 0x2c8   : > { %v8648_v60 = vpop.f32.mrb[98].mxu1  ;;  %829 = vadd.xlane.f32.xlu0 %v802_v47  ;;  %10651 = vst [vmem:[#allocation86_spill] sm:$0xff] %v8697_v6  ;;  %v806_v16 = vmul.f32 %v8697_v6, %v8697_v6  ;;  %10677 = vst [vmem:[#allocation112_spill] sm:$0xff] %v8870_v4  ;;  %v8873_v22 = vsub.f32 %v8290_v58, %v1310_v49 }
 0x2c9   : > { %3406 = vadd.xlane.f32.xlu1 %v8643_v38  ;;  %v8651_v59 = vpop.f32.mrb[99].mxu1  ;;  %v8653_v12 = vpop.xlane.xlu1 %1290 }
 0x2ca   : > { %v8662_v51 = vpop.xlane.xlu0 %1288  ;;  %10678 = vst [vmem:[#allocation113_spill] sm:$0xff] %v8873_v22  ;;  %v1312_v58 = vmul.f32 0.0078125, %v8653_v12  ;;  %v1342_v49 = vmul.f32 %v8873_v22, %v8873_v22  ;;  %v8908_v12 = vadd.f32 %v8651_v59, %v8101_v44  ;;  %v10687_v22 = vld [vmem:[#allocation8_spill] sm:$0xff] }
 0x2cc   : > { %v8667_v47 = vpop.f32.mrb[100].mxu1  ;;  %3408 = vadd.xlane.f32.xlu0 %v8657_v5  ;;  %v8694_v5 = vadd.f32 %v8548_v35, %v8141_v34  ;;  %v1303_v35 = vmul.f32 0.0078125, %v8591_v9  ;;  %10686 = vst [vmem:[#allocation121_spill] sm:$0xff] %v8908_v12 }
 0x2cd   : > { %831 = vadd.xlane.f32.xlu1 %v803_v57  ;;  %v8670_v38 = vpop.f32.mrb[101].mxu1  ;;  %v8672_v56 = vpop.xlane.xlu1 %1294 }
 0x2ce   : > { %v8674_v1 = vpop.xlane.xlu0 %1292  ;;  %10650 = vst [vmem:[#allocation85_spill] sm:$0xff] %v8694_v5  ;;  %v8735_v6 = vsub.f32 %v8257_v11, %v1303_v35 }
 0x2d0   : > { %v8685_v3 = vpop.f32.mrb[102].mxu1  ;;  %833 = vadd.xlane.f32.xlu0 %v804_v14  ;;  %10657 = vst [vmem:[#allocation92_spill] sm:$0xff] %v8735_v6  ;;  %v1335_v35 = vmul.f32 %v8735_v6, %v8735_v6 }
 0x2d1   : > { %10649 = vst [vmem:[#allocation84_spill] sm:$0xff] %v8685_v3  ;;  %3410 = vadd.xlane.f32.xlu1 %v8680_v61  ;;  %v8688_v57 = vpop.f32.mrb[103].mxu1  ;;  %v8690_v33 = vpop.xlane.xlu1 %1298 }
 0x2d2   : > { %v8699_v29 = vpop.xlane.xlu0 %1296 }
 0x2d4   : > { %v8704_v14 = vpop.f32.mrb[104].mxu1  ;;  %3412 = vadd.xlane.f32.xlu0 %v8694_v5 }
 0x2d5   : > { %10652 = vst [vmem:[#allocation87_spill] sm:$0xff] %v8704_v14  ;;  %835 = vadd.xlane.f32.xlu1 %v805_v0  ;;  %v8707_v61 = vpop.f32.mrb[105].mxu1  ;;  %v8709_v3 = vpop.xlane.xlu1 %1802  ;;  %v8732_v14 = vadd.f32 %v8563_v42, %v8167_v15  ;;  %v1305_v42 = vmul.f32 0.0078125, %v8602_v13 }
 0x2d6   : > { %v8712_v31 = vpop.xlane.xlu0 %1300 }
 0x2d7   : > { %10656 = vst [vmem:[#allocation91_spill] sm:$0xff] %v8732_v14  ;;  %v8773_v6 = vsub.f32 %v8271_v26, %v1305_v42 }
 0x2d8   : > { %v8723_v5 = vpop.f32.mrb[106].mxu1  ;;  %837 = vadd.xlane.f32.xlu0 %v806_v16 }
 0x2d9   : > { %10655 = vst [vmem:[#allocation90_spill] sm:$0xff] %v8723_v5  ;;  %3414 = vadd.xlane.f32.xlu1 %v8718_v39  ;;  %v8726_v0 = vpop.f32.mrb[107].mxu1  ;;  %v8728_v9 = vpop.xlane.xlu1 %1806  ;;  %10663 = vst [vmem:[#allocation98_spill] sm:$0xff] %v8773_v6  ;;  %v1337_v42 = vmul.f32 %v8773_v6, %v8773_v6 }
 0x2da   : > { %v8737_v28 = vpop.xlane.xlu0 %1804 }
 0x2dc   : > { %v8742_v16 = vpop.f32.mrb[108].mxu1  ;;  %3416 = vadd.xlane.f32.xlu0 %v8732_v14 }
 0x2dd   : > { %10658 = vst [vmem:[#allocation93_spill] sm:$0xff] %v8742_v16  ;;  %1350 = vadd.xlane.f32.xlu1 %v1334_v19  ;;  %v8745_v39 = vpop.f32.mrb[109].mxu1  ;;  %v8747_v5 = vpop.xlane.xlu1 %1810  ;;  %v8770_v16 = vadd.f32 %v8578_v8, %v8187_v52  ;;  %v1307_v8 = vmul.f32 0.0078125, %v8626_v45 }
 0x2de   : > { %v8750_v11 = vpop.xlane.xlu0 %1808 }
 0x2df   : > { %10662 = vst [vmem:[#allocation97_spill] sm:$0xff] %v8770_v16  ;;  %v8811_v6 = vsub.f32 %v8279_v46, %v1307_v8 }
 0x2e0   : > { %v8761_v14 = vpop.f32.mrb[110].mxu1  ;;  %1352 = vadd.xlane.f32.xlu0 %v1335_v35 }
 0x2e1   : > { %10661 = vst [vmem:[#allocation96_spill] sm:$0xff] %v8761_v14  ;;  %3418 = vadd.xlane.f32.xlu1 %v8756_v37  ;;  %v8764_v19 = vpop.f32.mrb[111].mxu1  ;;  %v8766_v13 = vpop.xlane.xlu1 %1814  ;;  %10669 = vst [vmem:[#allocation104_spill] sm:$0xff] %v8811_v6  ;;  %v1339_v8 = vmul.f32 %v8811_v6, %v8811_v6 }
 0x2e2   : > { %v8775_v40 = vpop.xlane.xlu0 %1812 }
 0x2e4   : > { %v8780_v35 = vpop.f32.mrb[112].mxu1  ;;  %3420 = vadd.xlane.f32.xlu0 %v8770_v16 }
 0x2e5   : > { %10664 = vst [vmem:[#allocation99_spill] sm:$0xff] %v8780_v35  ;;  %1354 = vadd.xlane.f32.xlu1 %v1336_v27  ;;  %v8783_v37 = vpop.f32.mrb[113].mxu1  ;;  %v8785_v14 = vpop.xlane.xlu1 %1818  ;;  %v8808_v35 = vadd.f32 %v8595_v30, %v8217_v50  ;;  %v1309_v30 = vmul.f32 0.0078125, %v8637_v10 }
 0x2e6   : > { %v8788_v26 = vpop.xlane.xlu0 %1816 }
 0x2e7   : > { %10668 = vst [vmem:[#allocation103_spill] sm:$0xff] %v8808_v35  ;;  %v8849_v6 = vsub.f32 %v8287_v54, %v1309_v30 }
 0x2e8   : > { %v8799_v16 = vpop.f32.mrb[114].mxu1  ;;  %1356 = vadd.xlane.f32.xlu0 %v1337_v42 }
 0x2e9   : > { %10667 = vst [vmem:[#allocation102_spill] sm:$0xff] %v8799_v16  ;;  %3422 = vadd.xlane.f32.xlu1 %v8794_v53  ;;  %v8802_v27 = vpop.f32.mrb[115].mxu1  ;;  %v8804_v45 = vpop.xlane.xlu1 %1822  ;;  %10675 = vst [vmem:[#allocation110_spill] sm:$0xff] %v8849_v6  ;;  %v1341_v30 = vmul.f32 %v8849_v6, %v8849_v6 }
 0x2ea   : > { %v8813_v18 = vpop.xlane.xlu0 %1820 }
 0x2ec   : > { %v8818_v42 = vpop.f32.mrb[116].mxu1  ;;  %3424 = vadd.xlane.f32.xlu0 %v8808_v35 }
 0x2ed   : > { %10670 = vst [vmem:[#allocation105_spill] sm:$0xff] %v8818_v42  ;;  %1358 = vadd.xlane.f32.xlu1 %v1338_v32  ;;  %v8821_v53 = vpop.f32.mrb[117].mxu1  ;;  %v8823_v16 = vpop.xlane.xlu1 %1826  ;;  %v8846_v42 = vadd.f32 %v8612_v62, %v8237_v23  ;;  %v1311_v62 = vmul.f32 0.0078125, %v8662_v51 }
 0x2ee   : > { %v8826_v46 = vpop.xlane.xlu0 %1824 }
 0x2ef   : > { %10674 = vst [vmem:[#allocation109_spill] sm:$0xff] %v8846_v42  ;;  %v8887_v6 = vsub.f32 %v8295_v63, %v1311_v62 }
 0x2f0   : > { %v8837_v35 = vpop.f32.mrb[118].mxu1  ;;  %1360 = vadd.xlane.f32.xlu0 %v1339_v8 }
 0x2f1   : > { %10673 = vst [vmem:[#allocation108_spill] sm:$0xff] %v8837_v35  ;;  %3426 = vadd.xlane.f32.xlu1 %v8832_v20  ;;  %v8840_v32 = vpop.f32.mrb[119].mxu1  ;;  %v8842_v10 = vpop.xlane.xlu1 %1830  ;;  %10682 = vst [vmem:[#allocation117_spill] sm:$0xff] %v8887_v6  ;;  %v1343_v62 = vmul.f32 %v8887_v6, %v8887_v6  ;;  %v10693_v6 = vld [vmem:[#allocation9_spill] sm:$0xff] }
 0x2f2   : > { %v8851_v48 = vpop.xlane.xlu0 %1828 }
 0x2f4   : > { %v8856_v8 = vpop.f32.mrb[120].mxu1  ;;  %3428 = vadd.xlane.f32.xlu0 %v8846_v42 }
 0x2f5   : > { %10676 = vst [vmem:[#allocation111_spill] sm:$0xff] %v8856_v8  ;;  %1362 = vadd.xlane.f32.xlu1 %v1340_v24  ;;  %v8859_v20 = vpop.f32.mrb[121].mxu1  ;;  %v8861_v35 = vpop.xlane.xlu1 %2334  ;;  %v8884_v8 = vadd.f32 %v8630_v36, %v8104_v2  ;;  %v1313_v36 = vmul.f32 0.0078125, %v8674_v1 }
 0x2f6   : > { %v8864_v54 = vpop.xlane.xlu0 %1832 }
 0x2f7   : > { %10681 = vst [vmem:[#allocation116_spill] sm:$0xff] %v8884_v8 }
 0x2f8   : > { %v8875_v42 = vpop.f32.mrb[122].mxu1  ;;  %1364 = vadd.xlane.f32.xlu0 %v1341_v30 }
 0x2f9   : > { %10679 = vst [vmem:[#allocation114_spill] sm:$0xff] %v8875_v42  ;;  %3930 = vadd.xlane.f32.xlu1 %v8870_v4  ;;  %v8878_v24 = vpop.f32.mrb[123].mxu1  ;;  %v8880_v51 = vpop.xlane.xlu1 %2338 }
 0x2fa   : > { %10680 = vst [vmem:[#allocation115_spill] sm:$0xff] %v8878_v24  ;;  %v8889_v25 = vpop.xlane.xlu0 %2336  ;;  %v8925_v24 = vsub.f32 %v10693_v6, %v1313_v36 }
 0x2fc   : > { %v8894_v30 = vpop.f32.mrb[124].mxu1  ;;  %3932 = vadd.xlane.f32.xlu0 %v8884_v8  ;;  %10694 = vst [vmem:[#allocation9_spill] sm:$0xff] %v8925_v24  ;;  %v1345_v6 = vmul.f32 %v8925_v24, %v8925_v24 }
 0x2fd   : > { %10683 = vst [vmem:[#allocation118_spill] sm:$0xff] %v8894_v30  ;;  %1366 = vadd.xlane.f32.xlu1 %v1342_v49  ;;  %v8897_v4 = vpop.f32.mrb[125].mxu1  ;;  %v8899_v42 = vpop.xlane.xlu1 %2342  ;;  %v8911_v30 = vsub.f32 %v10687_v22, %v1312_v58  ;;  %v1314_v22 = vmul.f32 0.0078125, %v8672_v56  ;;  %v10698_v56 = vld [vmem:[#allocation10_spill] sm:$0xff] }
 0x2fe   : > { %10684 = vst [vmem:[#allocation119_spill] sm:$0xff] %v8897_v4  ;;  %10685 = vst [vmem:[#allocation120_spill] sm:$0xff] %v8899_v42  ;;  %v8902_v63 = vpop.xlane.xlu0 %2340  ;;  %v10691_v4 = vld [vmem:[#allocation5_spill] sm:$0xff] }
 0x2ff   : > { %10688 = vst [vmem:[#allocation8_spill] sm:$0xff] %v8911_v30  ;;  %v8922_v42 = vadd.f32 %v8648_v60, %v10691_v4  ;;  %v1344_v58 = vmul.f32 %v8911_v30, %v8911_v30  ;;  %v10696_v60 = vld [vmem:[#allocation6_spill] sm:$0xff]  ;;  %v10702_v30 = vld [vmem:[#allocation11_spill] sm:$0xff] }
 0x300   : > { %v8913_v8 = vpop.f32.mrb[126].mxu1  ;;  %1368 = vadd.xlane.f32.xlu0 %v1343_v62  ;;  %v8942_v36 = vadd.f32 %v8670_v38, %v10696_v60  ;;  %v1316_v38 = vmul.f32 0.0078125, %v8690_v33  ;;  %v10706_v33 = vld [vmem:[#allocation12_spill] sm:$0xff] }
 0x301   : > { %10689 = vst [vmem:[#allocation122_spill] sm:$0xff] %v8913_v8  ;;  %3934 = vadd.xlane.f32.xlu1 %v8908_v12  ;;  %v8916_v49 = vpop.f32.mrb[127].mxu1  ;;  %v8918_v1 = vpop.xlane.xlu1 %2346  ;;  %10692 = vst [vmem:[#allocation5_spill] sm:$0xff] %v8922_v42  ;;  %v1315_v12 = vmul.f32 0.0078125, %v8699_v29 }
 0x302   : > { %10690 = vst [vmem:[#allocation123_spill] sm:$0xff] %v8916_v49  ;;  %v8927_v59 = vpop.xlane.xlu0 %2344  ;;  %10697 = vst [vmem:[#allocation6_spill] sm:$0xff] %v8942_v36  ;;  %v8945_v49 = vsub.f32 %v10698_v56, %v1314_v22  ;;  %v1317_v56 = vmul.f32 0.0078125, %v8712_v31 }
 0x304   : > { %3936 = vadd.xlane.f32.xlu0 %v8922_v42  ;;  %10699 = vst [vmem:[#allocation10_spill] sm:$0xff] %v8945_v49  ;;  %v10700_v42 = vld [vmem:[#allocation7_spill] sm:$0xff]  ;;  %v1346_v22 = vmul.f32 %v8945_v49, %v8945_v49  ;;  %v10710_v49 = vld [vmem:[#allocation13_spill] sm:$0xff] }
 0x305   : > { %1370 = vadd.xlane.f32.xlu1 %v1344_v58  ;;  %v8933_v62 = vpop.xlane.xlu1 %2350  ;;  %v8952_v29 = vadd.f32 %v8667_v47, %v10700_v42 }
 0x306   : > { %v8936_v8 = vpop.xlane.xlu0 %2348 }
 0x307   : > { %10695 = vst [vmem:[#allocation124_spill] sm:$0xff] %v8936_v8  ;;  %10701 = vst [vmem:[#allocation7_spill] sm:$0xff] %v8952_v29  ;;  %v8955_v8 = vsub.f32 %v10702_v30, %v1315_v12  ;;  %v8972_v30 = vadd.f32 %v8688_v57, %v8132_v7  ;;  %v8975_v12 = vsub.f32 %v10706_v33, %v1316_v38  ;;  %v1834_v57 = vmul.f32 0.0078125, %v8709_v3  ;;  %v10714_v3 = vld [vmem:[#allocation14_spill] sm:$0xff] }
 0x308   : > { %1372 = vadd.xlane.f32.xlu0 %v1345_v6  ;;  %v1835_v33 = vmul.f32 0.0078125, %v8737_v28 }
 0x309   : > { %3938 = vadd.xlane.f32.xlu1 %v8942_v36  ;;  %v8948_v58 = vpop.xlane.xlu1 %2354  ;;  %10703 = vst [vmem:[#allocation11_spill] sm:$0xff] %v8955_v8  ;;  %v1347_v47 = vmul.f32 %v8955_v8, %v8955_v8  ;;  %10705 = vst [vmem:[#allocation126_spill] sm:$0xff] %v8972_v30  ;;  %v1348_v38 = vmul.f32 %v8975_v12, %v8975_v12 }
 0x30a   : > { %v8957_v24 = vpop.xlane.xlu0 %2352  ;;  %10707 = vst [vmem:[#allocation12_spill] sm:$0xff] %v8975_v12  ;;  %v10718_v12 = vld [vmem:[#allocation15_spill] sm:$0xff] }
 0x30c   : > { %3940 = vadd.xlane.f32.xlu0 %v8952_v29  ;;  %v10708_v29 = vld [vmem:[#allocation84_spill] sm:$0xff] }
 0x30d   : > { %1374 = vadd.xlane.f32.xlu1 %v1346_v22  ;;  %v8963_v6 = vpop.xlane.xlu1 %2358  ;;  %v8982_v31 = vadd.f32 %v10708_v29, %v8141_v34  ;;  %v9002_v29 = vadd.f32 %v8707_v61, %v8151_v17  ;;  %v1836_v61 = vmul.f32 0.0078125, %v8728_v9  ;;  %v10722_v9 = vld [vmem:[#allocation16_spill] sm:$0xff] }
 0x30e   : > { %10704 = vst [vmem:[#allocation125_spill] sm:$0xff] %v8963_v6  ;;  %v8966_v36 = vpop.xlane.xlu0 %2356  ;;  %v8985_v6 = vsub.f32 %v10710_v49, %v1317_v56  ;;  %v9005_v56 = vsub.f32 %v10714_v3, %v1834_v57  ;;  %v1837_v3 = vmul.f32 0.0078125, %v8750_v11 }
 0x30f   : > { %10709 = vst [vmem:[#allocation84_spill] sm:$0xff] %v8982_v31  ;;  %10713 = vst [vmem:[#allocation128_spill] sm:$0xff] %v9002_v29 }
 0x310   : > { %1376 = vadd.xlane.f32.xlu0 %v1347_v47  ;;  %10711 = vst [vmem:[#allocation13_spill] sm:$0xff] %v8985_v6  ;;  %v1349_v49 = vmul.f32 %v8985_v6, %v8985_v6  ;;  %10715 = vst [vmem:[#allocation14_spill] sm:$0xff] %v9005_v56  ;;  %v1866_v57 = vmul.f32 %v9005_v56, %v9005_v56  ;;  %v10726_v56 = vld [vmem:[#allocation17_spill] sm:$0xff] }
 0x311   : > { %3942 = vadd.xlane.f32.xlu1 %v8972_v30  ;;  %v8978_v22 = vpop.xlane.xlu1 %2362 }
 0x312   : > { %v8987_v8 = vpop.xlane.xlu0 %2360 }
 0x314   : > { %3944 = vadd.xlane.f32.xlu0 %v8982_v31  ;;  %v10716_v31 = vld [vmem:[#allocation87_spill] sm:$0xff] }
 0x315   : > { %1378 = vadd.xlane.f32.xlu1 %v1348_v38  ;;  %v8993_v47 = vpop.xlane.xlu1 %2866  ;;  %v9012_v28 = vadd.f32 %v10716_v31, %v8167_v15  ;;  %v9032_v31 = vadd.f32 %v8726_v0, %v8171_v43  ;;  %v1838_v0 = vmul.f32 0.0078125, %v8747_v5  ;;  %v10731_v5 = vld [vmem:[#allocation18_spill] sm:$0xff] }
 0x316   : > { %10712 = vst [vmem:[#allocation127_spill] sm:$0xff] %v8993_v47  ;;  %v8996_v30 = vpop.xlane.xlu0 %2364  ;;  %v9015_v47 = vsub.f32 %v10718_v12, %v1835_v33  ;;  %v9035_v33 = vsub.f32 %v10722_v9, %v1836_v61  ;;  %v1839_v9 = vmul.f32 0.0078125, %v8775_v40  ;;  %v10735_v40 = vld [vmem:[#allocation19_spill] sm:$0xff] }
 0x317   : > { %10717 = vst [vmem:[#allocation87_spill] sm:$0xff] %v9012_v28  ;;  %10721 = vst [vmem:[#allocation130_spill] sm:$0xff] %v9032_v31 }
 0x318   : > { %1380 = vadd.xlane.f32.xlu0 %v1349_v49  ;;  %10719 = vst [vmem:[#allocation15_spill] sm:$0xff] %v9015_v47  ;;  %v1867_v12 = vmul.f32 %v9015_v47, %v9015_v47  ;;  %10723 = vst [vmem:[#allocation16_spill] sm:$0xff] %v9035_v33  ;;  %v1868_v61 = vmul.f32 %v9035_v33, %v9035_v33 }
 0x319   : > { %3946 = vadd.xlane.f32.xlu1 %v9002_v29  ;;  %v9008_v38 = vpop.xlane.xlu1 %2870 }
 0x31a   : > { %v9017_v6 = vpop.xlane.xlu0 %2868 }
 0x31c   : > { %3948 = vadd.xlane.f32.xlu0 %v9012_v28  ;;  %v10724_v28 = vld [vmem:[#allocation90_spill] sm:$0xff] }
 0x31d   : > { %1882 = vadd.xlane.f32.xlu1 %v1866_v57  ;;  %v9023_v49 = vpop.xlane.xlu1 %2874  ;;  %v9042_v11 = vadd.f32 %v10724_v28, %v8187_v52  ;;  %v9062_v28 = vadd.f32 %v8745_v39, %v8201_v41  ;;  %v1840_v39 = vmul.f32 0.0078125, %v8766_v13  ;;  %v10739_v13 = vld [vmem:[#allocation20_spill] sm:$0xff] }
 0x31e   : > { %v9026_v29 = vpop.xlane.xlu0 %2872 }
 0x31f   : > { %10720 = vst [vmem:[#allocation129_spill] sm:$0xff] %v9026_v29  ;;  %10725 = vst [vmem:[#allocation90_spill] sm:$0xff] %v9042_v11  ;;  %v9045_v29 = vsub.f32 %v10726_v56, %v1837_v3  ;;  %v9065_v3 = vsub.f32 %v10731_v5, %v1838_v0 }
 0x320   : > { %1884 = vadd.xlane.f32.xlu0 %v1867_v12  ;;  %10730 = vst [vmem:[#allocation133_spill] sm:$0xff] %v9062_v28 }
 0x321   : > { %3950 = vadd.xlane.f32.xlu1 %v9032_v31  ;;  %v9038_v57 = vpop.xlane.xlu1 %2878  ;;  %10727 = vst [vmem:[#allocation17_spill] sm:$0xff] %v9045_v29  ;;  %v1869_v56 = vmul.f32 %v9045_v29, %v9045_v29  ;;  %10732 = vst [vmem:[#allocation18_spill] sm:$0xff] %v9065_v3  ;;  %v1870_v0 = vmul.f32 %v9065_v3, %v9065_v3 }
 0x322   : > { %v9047_v47 = vpop.xlane.xlu0 %2876 }
 0x324   : > { %3952 = vadd.xlane.f32.xlu0 %v9042_v11  ;;  %v10733_v11 = vld [vmem:[#allocation93_spill] sm:$0xff] }
 0x325   : > { %1886 = vadd.xlane.f32.xlu1 %v1868_v61  ;;  %v9053_v12 = vpop.xlane.xlu1 %2882  ;;  %v9070_v33 = vadd.f32 %v10733_v11, %v8217_v50  ;;  %v1841_v11 = vmul.f32 0.0078125, %v8788_v26  ;;  %v10741_v26 = vld [vmem:[#allocation96_spill] sm:$0xff] }
 0x326   : > { %10728 = vst [vmem:[#allocation131_spill] sm:$0xff] %v9053_v12  ;;  %v9056_v31 = vpop.xlane.xlu0 %2880  ;;  %v9073_v12 = vsub.f32 %v10735_v40, %v1839_v9  ;;  %v9091_v40 = vsub.f32 %v10739_v13, %v1840_v39  ;;  %v1843_v13 = vmul.f32 0.0078125, %v8813_v18  ;;  %v9123_v18 = vld [vmem:[%s10386_s5] ss:$0 sm:$0xff] }
 0x327   : > { %10729 = vst [vmem:[#allocation132_spill] sm:$0xff] %v9056_v31  ;;  %10734 = vst [vmem:[#allocation93_spill] sm:$0xff] %v9070_v33 }
 0x328   : > { %1888 = vadd.xlane.f32.xlu0 %v1869_v56  ;;  %10736 = vst [vmem:[#allocation19_spill] sm:$0xff] %v9073_v12  ;;  %v1871_v9 = vmul.f32 %v9073_v12, %v9073_v12  ;;  %10740 = vst [vmem:[#allocation20_spill] sm:$0xff] %v9091_v40 }
 0x329   : > { %3954 = vadd.xlane.f32.xlu1 %v9062_v28  ;;  %v808_v61 = vpop.xlane.xlu1 %807 }
 0x32a   : > { %v839_v31 = vmul.f32 0.0078125, %v808_v61  ;;  %v9075_v29 = vpop.xlane.xlu0 %2884  ;;  %v9088_v61 = vadd.f32 %v8764_v19, %v8221_v21  ;;  %v1842_v19 = vmul.f32 0.0078125, %v8785_v14  ;;  %v9115_v14 = vadd.f32 %v8783_v37, %v8095_v55  ;;  %v10748_v55 = vld [vmem:[#allocation99_spill] sm:$0xff] }
 0x32b   : > { %v9131_v37 = vadd.f32 %v10748_v55, %v8104_v2  ;;  %v1845_v55 = vmul.f32 0.0078125, %v8826_v46 }
 0x32c   : > { %v855_v5 = vadd.f32 1e-05, %v839_v31  ;;  %3956 = vadd.xlane.f32.xlu0 %v9070_v33  ;;  %10738 = vst [vmem:[#allocation135_spill] sm:$0xff] %v9088_v61  ;;  %v10743_v33 = vld [vmem:[#allocation21_spill] sm:$0xff]  ;;  %10745 = vst [vmem:[#allocation136_spill] sm:$0xff] %v9115_v14 }
 0x32d   : > { %1890 = vadd.xlane.f32.xlu1 %v1870_v0  ;;  %v9081_v56 = vpop.xlane.xlu1 %2886  ;;  %v9099_v3 = vsub.f32 %v10743_v33, %v1841_v11 }
 0x32e   : > { %10737 = vst [vmem:[#allocation134_spill] sm:$0xff] %v9081_v56  ;;  %6972 = vrsqrt.f32 %v855_v5  ;;  %v810_v28 = vpop.xlane.xlu0 %809  ;;  %v9096_v5 = vadd.f32 %v10741_v26, %v8237_v23 }
 0x32f   : > { %v840_v31 = vmul.f32 0.0078125, %v810_v28  ;;  %10744 = vst [vmem:[#allocation21_spill] sm:$0xff] %v9099_v3  ;;  %v1872_v28 = vmul.f32 %v9091_v40, %v9091_v40 }
 0x330   : > { %1892 = vadd.xlane.f32.xlu0 %v1871_v9  ;;  %10742 = vst [vmem:[#allocation96_spill] sm:$0xff] %v9096_v5 }
 0x331   : > { %v856_v0 = vadd.f32 1e-05, %v840_v31  ;;  %3958 = vadd.xlane.f32.xlu1 %v9088_v61  ;;  %v1873_v31 = vmul.f32 %v9099_v3, %v9099_v3 }
 0x332   : > { %v812_v12 = vpop.xlane.xlu1 %811  ;;  %v9101_v56 = vpop.xlane.xlu0 %2888 }
 0x333   : > { %6974 = vrsqrt.f32 %v856_v0  ;;  %v841_v39 = vmul.f32 0.0078125, %v812_v12  ;;  %v10746_v12 = vld [vmem:[#allocation22_spill] sm:$0xff] }
 0x334   : > { %3960 = vadd.xlane.f32.xlu0 %v9096_v5  ;;  %v9118_v0 = vsub.f32 %v10746_v12, %v1842_v19  ;;  %10749 = vst [vmem:[#allocation22_spill] sm:$0xff] %v9131_v37  ;;  %v1844_v19 = vmul.f32 0.0078125, %v8804_v45 }
 0x335   : > { %v857_v9 = vadd.f32 1e-05, %v841_v39  ;;  %1894 = vadd.xlane.f32.xlu1 %v1872_v28  ;;  %v10747_v28 = vld [vmem:[#allocation55_spill] sm:$0xff] }
 0x336   : > { %v9109_v33 = vpop.xlane.xlu1 %2890  ;;  %v814_v11 = vpop.xlane.xlu0 %813  ;;  %v1874_v2 = vmul.f32 %v9118_v0, %v9118_v0 }
 0x337   : > { %6976 = vrsqrt.f32 %v857_v9  ;;  %v842_v26 = vmul.f32 0.0078125, %v814_v11  ;;  %v10750_v9 = vld [vmem:[#allocation23_spill] sm:$0xff] }
 0x338   : > { %v6973_v39 = vpop.eup %6972  ;;  %1896 = vadd.xlane.f32.xlu0 %v1873_v31  ;;  %v9135_v11 = vsub.f32 %v10750_v9, %v1843_v13  ;;  %v9140_v31 = vld [vmem:[%s10387_s6] ss:$0 sm:$0xff] }
 0x339   : > { %v887_v5 = vmul.f32 %v6973_v39, %v10747_v28  ;;  %v858_v61 = vadd.f32 1e-05, %v842_v26  ;;  %4462 = vadd.xlane.f32.xlu1 %v9115_v14  ;;  %v10752_v9 = vld [vmem:[#allocation57_spill] sm:$0xff] }
 0x33a   : > { %v816_v12 = vpop.xlane.xlu1 %815  ;;  %v9142_v3 = vpop.xlane.xlu0 %2892 }
 0x33b   : > { %10751 = vst [vmem:[#allocation55_spill] sm:$0xff] %v9142_v3  ;;  %v909_v26 = vmul.f32 %v9123_v18, %v887_v5  ;;  %6978 = vrsqrt.f32 %v858_v61  ;;  %v843_v39 = vmul.f32 0.0078125, %v816_v12  ;;  %v1875_v61 = vmul.f32 %v9135_v11, %v9135_v11  ;;  %v10753_v12 = vld [vmem:[#allocation24_spill] sm:$0xff] }
 0x33c   : > { %4464 = vadd.xlane.f32.xlu0 %v9131_v37  ;;  %v9157_v5 = vadd.f32 %v8802_v27, %v8101_v44  ;;  %v9160_v37 = vsub.f32 %v10753_v12, %v1844_v19  ;;  %v10754_v44 = vld [vmem:[#allocation102_spill] sm:$0xff]  ;;  %v10756_v19 = vld [vmem:[#allocation25_spill] sm:$0xff] }
 0x33d   : > { %v6975_v45 = vpop.eup %6974  ;;  %v931_v13 = vadd.f32 %v9140_v31, %v909_v26  ;;  %v859_v28 = vadd.f32 1e-05, %v843_v39  ;;  %1898 = vadd.xlane.f32.xlu1 %v1874_v2  ;;  %v9169_v27 = vadd.f32 %v10754_v44, %v10691_v4 }
 0x33e   : > { %v888_v14 = vmul.f32 %v6975_v45, %v10752_v9  ;;  %v9151_v40 = vpop.xlane.xlu1 %2894  ;;  %v818_v3 = vpop.xlane.xlu0 %817  ;;  %v9172_v45 = vsub.f32 %v10756_v19, %v1845_v55  ;;  %v10758_v19 = vld [vmem:[#allocation61_spill] sm:$0xff] }
 0x33f   : > { %947 = vst [vmem:[%s9162_s19] sm:$0xff] %v931_v13  ;;  %6980 = vrsqrt.f32 %v859_v28  ;;  %v844_v46 = vmul.f32 0.0078125, %v818_v3  ;;  %10755 = vst [vmem:[#allocation99_spill] sm:$0xff] %v9169_v27  ;;  %v10757_v13 = vld [vmem:[#allocation59_spill] sm:$0xff] }
 0x340   : > { %v910_v26 = vmul.f32 %v9123_v18, %v888_v14  ;;  %1900 = vadd.xlane.f32.xlu0 %v1875_v61  ;;  %v1846_v14 = vmul.f32 0.0078125, %v8823_v16 }
 0x341   : > { %v6977_v39 = vpop.eup %6976  ;;  %v860_v2 = vadd.f32 1e-05, %v844_v46  ;;  %4466 = vadd.xlane.f32.xlu1 %v9157_v5  ;;  %v1876_v46 = vmul.f32 %v9160_v37, %v9160_v37 }
 0x342   : > { %v932_v9 = vadd.f32 %v9140_v31, %v910_v26  ;;  %v889_v28 = vmul.f32 %v6977_v39, %v10757_v13  ;;  %v820_v3 = vpop.xlane.xlu1 %819  ;;  %v9176_v12 = vpop.xlane.xlu0 %2896  ;;  %v1847_v39 = vmul.f32 0.0078125, %v8851_v48 }
 0x343   : > { %6982 = vrsqrt.f32 %v860_v2  ;;  %v845_v61 = vmul.f32 0.0078125, %v820_v3  ;;  %v10759_v3 = vld [vmem:[#allocation26_spill] sm:$0xff] }
 0x344   : > { %948 = vst [vmem:[%s9162_s19 + $0x8] sm:$0xff] %v932_v9  ;;  %v911_v4 = vmul.f32 %v9123_v18, %v889_v28  ;;  %4468 = vadd.xlane.f32.xlu0 %v9169_v27  ;;  %v1877_v9 = vmul.f32 %v9172_v45, %v9172_v45  ;;  %v9193_v28 = vadd.f32 %v8821_v53, %v10696_v60  ;;  %v10762_v53 = vld [vmem:[#allocation27_spill] sm:$0xff] }
 0x345   : > { %v6979_v55 = vpop.eup %6978  ;;  %v861_v26 = vadd.f32 1e-05, %v845_v61  ;;  %1902 = vadd.xlane.f32.xlu1 %v1876_v46  ;;  %v9196_v27 = vsub.f32 %v10759_v3, %v1846_v14  ;;  %v9206_v60 = vsub.f32 %v10762_v53, %v1847_v39  ;;  %v10764_v53 = vld [vmem:[#allocation65_spill] sm:$0xff] }
 0x346   : > { %v933_v44 = vadd.f32 %v9140_v31, %v911_v4  ;;  %v890_v16 = vmul.f32 %v6979_v55, %v10758_v19  ;;  %v9187_v2 = vpop.xlane.xlu1 %3398  ;;  %v822_v13 = vpop.xlane.xlu0 %821  ;;  %v10760_v55 = vld [vmem:[#allocation105_spill] sm:$0xff] }
 0x347   : > { %6984 = vrsqrt.f32 %v861_v26  ;;  %v846_v61 = vmul.f32 0.0078125, %v822_v13  ;;  %v9203_v19 = vadd.f32 %v10760_v55, %v10700_v42  ;;  %v10763_v26 = vld [vmem:[#allocation63_spill] sm:$0xff] }
 0x348   : > { %949 = vst [vmem:[%s9162_s19 + $0x10] sm:$0xff] %v933_v44  ;;  %v912_v48 = vmul.f32 %v9123_v18, %v890_v16  ;;  %1904 = vadd.xlane.f32.xlu0 %v1877_v9  ;;  %v1848_v16 = vmul.f32 0.0078125, %v8842_v10 }
 0x349   : > { %v6981_v46 = vpop.eup %6980  ;;  %v862_v4 = vadd.f32 1e-05, %v846_v61  ;;  %4470 = vadd.xlane.f32.xlu1 %v9193_v28  ;;  %10761 = vst [vmem:[#allocation23_spill] sm:$0xff] %v9203_v19  ;;  %v1878_v61 = vmul.f32 %v9196_v27, %v9196_v27 }
 0x34a   : > { %v934_v14 = vadd.f32 %v9140_v31, %v912_v48  ;;  %v891_v13 = vmul.f32 %v6981_v46, %v10763_v26  ;;  %v824_v44 = vpop.xlane.xlu1 %823  ;;  %v9210_v3 = vpop.xlane.xlu0 %3400  ;;  %v1849_v46 = vmul.f32 0.0078125, %v8864_v54 }
 0x34b   : > { %6986 = vrsqrt.f32 %v862_v4  ;;  %v847_v9 = vmul.f32 0.0078125, %v824_v44  ;;  %v10765_v44 = vld [vmem:[#allocation28_spill] sm:$0xff] }
 0x34c   : > { %950 = vst [vmem:[%s9162_s19 + $0x18] sm:$0xff] %v934_v14  ;;  %v913_v42 = vmul.f32 %v9123_v18, %v891_v13  ;;  %4472 = vadd.xlane.f32.xlu0 %v9203_v19  ;;  %v1879_v14 = vmul.f32 %v9206_v60, %v9206_v60  ;;  %v9227_v13 = vadd.f32 %v8840_v32, %v8132_v7  ;;  %v10768_v7 = vld [vmem:[#allocation29_spill] sm:$0xff] }
 0x34d   : > { %v6983_v39 = vpop.eup %6982  ;;  %v863_v48 = vadd.f32 1e-05, %v847_v9  ;;  %1906 = vadd.xlane.f32.xlu1 %v1878_v61  ;;  %v9230_v19 = vsub.f32 %v10765_v44, %v1848_v16  ;;  %v9240_v32 = vsub.f32 %v10768_v7, %v1849_v46  ;;  %v10771_v7 = vld [vmem:[#allocation69_spill] sm:$0xff] }
 0x34e   : > { %v935_v55 = vadd.f32 %v9140_v31, %v913_v42  ;;  %v892_v10 = vmul.f32 %v6983_v39, %v10764_v53  ;;  %v9221_v4 = vpop.xlane.xlu1 %3402  ;;  %v826_v26 = vpop.xlane.xlu0 %825  ;;  %v10767_v39 = vld [vmem:[#allocation108_spill] sm:$0xff] }
 0x34f   : > { %10766 = vst [vmem:[#allocation57_spill] sm:$0xff] %v9230_v19  ;;  %6988 = vrsqrt.f32 %v863_v48  ;;  %v848_v9 = vmul.f32 0.0078125, %v826_v26  ;;  %v9237_v53 = vadd.f32 %v10767_v39, %v8141_v34  ;;  %10769 = vst [vmem:[#allocation24_spill] sm:$0xff] %v9240_v32  ;;  %v10770_v48 = vld [vmem:[#allocation67_spill] sm:$0xff] }
 0x350   : > { %951 = vst [vmem:[%s9162_s19 + $0x20] sm:$0xff] %v935_v55  ;;  %v914_v54 = vmul.f32 %v9123_v18, %v892_v10  ;;  %1908 = vadd.xlane.f32.xlu0 %v1879_v14  ;;  %v2366_v10 = vmul.f32 0.0078125, %v8861_v35 }
 0x351   : > { %v6985_v61 = vpop.eup %6984  ;;  %v864_v42 = vadd.f32 1e-05, %v848_v9  ;;  %4474 = vadd.xlane.f32.xlu1 %v9227_v13  ;;  %v1880_v9 = vmul.f32 %v9230_v19, %v9230_v19 }
 0x352   : > { %v936_v16 = vadd.f32 %v9140_v31, %v914_v54  ;;  %v893_v26 = vmul.f32 %v6985_v61, %v10770_v48  ;;  %v828_v55 = vpop.xlane.xlu1 %827  ;;  %v9244_v44 = vpop.xlane.xlu0 %3404  ;;  %v2367_v61 = vmul.f32 0.0078125, %v8889_v25 }
 0x353   : > { %6990 = vrsqrt.f32 %v864_v42  ;;  %v849_v14 = vmul.f32 0.0078125, %v828_v55  ;;  %v10772_v55 = vld [vmem:[#allocation30_spill] sm:$0xff] }
 0x354   : > { %952 = vst [vmem:[%s9162_s19 + $0x28] sm:$0xff] %v936_v16  ;;  %v915_v34 = vmul.f32 %v9123_v18, %v893_v26  ;;  %4476 = vadd.xlane.f32.xlu0 %v9237_v53  ;;  %v1881_v16 = vmul.f32 %v9240_v32, %v9240_v32  ;;  %v9261_v26 = vadd.f32 %v8859_v20, %v8151_v17  ;;  %v10775_v17 = vld [vmem:[#allocation31_spill] sm:$0xff] }
 0x355   : > { %v6987_v46 = vpop.eup %6986  ;;  %v865_v54 = vadd.f32 1e-05, %v849_v14  ;;  %1910 = vadd.xlane.f32.xlu1 %v1880_v9  ;;  %v9264_v19 = vsub.f32 %v10772_v55, %v2366_v10  ;;  %v9274_v20 = vsub.f32 %v10775_v17, %v2367_v61  ;;  %v10778_v17 = vld [vmem:[#allocation73_spill] sm:$0xff] }
 0x356   : > { %v937_v39 = vadd.f32 %v9140_v31, %v915_v34  ;;  %v894_v35 = vmul.f32 %v6987_v46, %v10771_v7  ;;  %v9255_v42 = vpop.xlane.xlu1 %3406  ;;  %v830_v48 = vpop.xlane.xlu0 %829  ;;  %v10774_v46 = vld [vmem:[#allocation111_spill] sm:$0xff] }
 0x357   : > { %10773 = vst [vmem:[#allocation102_spill] sm:$0xff] %v9264_v19  ;;  %6992 = vrsqrt.f32 %v865_v54  ;;  %v850_v14 = vmul.f32 0.0078125, %v830_v48  ;;  %v9271_v7 = vadd.f32 %v10774_v46, %v8167_v15  ;;  %10776 = vst [vmem:[#allocation25_spill] sm:$0xff] %v9274_v20  ;;  %v10777_v54 = vld [vmem:[#allocation71_spill] sm:$0xff] }
 0x358   : > { %953 = vst [vmem:[%s9162_s19 + $0x30] sm:$0xff] %v937_v39  ;;  %v916_v25 = vmul.f32 %v9123_v18, %v894_v35  ;;  %1912 = vadd.xlane.f32.xlu0 %v1881_v16  ;;  %v2368_v35 = vmul.f32 0.0078125, %v8880_v51 }
 0x359   : > { %v6989_v9 = vpop.eup %6988  ;;  %v866_v34 = vadd.f32 1e-05, %v850_v14  ;;  %4478 = vadd.xlane.f32.xlu1 %v9261_v26  ;;  %v2398_v14 = vmul.f32 %v9264_v19, %v9264_v19  ;;  %v10780_v19 = vld [vmem:[#allocation32_spill] sm:$0xff] }
 0x35a   : > { %v938_v10 = vadd.f32 %v9140_v31, %v916_v25  ;;  %v895_v48 = vmul.f32 %v6989_v9, %v10777_v54  ;;  %v832_v39 = vpop.xlane.xlu1 %831  ;;  %v9278_v55 = vpop.xlane.xlu0 %3408  ;;  %v2369_v9 = vmul.f32 0.0078125, %v8902_v63  ;;  %v9298_v32 = vsub.f32 %v10780_v19, %v2368_v35  ;;  %v10786_v35 = vld [vmem:[#allocation75_spill] sm:$0xff] }
 0x35b   : > { %6994 = vrsqrt.f32 %v866_v34  ;;  %v851_v16 = vmul.f32 0.0078125, %v832_v39  ;;  %v10779_v39 = vld [vmem:[#allocation115_spill] sm:$0xff] }
 0x35c   : > { %954 = vst [vmem:[%s9162_s19 + $0x38] sm:$0xff] %v938_v10  ;;  %v917_v15 = vmul.f32 %v9123_v18, %v895_v48  ;;  %4480 = vadd.xlane.f32.xlu0 %v9271_v7  ;;  %v2399_v10 = vmul.f32 %v9274_v20, %v9274_v20  ;;  %v9295_v48 = vadd.f32 %v10779_v39, %v8171_v43  ;;  %10781 = vst [vmem:[#allocation59_spill] sm:$0xff] %v9298_v32  ;;  %v10784_v43 = vld [vmem:[#allocation33_spill] sm:$0xff] }
 0x35d   : > { %v6991_v61 = vpop.eup %6990  ;;  %v867_v25 = vadd.f32 1e-05, %v851_v16  ;;  %2414 = vadd.xlane.f32.xlu1 %v2398_v14  ;;  %v9308_v39 = vsub.f32 %v10784_v43, %v2369_v9  ;;  %v2400_v20 = vmul.f32 %v9298_v32, %v9298_v32  ;;  %v10788_v43 = vld [vmem:[#allocation77_spill] sm:$0xff]  ;;  %v10790_v32 = vld [vmem:[#allocation34_spill] sm:$0xff] }
 0x35e   : > { %v939_v46 = vadd.f32 %v9140_v31, %v917_v15  ;;  %v896_v51 = vmul.f32 %v6991_v61, %v10778_v17  ;;  %v9289_v34 = vpop.xlane.xlu1 %3410  ;;  %v834_v54 = vpop.xlane.xlu0 %833  ;;  %v10782_v61 = vld [vmem:[#allocation114_spill] sm:$0xff] }
 0x35f   : > { %6996 = vrsqrt.f32 %v867_v25  ;;  %v852_v16 = vmul.f32 0.0078125, %v834_v54  ;;  %v9305_v17 = vadd.f32 %v10782_v61, %v8187_v52  ;;  %10785 = vst [vmem:[#allocation26_spill] sm:$0xff] %v9308_v39 }
 0x360   : > { %955 = vst [vmem:[%s9162_s19 + $0x40] sm:$0xff] %v939_v46  ;;  %v918_v63 = vmul.f32 %v9123_v18, %v896_v51  ;;  %2416 = vadd.xlane.f32.xlu0 %v2399_v10  ;;  %v10787_v51 = vld [vmem:[#allocation120_spill] sm:$0xff] }
 0x361   : > { %v6993_v14 = vpop.eup %6992  ;;  %v868_v15 = vadd.f32 1e-05, %v852_v16  ;;  %4482 = vadd.xlane.f32.xlu1 %v9295_v48  ;;  %10783 = vst [vmem:[#allocation61_spill] sm:$0xff] %v9305_v17  ;;  %v2370_v10 = vmul.f32 0.0078125, %v10787_v51  ;;  %v10789_v51 = vld [vmem:[#allocation119_spill] sm:$0xff] }
 0x362   : > { %v940_v19 = vadd.f32 %v9140_v31, %v918_v63  ;;  %v897_v25 = vmul.f32 %v6993_v14, %v10786_v35  ;;  %v836_v46 = vpop.xlane.xlu1 %835  ;;  %v9312_v54 = vpop.xlane.xlu0 %3412  ;;  %v2371_v14 = vmul.f32 0.0078125, %v8927_v59 }
 0x363   : > { %6998 = vrsqrt.f32 %v868_v15  ;;  %v853_v16 = vmul.f32 0.0078125, %v836_v46 }
 0x364   : > { %956 = vst [vmem:[%s9162_s19 + $0x48] sm:$0xff] %v940_v19  ;;  %v919_v52 = vmul.f32 %v9123_v18, %v897_v25  ;;  %4484 = vadd.xlane.f32.xlu0 %v9305_v17  ;;  %v2401_v19 = vmul.f32 %v9308_v39, %v9308_v39  ;;  %v9329_v25 = vadd.f32 %v10789_v51, %v8201_v41  ;;  %v10794_v41 = vld [vmem:[#allocation35_spill] sm:$0xff] }
 0x365   : > { %v6995_v9 = vpop.eup %6994  ;;  %v869_v63 = vadd.f32 1e-05, %v853_v16  ;;  %2418 = vadd.xlane.f32.xlu1 %v2400_v20  ;;  %v9332_v17 = vsub.f32 %v10790_v32, %v2370_v10  ;;  %v9342_v51 = vsub.f32 %v10794_v41, %v2371_v14  ;;  %v10796_v10 = vld [vmem:[#allocation79_spill] sm:$0xff] }
 0x366   : > { %v941_v61 = vadd.f32 %v9140_v31, %v919_v52  ;;  %v898_v35 = vmul.f32 %v6995_v9, %v10788_v43  ;;  %v9323_v15 = vpop.xlane.xlu1 %3414  ;;  %v838_v46 = vpop.xlane.xlu0 %837  ;;  %v10792_v9 = vld [vmem:[#allocation118_spill] sm:$0xff] }
 0x367   : > { %10791 = vst [vmem:[#allocation105_spill] sm:$0xff] %v9332_v17  ;;  %7000 = vrsqrt.f32 %v869_v63  ;;  %v854_v20 = vmul.f32 0.0078125, %v838_v46  ;;  %v9339_v43 = vadd.f32 %v10792_v9, %v8217_v50  ;;  %10795 = vst [vmem:[#allocation63_spill] sm:$0xff] %v9342_v51  ;;  %v10797_v9 = vld [vmem:[#allocation124_spill] sm:$0xff] }
 0x368   : > { %957 = vst [vmem:[%s9162_s19 + $0x50] sm:$0xff] %v941_v61  ;;  %v920_v59 = vmul.f32 %v9123_v18, %v898_v35  ;;  %2420 = vadd.xlane.f32.xlu0 %v2401_v19  ;;  %v2372_v35 = vmul.f32 0.0078125, %v8918_v1  ;;  %v2373_v41 = vmul.f32 0.0078125, %v10797_v9 }
 0x369   : > { %v6997_v16 = vpop.eup %6996  ;;  %v870_v52 = vadd.f32 1e-05, %v854_v20  ;;  %4486 = vadd.xlane.f32.xlu1 %v9329_v25  ;;  %10793 = vst [vmem:[#allocation27_spill] sm:$0xff] %v9339_v43  ;;  %v2402_v20 = vmul.f32 %v9332_v17, %v9332_v17 }
 0x36a   : > { %v942_v32 = vadd.f32 %v9140_v31, %v920_v59  ;;  %v899_v63 = vmul.f32 %v6997_v16, %v10796_v10  ;;  %v1351_v61 = vpop.xlane.xlu1 %1350  ;;  %v9346_v46 = vpop.xlane.xlu0 %3416  ;;  %v2374_v59 = vmul.f32 0.0078125, %v8933_v62 }
 0x36b   : > { %7002 = vrsqrt.f32 %v870_v52  ;;  %v1382_v19 = vmul.f32 0.0078125, %v1351_v61  ;;  %v10798_v52 = vld [vmem:[#allocation81_spill] sm:$0xff] }
 0x36c   : > { %958 = vst [vmem:[%s9162_s19 + $0x58] sm:$0xff] %v942_v32  ;;  %v921_v50 = vmul.f32 %v9123_v18, %v899_v63  ;;  %4488 = vadd.xlane.f32.xlu0 %v9339_v43  ;;  %v2403_v32 = vmul.f32 %v9342_v51, %v9342_v51  ;;  %v10799_v63 = vld [vmem:[#allocation123_spill] sm:$0xff]  ;;  %v10800_v43 = vld [vmem:[#allocation36_spill] sm:$0xff] }
 0x36d   : > { %v6999_v14 = vpop.eup %6998  ;;  %v1398_v16 = vadd.f32 1e-05, %v1382_v19  ;;  %2422 = vadd.xlane.f32.xlu1 %v2402_v20  ;;  %v9364_v39 = vadd.f32 %v10799_v63, %v8221_v21  ;;  %v9367_v62 = vsub.f32 %v10800_v43, %v2372_v35  ;;  %v10806_v43 = vld [vmem:[#allocation37_spill] sm:$0xff] }
 0x36e   : > { %v943_v1 = vadd.f32 %v9140_v31, %v921_v50  ;;  %v900_v10 = vmul.f32 %v6999_v14, %v10798_v52  ;;  %v9358_v61 = vpop.xlane.xlu1 %3418  ;;  %v1353_v17 = vpop.xlane.xlu0 %1352  ;;  %v10802_v14 = vld [vmem:[#allocation122_spill] sm:$0xff]  ;;  %v9380_v35 = vsub.f32 %v10806_v43, %v2373_v41 }
 0x36f   : > { %10801 = vst [vmem:[#allocation65_spill] sm:$0xff] %v9367_v62  ;;  %7004 = vrsqrt.f32 %v1398_v16  ;;  %v1383_v19 = vmul.f32 0.0078125, %v1353_v17  ;;  %v9373_v9 = vadd.f32 %v10802_v14, %v8237_v23  ;;  %v10804_v52 = vld [vmem:[#allocation38_spill] sm:$0xff]  ;;  %v2375_v17 = vmul.f32 0.0078125, %v8957_v24 }
 0x370   : > { %959 = vst [vmem:[%s9162_s19 + $0x60] sm:$0xff] %v943_v1  ;;  %v922_v20 = vmul.f32 %v9123_v18, %v900_v10  ;;  %2424 = vadd.xlane.f32.xlu0 %v2403_v32  ;;  %v9376_v51 = vsub.f32 %v10804_v52, %v2374_v59  ;;  %10807 = vst [vmem:[#allocation29_spill] sm:$0xff] %v9380_v35  ;;  %v10808_v1 = vld [vmem:[#allocation83_spill] sm:$0xff]  ;;  %v2376_v23 = vmul.f32 0.0078125, %v8948_v58  ;;  %v10811_v43 = vld [vmem:[#allocation86_spill] sm:$0xff] }
 0x371   : > { %v7001_v50 = vpop.eup %7000  ;;  %10803 = vst [vmem:[#allocation28_spill] sm:$0xff] %v9373_v9  ;;  %v1399_v21 = vadd.f32 1e-05, %v1383_v19  ;;  %4490 = vadd.xlane.f32.xlu1 %v9364_v39  ;;  %v2404_v19 = vmul.f32 %v9367_v62, %v9367_v62  ;;  %v10809_v58 = vld [vmem:[#allocation39_spill] sm:$0xff]  ;;  %v10812_v62 = vld [vmem:[#allocation40_spill] sm:$0xff] }
 0x372   : > { %10805 = vst [vmem:[#allocation108_spill] sm:$0xff] %v9376_v51  ;;  %v944_v16 = vadd.f32 %v9140_v31, %v922_v20  ;;  %v901_v10 = vmul.f32 %v7001_v50, %v10808_v1  ;;  %v1355_v32 = vpop.xlane.xlu1 %1354  ;;  %v9385_v63 = vpop.xlane.xlu0 %3420  ;;  %v2377_v20 = vmul.f32 0.0078125, %v8966_v36  ;;  %v2406_v14 = vmul.f32 %v9376_v51, %v9376_v51 }
 0x373   : > { %7006 = vrsqrt.f32 %v1399_v21  ;;  %v1384_v59 = vmul.f32 0.0078125, %v1355_v32  ;;  %v9397_v52 = vsub.f32 %v10809_v58, %v2375_v17  ;;  %v2405_v32 = vmul.f32 %v9380_v35, %v9380_v35 }
 0x374   : > { %960 = vst [vmem:[%s9162_s19 + $0x68] sm:$0xff] %v944_v16  ;;  %v923_v41 = vmul.f32 %v9123_v18, %v901_v10  ;;  %4492 = vadd.xlane.f32.xlu0 %v9373_v9  ;;  %v9406_v36 = vsub.f32 %v10812_v62, %v2376_v23  ;;  %v2379_v62 = vmul.f32 0.0078125, %v8987_v8 }
 0x375   : > { %v7003_v24 = vpop.eup %7002  ;;  %v1400_v50 = vadd.f32 1e-05, %v1384_v59  ;;  %2426 = vadd.xlane.f32.xlu1 %v2404_v19  ;;  %10810 = vst [vmem:[#allocation67_spill] sm:$0xff] %v9397_v52  ;;  %v10813_v59 = vld [vmem:[#allocation125_spill] sm:$0xff] }
 0x376   : > { %v945_v21 = vadd.f32 %v9140_v31, %v923_v41  ;;  %v902_v16 = vmul.f32 %v7003_v24, %v10811_v43  ;;  %v9401_v1 = vpop.xlane.xlu1 %3422  ;;  %v1357_v10 = vpop.xlane.xlu0 %1356  ;;  %v2378_v19 = vmul.f32 0.0078125, %v10813_v59  ;;  %v10814_v24 = vld [vmem:[#allocation41_spill] sm:$0xff]  ;;  %v2380_v43 = vmul.f32 0.0078125, %v8978_v22 }
 0x377   : > { %7008 = vrsqrt.f32 %v1400_v50  ;;  %v1385_v51 = vmul.f32 0.0078125, %v1357_v10  ;;  %v9412_v58 = vsub.f32 %v10814_v24, %v2377_v20  ;;  %v10816_v59 = vld [vmem:[#allocation89_spill] sm:$0xff]  ;;  %v2408_v22 = vmul.f32 %v9406_v36, %v9406_v36  ;;  %v10821_v24 = vld [vmem:[#allocation43_spill] sm:$0xff] }
 0x378   : > { %961 = vst [vmem:[%s9162_s19 + $0x70] sm:$0xff] %v945_v21  ;;  %v924_v17 = vmul.f32 %v9123_v18, %v902_v16  ;;  %2428 = vadd.xlane.f32.xlu0 %v2405_v32  ;;  %v2407_v16 = vmul.f32 %v9397_v52, %v9397_v52  ;;  %v10817_v32 = vld [vmem:[#allocation42_spill] sm:$0xff]  ;;  %v10824_v52 = vld [vmem:[#allocation127_spill] sm:$0xff] }
 0x379   : > { %v7005_v41 = vpop.eup %7004  ;;  %10815 = vst [vmem:[#allocation69_spill] sm:$0xff] %v9412_v58  ;;  %v1401_v9 = vadd.f32 1e-05, %v1385_v51  ;;  %2430 = vadd.xlane.f32.xlu1 %v2406_v14  ;;  %v9423_v35 = vsub.f32 %v10817_v32, %v2378_v19  ;;  %v10819_v14 = vld [vmem:[#allocation44_spill] sm:$0xff]  ;;  %v2409_v19 = vmul.f32 %v9412_v58, %v9412_v58 }
 0x37a   : > { %v946_v23 = vadd.f32 %v9140_v31, %v924_v17  ;;  %v1430_v50 = vmul.f32 %v7005_v41, %v10816_v59  ;;  %v1359_v10 = vpop.xlane.xlu1 %1358  ;;  %v9418_v21 = vpop.xlane.xlu0 %3424  ;;  %v9430_v17 = vsub.f32 %v10819_v14, %v2380_v43  ;;  %v2381_v59 = vmul.f32 0.0078125, %v8996_v30 }
 0x37b   : > { %10818 = vst [vmem:[#allocation30_spill] sm:$0xff] %v9423_v35  ;;  %7010 = vrsqrt.f32 %v1401_v9  ;;  %v1386_v20 = vmul.f32 0.0078125, %v1359_v10  ;;  %v9435_v9 = vsub.f32 %v10821_v24, %v2379_v62  ;;  %v10823_v10 = vld [vmem:[#allocation92_spill] sm:$0xff]  ;;  %v2898_v43 = vmul.f32 0.0078125, %v10824_v52  ;;  %v10825_v24 = vld [vmem:[#allocation45_spill] sm:$0xff] }
 0x37c   : > { %962 = vst [vmem:[%s9162_s19 + $0x78] sm:$0xff] %v946_v23  ;;  %v1446_v8 = vmul.f32 %v9123_v18, %v1430_v50  ;;  %2432 = vadd.xlane.f32.xlu0 %v2407_v16  ;;  %10820 = vst [vmem:[#allocation111_spill] sm:$0xff] %v9430_v17  ;;  %v9451_v52 = vsub.f32 %v10825_v24, %v2381_v59 }
 0x37d   : > { %v7007_v51 = vpop.eup %7006  ;;  %v1402_v41 = vadd.f32 1e-05, %v1386_v20  ;;  %2434 = vadd.xlane.f32.xlu1 %v2408_v22  ;;  %10822 = vst [vmem:[#allocation31_spill] sm:$0xff] %v9435_v9  ;;  %v2410_v22 = vmul.f32 %v9423_v35, %v9423_v35 }
 0x37e   : > { %v1462_v23 = vadd.f32 %v9140_v31, %v1446_v8  ;;  %v1431_v50 = vmul.f32 %v7007_v51, %v10823_v10  ;;  %v9440_v16 = vpop.xlane.xlu1 %3426  ;;  %v1361_v32 = vpop.xlane.xlu0 %1360  ;;  %v2899_v8 = vmul.f32 0.0078125, %v9017_v6  ;;  %v2412_v51 = vmul.f32 %v9430_v17, %v9430_v17  ;;  %10826 = vst [vmem:[#allocation71_spill] sm:$0xff] %v9451_v52  ;;  %v10827_v10 = vld [vmem:[#allocation95_spill] sm:$0xff] }
 0x37f   : > { %7012 = vrsqrt.f32 %v1402_v41  ;;  %v1387_v20 = vmul.f32 0.0078125, %v1361_v32 }
 0x380   : > { %4791 = vst [vmem:[%s9162_s19 + $0x80] sm:$0xff] %v1462_v23  ;;  %v1447_v62 = vmul.f32 %v9123_v18, %v1431_v50  ;;  %2436 = vadd.xlane.f32.xlu0 %v2409_v19  ;;  %v2411_v19 = vmul.f32 %v9435_v9, %v9435_v9  ;;  %v10828_v50 = vld [vmem:[#allocation46_spill] sm:$0xff]  ;;  %v10832_v9 = vld [vmem:[#allocation129_spill] sm:$0xff] }
 0x381   : > { %v7009_v30 = vpop.eup %7008  ;;  %v1403_v14 = vadd.f32 1e-05, %v1387_v20  ;;  %2438 = vadd.xlane.f32.xlu1 %v2410_v22  ;;  %v9460_v6 = vsub.f32 %v10828_v50, %v2898_v43  ;;  %v2900_v20 = vmul.f32 0.0078125, %v9008_v38  ;;  %v2901_v43 = vmul.f32 0.0078125, %v10832_v9  ;;  %v10833_v38 = vld [vmem:[#allocation98_spill] sm:$0xff] }
 0x382   : > { %v1463_v41 = vadd.f32 %v9140_v31, %v1447_v62  ;;  %v1432_v32 = vmul.f32 %v7009_v30, %v10827_v10  ;;  %v1363_v23 = vpop.xlane.xlu1 %1362  ;;  %v9455_v58 = vpop.xlane.xlu0 %3428  ;;  %v10830_v30 = vld [vmem:[#allocation47_spill] sm:$0xff]  ;;  %v2902_v10 = vmul.f32 0.0078125, %v9023_v49 }
 0x383   : > { %10829 = vst [vmem:[#allocation73_spill] sm:$0xff] %v9460_v6  ;;  %7014 = vrsqrt.f32 %v1403_v14  ;;  %v1388_v22 = vmul.f32 0.0078125, %v1363_v23  ;;  %v9466_v24 = vsub.f32 %v10830_v30, %v2899_v8  ;;  %v2930_v49 = vmul.f32 %v9460_v6, %v9460_v6  ;;  %v10838_v30 = vld [vmem:[#allocation49_spill] sm:$0xff] }
 0x384   : > { %4792 = vst [vmem:[%s9162_s19 + $0x88] sm:$0xff] %v1463_v41  ;;  %v1448_v59 = vmul.f32 %v9123_v18, %v1432_v32  ;;  %2440 = vadd.xlane.f32.xlu0 %v2411_v19  ;;  %v2413_v32 = vmul.f32 %v9451_v52, %v9451_v52  ;;  %v10834_v19 = vld [vmem:[#allocation48_spill] sm:$0xff] }
 0x385   : > { %v7011_v62 = vpop.eup %7010  ;;  %10831 = vst [vmem:[#allocation115_spill] sm:$0xff] %v9466_v24  ;;  %v1404_v17 = vadd.f32 1e-05, %v1388_v22  ;;  %2442 = vadd.xlane.f32.xlu1 %v2412_v51  ;;  %v9477_v35 = vsub.f32 %v10834_v19, %v2900_v20  ;;  %v10836_v22 = vld [vmem:[#allocation50_spill] sm:$0xff]  ;;  %v2931_v20 = vmul.f32 %v9466_v24, %v9466_v24 }
 0x386   : > { %v1464_v50 = vadd.f32 %v9140_v31, %v1448_v59  ;;  %v1433_v14 = vmul.f32 %v7011_v62, %v10833_v38  ;;  %v9472_v23 = vpop.xlane.xlu1 %3930  ;;  %v1365_v41 = vpop.xlane.xlu0 %1364  ;;  %v9484_v59 = vsub.f32 %v10836_v22, %v2902_v10  ;;  %v2903_v38 = vmul.f32 0.0078125, %v9047_v47  ;;  %v10841_v22 = vld [vmem:[#allocation132_spill] sm:$0xff] }
 0x387   : > { %10835 = vst [vmem:[#allocation32_spill] sm:$0xff] %v9477_v35  ;;  %7016 = vrsqrt.f32 %v1404_v17  ;;  %v1389_v8 = vmul.f32 0.0078125, %v1365_v41  ;;  %v9489_v17 = vsub.f32 %v10838_v30, %v2901_v43  ;;  %v10840_v41 = vld [vmem:[#allocation101_spill] sm:$0xff]  ;;  %v2904_v10 = vmul.f32 0.0078125, %v9038_v57 }
 0x388   : > { %4793 = vst [vmem:[%s9162_s19 + $0x90] sm:$0xff] %v1464_v50  ;;  %v1449_v9 = vmul.f32 %v9123_v18, %v1433_v14  ;;  %2444 = vadd.xlane.f32.xlu0 %v2413_v32  ;;  %10837 = vst [vmem:[#allocation114_spill] sm:$0xff] %v9484_v59 }
 0x389   : > { %v7013_v51 = vpop.eup %7012  ;;  %v1405_v62 = vadd.f32 1e-05, %v1389_v8  ;;  %2946 = vadd.xlane.f32.xlu1 %v2930_v49  ;;  %10839 = vst [vmem:[#allocation33_spill] sm:$0xff] %v9489_v17  ;;  %v2932_v49 = vmul.f32 %v9477_v35, %v9477_v35  ;;  %v10844_v35 = vld [vmem:[#allocation52_spill] sm:$0xff] }
 0x38a   : > { %v1465_v50 = vadd.f32 %v9140_v31, %v1449_v9  ;;  %v1434_v14 = vmul.f32 %v7013_v51, %v10840_v41  ;;  %v1367_v32 = vpop.xlane.xlu1 %1366  ;;  %v9494_v19 = vpop.xlane.xlu0 %3932  ;;  %v2905_v9 = vmul.f32 0.0078125, %v10841_v22  ;;  %v2934_v51 = vmul.f32 %v9484_v59, %v9484_v59  ;;  %v10842_v41 = vld [vmem:[#allocation51_spill] sm:$0xff] }
 0x38b   : > { %7018 = vrsqrt.f32 %v1405_v62  ;;  %v1390_v8 = vmul.f32 0.0078125, %v1367_v32  ;;  %v9505_v57 = vsub.f32 %v10842_v41, %v2903_v38  ;;  %v10843_v32 = vld [vmem:[#allocation104_spill] sm:$0xff]  ;;  %v9514_v22 = vsub.f32 %v10844_v35, %v2904_v10 }
 0x38c   : > { %4794 = vst [vmem:[%s9162_s19 + $0x98] sm:$0xff] %v1465_v50  ;;  %v1450_v43 = vmul.f32 %v9123_v18, %v1434_v14  ;;  %2948 = vadd.xlane.f32.xlu0 %v2931_v20  ;;  %v2933_v20 = vmul.f32 %v9489_v17, %v9489_v17  ;;  %v10848_v17 = vld [vmem:[#allocation134_spill] sm:$0xff] }
 0x38d   : > { %v7015_v47 = vpop.eup %7014  ;;  %v1406_v30 = vadd.f32 1e-05, %v1390_v8  ;;  %2950 = vadd.xlane.f32.xlu1 %v2932_v49  ;;  %v10845_v8 = vld [vmem:[#allocation131_spill] sm:$0xff]  ;;  %v2908_v35 = vmul.f32 0.0078125, %v10848_v17 }
 0x38e   : > { %v1466_v62 = vadd.f32 %v9140_v31, %v1450_v43  ;;  %v1435_v24 = vmul.f32 %v7015_v47, %v10843_v32  ;;  %v9509_v50 = vpop.xlane.xlu1 %3934  ;;  %v1369_v14 = vpop.xlane.xlu0 %1368  ;;  %v2906_v49 = vmul.f32 0.0078125, %v10845_v8  ;;  %v10846_v47 = vld [vmem:[#allocation53_spill] sm:$0xff]  ;;  %v2907_v32 = vmul.f32 0.0078125, %v9075_v29  ;;  %v10849_v8 = vld [vmem:[#allocation107_spill] sm:$0xff] }
 0x38f   : > { %7020 = vrsqrt.f32 %v1406_v30  ;;  %v1391_v59 = vmul.f32 0.0078125, %v1369_v14  ;;  %v9520_v41 = vsub.f32 %v10846_v47, %v2905_v9  ;;  %v2936_v29 = vmul.f32 %v9514_v22, %v9514_v22  ;;  %v10854_v47 = vld [vmem:[#allocation58_spill] sm:$0xff] }
 0x390   : > { %4795 = vst [vmem:[%s9162_s19 + $0xa0] sm:$0xff] %v1466_v62  ;;  %v1451_v38 = vmul.f32 %v9123_v18, %v1435_v24  ;;  %2952 = vadd.xlane.f32.xlu0 %v2933_v20  ;;  %v2935_v24 = vmul.f32 %v9505_v57, %v9505_v57  ;;  %v10850_v20 = vld [vmem:[#allocation54_spill] sm:$0xff] }
 0x391   : > { %v7017_v43 = vpop.eup %7016  ;;  %10847 = vst [vmem:[#allocation75_spill] sm:$0xff] %v9520_v41  ;;  %v1407_v52 = vadd.f32 1e-05, %v1391_v59  ;;  %2954 = vadd.xlane.f32.xlu1 %v2934_v51  ;;  %v9531_v6 = vsub.f32 %v10850_v20, %v2906_v49  ;;  %v10852_v51 = vld [vmem:[#allocation56_spill] sm:$0xff]  ;;  %v2937_v49 = vmul.f32 %v9520_v41, %v9520_v41 }
 0x392   : > { %v1467_v10 = vadd.f32 %v9140_v31, %v1451_v38  ;;  %v1436_v30 = vmul.f32 %v7017_v43, %v10849_v8  ;;  %v1371_v14 = vpop.xlane.xlu1 %1370  ;;  %v9526_v62 = vpop.xlane.xlu0 %3936  ;;  %v9538_v38 = vsub.f32 %v10852_v51, %v2907_v32  ;;  %v2909_v8 = vmul.f32 0.0078125, %v9101_v56  ;;  %v10857_v51 = vld [vmem:[#allocation55_spill] sm:$0xff] }
 0x393   : > { %10851 = vst [vmem:[#allocation120_spill] sm:$0xff] %v9531_v6  ;;  %7022 = vrsqrt.f32 %v1407_v52  ;;  %v1392_v9 = vmul.f32 0.0078125, %v1371_v14  ;;  %v9543_v52 = vsub.f32 %v10854_v47, %v2908_v35  ;;  %v10856_v14 = vld [vmem:[#allocation110_spill] sm:$0xff]  ;;  %v2910_v32 = vmul.f32 0.0078125, %v9109_v33 }
 0x394   : > { %4796 = vst [vmem:[%s9162_s19 + $0xa8] sm:$0xff] %v1467_v10  ;;  %v1452_v59 = vmul.f32 %v9123_v18, %v1436_v30  ;;  %2956 = vadd.xlane.f32.xlu0 %v2935_v24  ;;  %10853 = vst [vmem:[#allocation77_spill] sm:$0xff] %v9538_v38 }
 0x395   : > { %v7019_v17 = vpop.eup %7018  ;;  %v1408_v43 = vadd.f32 1e-05, %v1392_v9  ;;  %2958 = vadd.xlane.f32.xlu1 %v2936_v29  ;;  %10855 = vst [vmem:[#allocation119_spill] sm:$0xff] %v9543_v52  ;;  %v2938_v29 = vmul.f32 %v9531_v6, %v9531_v6 }
 0x396   : > { %v1468_v10 = vadd.f32 %v9140_v31, %v1452_v59  ;;  %v1437_v30 = vmul.f32 %v7019_v17, %v10856_v14  ;;  %v9548_v24 = vpop.xlane.xlu1 %3938  ;;  %v1373_v20 = vpop.xlane.xlu0 %1372  ;;  %v2911_v59 = vmul.f32 0.0078125, %v10857_v51  ;;  %v2939_v17 = vmul.f32 %v9538_v38, %v9538_v38  ;;  %v10858_v14 = vld [vmem:[#allocation60_spill] sm:$0xff] }
 0x397   : > { %7024 = vrsqrt.f32 %v1408_v43  ;;  %v1393_v9 = vmul.f32 0.0078125, %v1373_v20  ;;  %v9559_v33 = vsub.f32 %v10858_v14, %v2909_v8  ;;  %v10859_v20 = vld [vmem:[#allocation113_spill] sm:$0xff] }
 0x398   : > { %4797 = vst [vmem:[%s9162_s19 + $0xb0] sm:$0xff] %v1468_v10  ;;  %v1453_v35 = vmul.f32 %v9123_v18, %v1437_v30  ;;  %2960 = vadd.xlane.f32.xlu0 %v2937_v49  ;;  %v2940_v49 = vmul.f32 %v9543_v52, %v9543_v52  ;;  %v10860_v30 = vld [vmem:[#allocation62_spill] sm:$0xff] }
 0x399   : > { %v7021_v56 = vpop.eup %7020  ;;  %v1409_v47 = vadd.f32 1e-05, %v1393_v9  ;;  %2962 = vadd.xlane.f32.xlu1 %v2938_v29  ;;  %v9568_v51 = vsub.f32 %v10860_v30, %v2910_v32  ;;  %v2912_v9 = vmul.f32 0.0078125, %v9151_v40  ;;  %v3430_v32 = vmul.f32 0.0078125, %v9187_v2  ;;  %v10863_v40 = vld [vmem:[#allocation117_spill] sm:$0xff] }
 0x39a   : > { %v1469_v43 = vadd.f32 %v9140_v31, %v1453_v35  ;;  %v1438_v41 = vmul.f32 %v7021_v56, %v10859_v20  ;;  %v1375_v10 = vpop.xlane.xlu1 %1374  ;;  %v9563_v6 = vpop.xlane.xlu0 %3940  ;;  %v10861_v56 = vld [vmem:[#allocation64_spill] sm:$0xff]  ;;  %v2913_v20 = vmul.f32 0.0078125, %v9176_v12 }
 0x39b   : > { %7026 = vrsqrt.f32 %v1409_v47  ;;  %v1394_v29 = vmul.f32 0.0078125, %v1375_v10  ;;  %v9574_v14 = vsub.f32 %v10861_v56, %v2911_v59  ;;  %v2942_v12 = vmul.f32 %v9568_v51, %v9568_v51  ;;  %v10867_v56 = vld [vmem:[#allocation70_spill] sm:$0xff] }
 0x39c   : > { %4798 = vst [vmem:[%s9162_s19 + $0xb8] sm:$0xff] %v1469_v43  ;;  %v1454_v8 = vmul.f32 %v9123_v18, %v1438_v41  ;;  %2964 = vadd.xlane.f32.xlu0 %v2939_v17  ;;  %v2941_v41 = vmul.f32 %v9559_v33, %v9559_v33  ;;  %v10864_v17 = vld [vmem:[#allocation66_spill] sm:$0xff] }
 0x39d   : > { %v7023_v35 = vpop.eup %7022  ;;  %10862 = vst [vmem:[#allocation34_spill] sm:$0xff] %v9574_v14  ;;  %v1410_v38 = vadd.f32 1e-05, %v1394_v29  ;;  %2966 = vadd.xlane.f32.xlu1 %v2940_v49  ;;  %v9585_v52 = vsub.f32 %v10864_v17, %v2912_v9  ;;  %v10865_v29 = vld [vmem:[#allocation68_spill] sm:$0xff]  ;;  %v2943_v9 = vmul.f32 %v9574_v14, %v9574_v14  ;;  %v10872_v14 = vld [vmem:[#allocation74_spill] sm:$0xff] }
 0x39e   : > { %v1470_v30 = vadd.f32 %v9140_v31, %v1454_v8  ;;  %v1439_v47 = vmul.f32 %v7023_v35, %v10863_v40  ;;  %v9580_v10 = vpop.xlane.xlu1 %3942  ;;  %v1377_v43 = vpop.xlane.xlu0 %1376  ;;  %v9592_v8 = vsub.f32 %v10865_v29, %v2913_v20  ;;  %v3431_v40 = vmul.f32 0.0078125, %v9210_v3 }
 0x39f   : > { %7028 = vrsqrt.f32 %v1410_v38  ;;  %v1395_v59 = vmul.f32 0.0078125, %v1377_v43  ;;  %v9597_v38 = vsub.f32 %v10867_v56, %v3430_v32  ;;  %v10869_v43 = vld [vmem:[#allocation8_spill] sm:$0xff]  ;;  %v3432_v20 = vmul.f32 0.0078125, %v9221_v4 }
 0x3a0   : > { %4799 = vst [vmem:[%s9162_s19 + $0xc0] sm:$0xff] %v1470_v30  ;;  %v1455_v2 = vmul.f32 %v9123_v18, %v1439_v47  ;;  %2968 = vadd.xlane.f32.xlu0 %v2941_v41  ;;  %10866 = vst [vmem:[#allocation118_spill] sm:$0xff] %v9592_v8  ;;  %v10870_v56 = vld [vmem:[#allocation72_spill] sm:$0xff] }
 0x3a1   : > { %v7025_v49 = vpop.eup %7024  ;;  %v1411_v35 = vadd.f32 1e-05, %v1395_v59  ;;  %2970 = vadd.xlane.f32.xlu1 %v2942_v12  ;;  %10868 = vst [vmem:[#allocation35_spill] sm:$0xff] %v9597_v38  ;;  %v2944_v12 = vmul.f32 %v9585_v52, %v9585_v52  ;;  %v9613_v4 = vsub.f32 %v10870_v56, %v3431_v40 }
 0x3a2   : > { %v1471_v30 = vadd.f32 %v9140_v31, %v1455_v2  ;;  %v1440_v47 = vmul.f32 %v7025_v49, %v10869_v43  ;;  %v1379_v41 = vpop.xlane.xlu1 %1378  ;;  %v9602_v17 = vpop.xlane.xlu0 %3944  ;;  %v3433_v2 = vmul.f32 0.0078125, %v9244_v44  ;;  %v2945_v49 = vmul.f32 %v9592_v8, %v9592_v8  ;;  %v10871_v43 = vld [vmem:[#allocation9_spill] sm:$0xff] }
 0x3a3   : > { %7030 = vrsqrt.f32 %v1411_v35  ;;  %v1396_v59 = vmul.f32 0.0078125, %v1379_v41  ;;  %v9622_v44 = vsub.f32 %v10872_v14, %v3432_v20  ;;  %v3436_v14 = vmul.f32 0.0078125, %v9289_v34 }
 0x3a4   : > { %4800 = vst [vmem:[%s9162_s19 + $0xc8] sm:$0xff] %v1471_v30  ;;  %v1456_v32 = vmul.f32 %v9123_v18, %v1440_v47  ;;  %2972 = vadd.xlane.f32.xlu0 %v2943_v9  ;;  %v3462_v9 = vmul.f32 %v9597_v38, %v9597_v38 }
 0x3a5   : > { %v7027_v3 = vpop.eup %7026  ;;  %v1412_v29 = vadd.f32 1e-05, %v1396_v59  ;;  %2974 = vadd.xlane.f32.xlu1 %v2944_v12  ;;  %v3434_v59 = vmul.f32 0.0078125, %v9255_v42  ;;  %v10875_v42 = vld [vmem:[#allocation10_spill] sm:$0xff] }
 0x3a6   : > { %v1472_v35 = vadd.f32 %v9140_v31, %v1456_v32  ;;  %v1441_v41 = vmul.f32 %v7027_v3, %v10871_v43  ;;  %v9617_v30 = vpop.xlane.xlu1 %3946  ;;  %v1381_v47 = vpop.xlane.xlu0 %1380  ;;  %v10873_v3 = vld [vmem:[#allocation76_spill] sm:$0xff]  ;;  %v3435_v43 = vmul.f32 0.0078125, %v9278_v55  ;;  %v3464_v55 = vmul.f32 %v9622_v44, %v9622_v44 }
 0x3a7   : > { %7032 = vrsqrt.f32 %v1412_v29  ;;  %v1397_v12 = vmul.f32 0.0078125, %v1381_v47  ;;  %v9628_v56 = vsub.f32 %v10873_v3, %v3433_v2  ;;  %v10879_v3 = vld [vmem:[#allocation82_spill] sm:$0xff] }
 0x3a8   : > { %4801 = vst [vmem:[%s9162_s19 + $0xd0] sm:$0xff] %v1472_v35  ;;  %v1457_v40 = vmul.f32 %v9123_v18, %v1441_v41  ;;  %2976 = vadd.xlane.f32.xlu0 %v2945_v49  ;;  %v3463_v49 = vmul.f32 %v9613_v4, %v9613_v4  ;;  %v10876_v41 = vld [vmem:[#allocation78_spill] sm:$0xff] }
 0x3a9   : > { %v7029_v32 = vpop.eup %7028  ;;  %10874 = vst [vmem:[#allocation79_spill] sm:$0xff] %v9628_v56  ;;  %v1413_v8 = vadd.f32 1e-05, %v1397_v12  ;;  %3478 = vadd.xlane.f32.xlu1 %v3462_v9  ;;  %v9639_v38 = vsub.f32 %v10876_v41, %v3434_v59  ;;  %v10877_v12 = vld [vmem:[#allocation80_spill] sm:$0xff]  ;;  %v3465_v59 = vmul.f32 %v9628_v56, %v9628_v56 }
 0x3aa   : > { %v1473_v20 = vadd.f32 %v9140_v31, %v1457_v40  ;;  %v1442_v29 = vmul.f32 %v7029_v32, %v10875_v42  ;;  %v1883_v47 = vpop.xlane.xlu1 %1882  ;;  %v9634_v35 = vpop.xlane.xlu0 %3948  ;;  %v9646_v40 = vsub.f32 %v10877_v12, %v3435_v43  ;;  %v3437_v42 = vmul.f32 0.0078125, %v9312_v54 }
 0x3ab   : > { %7034 = vrsqrt.f32 %v1413_v8  ;;  %v1914_v2 = vmul.f32 0.0078125, %v1883_v47  ;;  %v9651_v8 = vsub.f32 %v10879_v3, %v3436_v14  ;;  %v10881_v47 = vld [vmem:[#allocation11_spill] sm:$0xff]  ;;  %v3438_v43 = vmul.f32 0.0078125, %v9323_v15  ;;  %v9665_v14 = vld [vmem:[%s10386_s5] ss:$0 sm:$0xff] }
 0x3ac   : > { %4802 = vst [vmem:[%s9162_s19 + $0xd8] sm:$0xff] %v1473_v20  ;;  %v1458_v34 = vmul.f32 %v9123_v18, %v1442_v29  ;;  %3480 = vadd.xlane.f32.xlu0 %v3463_v49  ;;  %10878 = vst [vmem:[#allocation124_spill] sm:$0xff] %v9646_v40  ;;  %v3467_v15 = vmul.f32 %v9646_v40, %v9646_v40  ;;  %v3441_v40 = vmul.f32 0.0078125, %v9385_v63 }
 0x3ad   : > { %v7031_v9 = vpop.eup %7030  ;;  %v1930_v32 = vadd.f32 1e-05, %v1914_v2  ;;  %3482 = vadd.xlane.f32.xlu1 %v3464_v55  ;;  %10880 = vst [vmem:[#allocation81_spill] sm:$0xff] %v9651_v8  ;;  %v3466_v2 = vmul.f32 %v9639_v38, %v9639_v38  ;;  %v3439_v55 = vmul.f32 0.0078125, %v9346_v46  ;;  %v3468_v46 = vmul.f32 %v9651_v8, %v9651_v8 }
 0x3ae   : > { %v1474_v20 = vadd.f32 %v9140_v31, %v1458_v34  ;;  %v1443_v18 = vmul.f32 %v7031_v9, %v10881_v47  ;;  %v9656_v29 = vpop.xlane.xlu1 %3950  ;;  %v1885_v49 = vpop.xlane.xlu0 %1884  ;;  %v10882_v9 = vld [vmem:[#allocation85_spill] sm:$0xff] }
 0x3af   : > { %7036 = vrsqrt.f32 %v1930_v32  ;;  %v1915_v41 = vmul.f32 0.0078125, %v1885_v49  ;;  %v9672_v12 = vsub.f32 %v10882_v9, %v3437_v42  ;;  %v9677_v32 = vld [vmem:[%s10387_s6] ss:$0 sm:$0xff]  ;;  %v10884_v49 = vld [vmem:[#allocation88_spill] sm:$0xff]  ;;  %v3440_v42 = vmul.f32 0.0078125, %v9358_v61 }
 0x3b0   : > { %4803 = vst [vmem:[%s9162_s19 + $0xe0] sm:$0xff] %v1474_v20  ;;  %v1459_v31 = vmul.f32 %v9665_v14, %v1443_v18  ;;  %3484 = vadd.xlane.f32.xlu0 %v3465_v59  ;;  %v10883_v59 = vld [vmem:[#allocation12_spill] sm:$0xff]  ;;  %v10887_v61 = vld [vmem:[#allocation13_spill] sm:$0xff] }
 0x3b1   : > { %v7033_v54 = vpop.eup %7032  ;;  %v1931_v34 = vadd.f32 1e-05, %v1915_v41  ;;  %3486 = vadd.xlane.f32.xlu1 %v3466_v2  ;;  %v9686_v41 = vsub.f32 %v10884_v49, %v3438_v43  ;;  %v3442_v43 = vmul.f32 0.0078125, %v9401_v1 }
 0x3b2   : > { %v1475_v3 = vadd.f32 %v9677_v32, %v1459_v31  ;;  %v1444_v20 = vmul.f32 %v7033_v54, %v10883_v59  ;;  %v1887_v47 = vpop.xlane.xlu1 %1886  ;;  %v9681_v18 = vpop.xlane.xlu0 %3952  ;;  %v10885_v54 = vld [vmem:[#allocation91_spill] sm:$0xff] }
 0x3b3   : > { %7038 = vrsqrt.f32 %v1931_v34  ;;  %v1916_v2 = vmul.f32 0.0078125, %v1887_v47  ;;  %v9692_v59 = vsub.f32 %v10885_v54, %v3439_v55  ;;  %v3470_v63 = vmul.f32 %v9686_v41, %v9686_v41  ;;  %v10891_v54 = vld [vmem:[#allocation100_spill] sm:$0xff] }
 0x3b4   : > { %4804 = vst [vmem:[%s9162_s19 + $0xe8] sm:$0xff] %v1475_v3  ;;  %v1460_v9 = vmul.f32 %v9665_v14, %v1444_v20  ;;  %3488 = vadd.xlane.f32.xlu0 %v3467_v15  ;;  %v3469_v15 = vmul.f32 %v9672_v12, %v9672_v12  ;;  %v10888_v20 = vld [vmem:[#allocation94_spill] sm:$0xff] }
 0x3b5   : > { %v7035_v31 = vpop.eup %7034  ;;  %10886 = vst [vmem:[#allocation123_spill] sm:$0xff] %v9692_v59  ;;  %v1932_v56 = vadd.f32 1e-05, %v1916_v2  ;;  %3490 = vadd.xlane.f32.xlu1 %v3468_v46  ;;  %v9703_v8 = vsub.f32 %v10888_v20, %v3440_v42  ;;  %v10889_v2 = vld [vmem:[#allocation97_spill] sm:$0xff]  ;;  %v3471_v42 = vmul.f32 %v9692_v59, %v9692_v59  ;;  %v10896_v59 = vld [vmem:[#allocation106_spill] sm:$0xff] }
 0x3b6   : > { %v1476_v49 = vadd.f32 %v9677_v32, %v1460_v9  ;;  %v1445_v34 = vmul.f32 %v7035_v31, %v10887_v61  ;;  %v9698_v47 = vpop.xlane.xlu1 %3954  ;;  %v1889_v3 = vpop.xlane.xlu0 %1888  ;;  %v9710_v9 = vsub.f32 %v10889_v2, %v3441_v40  ;;  %v3443_v61 = vmul.f32 0.0078125, %v9418_v21 }
 0x3b7   : > { %7040 = vrsqrt.f32 %v1932_v56  ;;  %v1917_v55 = vmul.f32 0.0078125, %v1889_v3  ;;  %v9715_v56 = vsub.f32 %v10891_v54, %v3442_v43  ;;  %v10893_v3 = vld [vmem:[#allocation14_spill] sm:$0xff]  ;;  %v3444_v40 = vmul.f32 0.0078125, %v9440_v16  ;;  %v10894_v54 = vld [vmem:[#allocation103_spill] sm:$0xff] }
 0x3b8   : > { %4805 = vst [vmem:[%s9162_s19 + $0xf0] sm:$0xff] %v1476_v49  ;;  %v1461_v1 = vmul.f32 %v9665_v14, %v1445_v34  ;;  %3492 = vadd.xlane.f32.xlu0 %v3469_v15  ;;  %10890 = vst [vmem:[#allocation36_spill] sm:$0xff] %v9710_v9  ;;  %v9731_v16 = vsub.f32 %v10894_v54, %v3443_v61 }
 0x3b9   : > { %v7037_v46 = vpop.eup %7036  ;;  %v1933_v31 = vadd.f32 1e-05, %v1917_v55  ;;  %3494 = vadd.xlane.f32.xlu1 %v3470_v63  ;;  %10892 = vst [vmem:[#allocation122_spill] sm:$0xff] %v9715_v56  ;;  %v3472_v63 = vmul.f32 %v9703_v8, %v9703_v8 }
 0x3ba   : > { %v1477_v49 = vadd.f32 %v9677_v32, %v1461_v1  ;;  %v1962_v34 = vmul.f32 %v7037_v46, %v10893_v3  ;;  %v1891_v15 = vpop.xlane.xlu1 %1890  ;;  %v9720_v20 = vpop.xlane.xlu0 %3956  ;;  %v3445_v1 = vmul.f32 0.0078125, %v9455_v58  ;;  %v3473_v46 = vmul.f32 %v9710_v9, %v9710_v9  ;;  %v10895_v3 = vld [vmem:[#allocation15_spill] sm:$0xff] }
 0x3bb   : > { %7042 = vrsqrt.f32 %v1933_v31  ;;  %v1918_v55 = vmul.f32 0.0078125, %v1891_v15  ;;  %v9740_v58 = vsub.f32 %v10896_v59, %v3444_v40  ;;  %v3964_v59 = vmul.f32 0.0078125, %v9509_v50 }
 0x3bc   : > { %4806 = vst [vmem:[%s9162_s19 + $0xf8] sm:$0xff] %v1477_v49  ;;  %v1978_v43 = vmul.f32 %v9665_v14, %v1962_v34  ;;  %3496 = vadd.xlane.f32.xlu0 %v3471_v42  ;;  %v3474_v42 = vmul.f32 %v9715_v56, %v9715_v56 }
 0x3bd   : > { %v7039_v21 = vpop.eup %7038  ;;  %v1934_v2 = vadd.f32 1e-05, %v1918_v55  ;;  %3498 = vadd.xlane.f32.xlu1 %v3472_v63  ;;  %v3962_v55 = vmul.f32 0.0078125, %v9472_v23  ;;  %v10899_v23 = vld [vmem:[#allocation16_spill] sm:$0xff] }
 0x3be   : > { %v1994_v31 = vadd.f32 %v9677_v32, %v1978_v43  ;;  %v1963_v15 = vmul.f32 %v7039_v21, %v10895_v3  ;;  %v9735_v49 = vpop.xlane.xlu1 %3958  ;;  %v1893_v34 = vpop.xlane.xlu0 %1892  ;;  %v10897_v21 = vld [vmem:[#allocation109_spill] sm:$0xff]  ;;  %v3963_v3 = vmul.f32 0.0078125, %v9494_v19  ;;  %v3476_v19 = vmul.f32 %v9740_v58, %v9740_v58 }
 0x3bf   : > { %7044 = vrsqrt.f32 %v1934_v2  ;;  %v1919_v63 = vmul.f32 0.0078125, %v1893_v34  ;;  %v9746_v54 = vsub.f32 %v10897_v21, %v3445_v1  ;;  %v10903_v21 = vld [vmem:[#allocation121_spill] sm:$0xff] }
 0x3c0   : > { %4823 = vst [vmem:[%s9162_s19 + $0x100] sm:$0xff] %v1994_v31  ;;  %v1979_v61 = vmul.f32 %v9665_v14, %v1963_v15  ;;  %3500 = vadd.xlane.f32.xlu0 %v3473_v46  ;;  %v3475_v46 = vmul.f32 %v9731_v16, %v9731_v16  ;;  %v10900_v15 = vld [vmem:[#allocation112_spill] sm:$0xff] }
 0x3c1   : > { %v7041_v43 = vpop.eup %7040  ;;  %10898 = vst [vmem:[#allocation38_spill] sm:$0xff] %v9746_v54  ;;  %v1935_v9 = vadd.f32 1e-05, %v1919_v63  ;;  %3502 = vadd.xlane.f32.xlu1 %v3474_v42  ;;  %v9757_v56 = vsub.f32 %v10900_v15, %v3962_v55  ;;  %v10901_v63 = vld [vmem:[#allocation116_spill] sm:$0xff]  ;;  %v3477_v55 = vmul.f32 %v9746_v54, %v9746_v54 }
 0x3c2   : > { %v1995_v40 = vadd.f32 %v9677_v32, %v1979_v61  ;;  %v1964_v2 = vmul.f32 %v7041_v43, %v10899_v23  ;;  %v1895_v34 = vpop.xlane.xlu1 %1894  ;;  %v9752_v31 = vpop.xlane.xlu0 %3960  ;;  %v9764_v61 = vsub.f32 %v10901_v63, %v3963_v3  ;;  %v3965_v23 = vmul.f32 0.0078125, %v9526_v62 }
 0x3c3   : > { %7046 = vrsqrt.f32 %v1935_v9  ;;  %v1920_v1 = vmul.f32 0.0078125, %v1895_v34  ;;  %v9769_v9 = vsub.f32 %v10903_v21, %v3964_v59  ;;  %v10905_v34 = vld [vmem:[#allocation17_spill] sm:$0xff]  ;;  %v3966_v3 = vmul.f32 0.0078125, %v9548_v24 }
 0x3c4   : > { %4824 = vst [vmem:[%s9162_s19 + $0x108] sm:$0xff] %v1995_v40  ;;  %v1980_v50 = vmul.f32 %v9665_v14, %v1964_v2  ;;  %3504 = vadd.xlane.f32.xlu0 %v3475_v46  ;;  %10902 = vst [vmem:[#allocation37_spill] sm:$0xff] %v9764_v61  ;;  %v10906_v21 = vld [vmem:[#allocation5_spill] sm:$0xff] }
 0x3c5   : > { %v7043_v42 = vpop.eup %7042  ;;  %v1936_v43 = vadd.f32 1e-05, %v1920_v1  ;;  %3506 = vadd.xlane.f32.xlu1 %v3476_v19  ;;  %10904 = vst [vmem:[#allocation83_spill] sm:$0xff] %v9769_v9  ;;  %v3994_v19 = vmul.f32 %v9757_v56, %v9757_v56  ;;  %v9785_v24 = vsub.f32 %v10906_v21, %v3965_v23 }
 0x3c6   : > { %v1996_v40 = vadd.f32 %v9677_v32, %v1980_v50  ;;  %v1965_v2 = vmul.f32 %v7043_v42, %v10905_v34  ;;  %v9774_v46 = vpop.xlane.xlu1 %4462  ;;  %v1897_v15 = vpop.xlane.xlu0 %1896  ;;  %v3967_v50 = vmul.f32 0.0078125, %v9563_v6  ;;  %v3995_v42 = vmul.f32 %v9764_v61, %v9764_v61  ;;  %v10907_v34 = vld [vmem:[#allocation18_spill] sm:$0xff] }
 0x3c7   : > { %7048 = vrsqrt.f32 %v1936_v43  ;;  %v1921_v1 = vmul.f32 0.0078125, %v1897_v15 }
 0x3c8   : > { %4825 = vst [vmem:[%s9162_s19 + $0x110] sm:$0xff] %v1996_v40  ;;  %v1981_v59 = vmul.f32 %v9665_v14, %v1965_v2  ;;  %3508 = vadd.xlane.f32.xlu0 %v3477_v55  ;;  %v3996_v55 = vmul.f32 %v9769_v9, %v9769_v9  ;;  %v10908_v2 = vld [vmem:[#allocation6_spill] sm:$0xff] }
 0x3c9   : > { %v7045_v62 = vpop.eup %7044  ;;  %v1937_v63 = vadd.f32 1e-05, %v1921_v1  ;;  %4010 = vadd.xlane.f32.xlu1 %v3994_v19  ;;  %v9794_v6 = vsub.f32 %v10908_v2, %v3966_v3  ;;  %v3968_v1 = vmul.f32 0.0078125, %v9580_v10  ;;  %v3970_v3 = vmul.f32 0.0078125, %v9617_v30  ;;  %v10911_v10 = vld [vmem:[#allocation19_spill] sm:$0xff] }
 0x3ca   : > { %v1997_v43 = vadd.f32 %v9677_v32, %v1981_v59  ;;  %v1966_v15 = vmul.f32 %v7045_v62, %v10907_v34  ;;  %v1899_v40 = vpop.xlane.xlu1 %1898  ;;  %v9789_v54 = vpop.xlane.xlu0 %4464  ;;  %v10909_v62 = vld [vmem:[#allocation7_spill] sm:$0xff]  ;;  %v3969_v34 = vmul.f32 0.0078125, %v9602_v17 }
 0x3cb   : > { %7050 = vrsqrt.f32 %v1937_v63  ;;  %v1922_v19 = vmul.f32 0.0078125, %v1899_v40  ;;  %v9800_v21 = vsub.f32 %v10909_v62, %v3967_v50  ;;  %v3998_v17 = vmul.f32 %v9794_v6, %v9794_v6  ;;  %v10915_v62 = vld [vmem:[#allocation128_spill] sm:$0xff] }
 0x3cc   : > { %4826 = vst [vmem:[%s9162_s19 + $0x118] sm:$0xff] %v1997_v43  ;;  %v1982_v23 = vmul.f32 %v9665_v14, %v1966_v15  ;;  %4012 = vadd.xlane.f32.xlu0 %v3995_v42  ;;  %v3997_v42 = vmul.f32 %v9785_v24, %v9785_v24  ;;  %v10912_v15 = vld [vmem:[#allocation126_spill] sm:$0xff] }
 0x3cd   : > { %v7047_v59 = vpop.eup %7046  ;;  %10910 = vst [vmem:[#allocation39_spill] sm:$0xff] %v9800_v21  ;;  %v1938_v61 = vadd.f32 1e-05, %v1922_v19  ;;  %4014 = vadd.xlane.f32.xlu1 %v3996_v55  ;;  %v9811_v9 = vsub.f32 %v10912_v15, %v3968_v1  ;;  %v10913_v19 = vld [vmem:[#allocation84_spill] sm:$0xff]  ;;  %v3999_v1 = vmul.f32 %v9800_v21, %v9800_v21  ;;  %v10919_v21 = vld [vmem:[#allocation130_spill] sm:$0xff] }
 0x3ce   : > { %v1998_v2 = vadd.f32 %v9677_v32, %v1982_v23  ;;  %v1967_v63 = vmul.f32 %v7047_v59, %v10911_v10  ;;  %v9806_v40 = vpop.xlane.xlu1 %4466  ;;  %v1901_v43 = vpop.xlane.xlu0 %1900  ;;  %v9818_v23 = vsub.f32 %v10913_v19, %v3969_v34  ;;  %v3971_v10 = vmul.f32 0.0078125, %v9634_v35 }
 0x3cf   : > { %7052 = vrsqrt.f32 %v1938_v61  ;;  %v1923_v50 = vmul.f32 0.0078125, %v1901_v43  ;;  %v9823_v61 = vsub.f32 %v10915_v62, %v3970_v3  ;;  %v10916_v43 = vld [vmem:[#allocation20_spill] sm:$0xff]  ;;  %v3972_v34 = vmul.f32 0.0078125, %v9656_v29  ;;  %v10917_v62 = vld [vmem:[#allocation87_spill] sm:$0xff] }
 0x3d0   : > { %4827 = vst [vmem:[%s9162_s19 + $0x120] sm:$0xff] %v1998_v2  ;;  %v1983_v30 = vmul.f32 %v9665_v14, %v1967_v63  ;;  %4016 = vadd.xlane.f32.xlu0 %v3997_v42  ;;  %10914 = vst [vmem:[#allocation86_spill] sm:$0xff] %v9818_v23  ;;  %v9839_v29 = vsub.f32 %v10917_v62, %v3971_v10 }
 0x3d1   : > { %v7049_v55 = vpop.eup %7048  ;;  %v1939_v59 = vadd.f32 1e-05, %v1923_v50  ;;  %4018 = vadd.xlane.f32.xlu1 %v3998_v17  ;;  %v4000_v17 = vmul.f32 %v9811_v9, %v9811_v9 }
 0x3d2   : > { %v1999_v2 = vadd.f32 %v9677_v32, %v1983_v30  ;;  %v1968_v63 = vmul.f32 %v7049_v55, %v10916_v43  ;;  %v1903_v42 = vpop.xlane.xlu1 %1902  ;;  %v9828_v15 = vpop.xlane.xlu0 %4468  ;;  %v3973_v30 = vmul.f32 0.0078125, %v9681_v18  ;;  %v4001_v55 = vmul.f32 %v9818_v23, %v9818_v23  ;;  %v10918_v43 = vld [vmem:[#allocation21_spill] sm:$0xff] }
 0x3d3   : > { %7054 = vrsqrt.f32 %v1939_v59  ;;  %v1924_v50 = vmul.f32 0.0078125, %v1903_v42  ;;  %v9848_v18 = vsub.f32 %v10919_v21, %v3972_v34  ;;  %v3976_v21 = vmul.f32 0.0078125, %v9735_v49 }
 0x3d4   : > { %4828 = vst [vmem:[%s9162_s19 + $0x128] sm:$0xff] %v1999_v2  ;;  %v1984_v3 = vmul.f32 %v9665_v14, %v1968_v63  ;;  %4020 = vadd.xlane.f32.xlu0 %v3999_v1  ;;  %v4002_v1 = vmul.f32 %v9823_v61, %v9823_v61 }
 0x3d5   : > { %v7051_v35 = vpop.eup %7050  ;;  %v1940_v19 = vadd.f32 1e-05, %v1924_v50  ;;  %4022 = vadd.xlane.f32.xlu1 %v4000_v17  ;;  %v3974_v50 = vmul.f32 0.0078125, %v9698_v47 }
 0x3d6   : > { %v2000_v59 = vadd.f32 %v9677_v32, %v1984_v3  ;;  %v1969_v42 = vmul.f32 %v7051_v35, %v10918_v43  ;;  %v9843_v2 = vpop.xlane.xlu1 %4470  ;;  %v1905_v63 = vpop.xlane.xlu0 %1904  ;;  %v10920_v35 = vld [vmem:[#allocation90_spill] sm:$0xff]  ;;  %v3975_v43 = vmul.f32 0.0078125, %v9720_v20  ;;  %v4004_v20 = vmul.f32 %v9848_v18, %v9848_v18 }
 0x3d7   : > { %7056 = vrsqrt.f32 %v1940_v19  ;;  %v1925_v17 = vmul.f32 0.0078125, %v1905_v63  ;;  %v9854_v62 = vsub.f32 %v10920_v35, %v3973_v30  ;;  %v3977_v35 = vmul.f32 0.0078125, %v9752_v31 }
 0x3d8   : > { %4829 = vst [vmem:[%s9162_s19 + $0x130] sm:$0xff] %v2000_v59  ;;  %v1985_v10 = vmul.f32 %v9665_v14, %v1969_v42  ;;  %4024 = vadd.xlane.f32.xlu0 %v4001_v55  ;;  %v4003_v55 = vmul.f32 %v9839_v29, %v9839_v29  ;;  %v10921_v42 = vld [vmem:[#allocation133_spill] sm:$0xff]  ;;  %v4495_v31 = vmul.f32 0.0078125, %v9789_v54  ;;  %v4496_v54 = vmul.f32 0.0078125, %v9806_v40 }
 0x3d9   : > { %v7053_v3 = vpop.eup %7052  ;;  %v1941_v23 = vadd.f32 1e-05, %v1925_v17  ;;  %4026 = vadd.xlane.f32.xlu1 %v4002_v1  ;;  %v9865_v63 = vsub.f32 %v10921_v42, %v3974_v50  ;;  %v10922_v1 = vld [vmem:[#allocation93_spill] sm:$0xff]  ;;  %v4005_v50 = vmul.f32 %v9854_v62, %v9854_v62  ;;  %v4494_v42 = vmul.f32 0.0078125, %v9774_v46 }
 0x3da   : > { %v2001_v34 = vadd.f32 %v9677_v32, %v1985_v10  ;;  %v1970_v47 = vmul.f32 %v7053_v3, %v9118_v0  ;;  %v1907_v19 = vpop.xlane.xlu1 %1906  ;;  %v9860_v59 = vpop.xlane.xlu0 %4472  ;;  %v9872_v17 = vsub.f32 %v10922_v1, %v3975_v43  ;;  %v10923_v3 = vld [vmem:[#allocation135_spill] sm:$0xff] }
 0x3db   : > { %7058 = vrsqrt.f32 %v1941_v23  ;;  %v1926_v30 = vmul.f32 0.0078125, %v1907_v19  ;;  %v9877_v23 = vsub.f32 %v10923_v3, %v3976_v21 }
 0x3dc   : > { %4830 = vst [vmem:[%s9162_s19 + $0x138] sm:$0xff] %v2001_v34  ;;  %v1986_v49 = vmul.f32 %v9665_v14, %v1970_v47  ;;  %4028 = vadd.xlane.f32.xlu0 %v4003_v55 }
 0x3dd   : > { %v7055_v0 = vpop.eup %7054  ;;  %v1942_v10 = vadd.f32 1e-05, %v1926_v30  ;;  %4030 = vadd.xlane.f32.xlu1 %v4004_v20  ;;  %v4006_v30 = vmul.f32 %v9865_v63, %v9865_v63 }
 0x3de   : > { %v2002_v34 = vadd.f32 %v9677_v32, %v1986_v49  ;;  %v1971_v47 = vmul.f32 %v7055_v0, %v9135_v11  ;;  %v4475_v19 = vpop.xlane.xlu1 %4474  ;;  %v1909_v55 = vpop.xlane.xlu0 %1908  ;;  %v4007_v11 = vmul.f32 %v9872_v17, %v9872_v17  ;;  %v10924_v0 = vld [vmem:[#allocation96_spill] sm:$0xff] }
 0x3df   : > { %7060 = vrsqrt.f32 %v1942_v10  ;;  %v1927_v43 = vmul.f32 0.0078125, %v1909_v55  ;;  %v9891_v46 = vsub.f32 %v10924_v0, %v3977_v35 }
 0x3e0   : > { %4831 = vst [vmem:[%s9162_s19 + $0x140] sm:$0xff] %v2002_v34  ;;  %v1987_v20 = vmul.f32 %v9665_v14, %v1971_v47  ;;  %4032 = vadd.xlane.f32.xlu0 %v4005_v50  ;;  %v4008_v50 = vmul.f32 %v9877_v23, %v9877_v23  ;;  %v10925_v47 = vld [vmem:[#allocation136_spill] sm:$0xff] }
 0x3e1   : > { %v7057_v21 = vpop.eup %7056  ;;  %v1943_v49 = vadd.f32 1e-05, %v1927_v43  ;;  %4034 = vadd.xlane.f32.xlu1 %v4006_v30  ;;  %v9898_v55 = vsub.f32 %v10925_v47, %v4494_v42  ;;  %v4498_v47 = vmul.f32 0.0078125, %v9843_v2 }
 0x3e2   : > { %v2003_v1 = vadd.f32 %v9677_v32, %v1987_v20  ;;  %v1972_v10 = vmul.f32 %v7057_v21, %v9160_v37  ;;  %v1911_v3 = vpop.xlane.xlu1 %1910  ;;  %v4477_v34 = vpop.xlane.xlu0 %4476  ;;  %v10926_v20 = vld [vmem:[#allocation22_spill] sm:$0xff]  ;;  %v4497_v21 = vmul.f32 0.0078125, %v9828_v15 }
 0x3e3   : > { %7062 = vrsqrt.f32 %v1943_v49  ;;  %v1928_v43 = vmul.f32 0.0078125, %v1911_v3  ;;  %v9904_v37 = vsub.f32 %v10926_v20, %v4495_v31  ;;  %v4526_v15 = vmul.f32 %v9898_v55, %v9898_v55 }
 0x3e4   : > { %4832 = vst [vmem:[%s9162_s19 + $0x148] sm:$0xff] %v2003_v1  ;;  %v1988_v35 = vmul.f32 %v9665_v14, %v1972_v10  ;;  %4036 = vadd.xlane.f32.xlu0 %v4007_v11  ;;  %v4009_v11 = vmul.f32 %v9891_v46, %v9891_v46  ;;  %v9913_v10 = vsub.f32 %v9157_v5, %v4496_v54  ;;  %v4499_v20 = vmul.f32 0.0078125, %v9860_v59 }
 0x3e5   : > { %v7059_v30 = vpop.eup %7058  ;;  %v1944_v0 = vadd.f32 1e-05, %v1928_v43  ;;  %4038 = vadd.xlane.f32.xlu1 %v4008_v50  ;;  %v4527_v5 = vmul.f32 %v9904_v37, %v9904_v37  ;;  %v9925_v54 = vsub.f32 %v9193_v28, %v4498_v47  ;;  %v4501_v47 = vmul.f32 0.0078125, %v4477_v34 }
 0x3e6   : > { %v2004_v42 = vadd.f32 %v9677_v32, %v1988_v35  ;;  %v1973_v40 = vmul.f32 %v7059_v30, %v9172_v45  ;;  %v4479_v49 = vpop.xlane.xlu1 %4478  ;;  %v1913_v1 = vpop.xlane.xlu0 %1912  ;;  %v10927_v45 = vld [vmem:[#allocation99_spill] sm:$0xff] }
 0x3e7   : > { %7064 = vrsqrt.f32 %v1944_v0  ;;  %v1929_v31 = vmul.f32 0.0078125, %v1913_v1  ;;  %v9920_v50 = vsub.f32 %v10927_v45, %v4497_v21  ;;  %v4528_v1 = vmul.f32 %v9913_v10, %v9913_v10 }
 0x3e8   : > { %4833 = vst [vmem:[%s9162_s19 + $0x150] sm:$0xff] %v2004_v42  ;;  %v1989_v3 = vmul.f32 %v9665_v14, %v1973_v40  ;;  %4040 = vadd.xlane.f32.xlu0 %v4009_v11  ;;  %v4500_v40 = vmul.f32 0.0078125, %v4475_v19  ;;  %v10928_v19 = vld [vmem:[#allocation23_spill] sm:$0xff]  ;;  %v4502_v34 = vmul.f32 0.0078125, %v4479_v49 }
 0x3e9   : > { %v7061_v2 = vpop.eup %7060  ;;  %v1945_v43 = vadd.f32 1e-05, %v1929_v31  ;;  %4542 = vadd.xlane.f32.xlu1 %v4526_v15  ;;  %v9938_v15 = vsub.f32 %v10928_v19, %v4499_v20 }
 0x3ea   : > { %v2005_v35 = vadd.f32 %v9677_v32, %v1989_v3  ;;  %v1974_v30 = vmul.f32 %v7061_v2, %v9196_v27  ;;  %v2415_v0 = vpop.xlane.xlu1 %2414  ;;  %v4481_v42 = vpop.xlane.xlu0 %4480  ;;  %v4529_v27 = vmul.f32 %v9920_v50, %v9920_v50 }
 0x3eb   : > { %7066 = vrsqrt.f32 %v1945_v43  ;;  %v2446_v21 = vmul.f32 0.0078125, %v2415_v0  ;;  %v4530_v43 = vmul.f32 %v9925_v54, %v9925_v54  ;;  %v9949_v0 = vsub.f32 %v9237_v53, %v4501_v47 }
 0x3ec   : > { %4834 = vst [vmem:[%s9162_s19 + $0x158] sm:$0xff] %v2005_v35  ;;  %v1990_v11 = vmul.f32 %v9665_v14, %v1974_v30  ;;  %4544 = vadd.xlane.f32.xlu0 %v4527_v5  ;;  %v9944_v5 = vsub.f32 %v9227_v13, %v4500_v40 }
 0x3ed   : > { %v7063_v28 = vpop.eup %7062  ;;  %v2462_v31 = vadd.f32 1e-05, %v2446_v21  ;;  %4546 = vadd.xlane.f32.xlu1 %v4528_v1 }
 0x3ee   : > { %v2006_v59 = vadd.f32 %v9677_v32, %v1990_v11  ;;  %v1975_v3 = vmul.f32 %v7063_v28, %v9206_v60  ;;  %v4483_v2 = vpop.xlane.xlu1 %4482  ;;  %v2417_v45 = vpop.xlane.xlu0 %2416  ;;  %v4503_v60 = vmul.f32 0.0078125, %v4481_v42  ;;  %v10929_v11 = vld [vmem:[#allocation57_spill] sm:$0xff]  ;;  %v4532_v53 = vmul.f32 %v9944_v5, %v9944_v5 }
 0x3ef   : > { %7068 = vrsqrt.f32 %v2462_v31  ;;  %v2447_v35 = vmul.f32 0.0078125, %v2417_v45  ;;  %v4504_v40 = vmul.f32 0.0078125, %v4483_v2  ;;  %v4531_v31 = vmul.f32 %v9938_v15, %v9938_v15  ;;  %v10930_v45 = vld [vmem:[#allocation24_spill] sm:$0xff] }
 0x3f0   : > { %4835 = vst [vmem:[%s9162_s19 + $0x160] sm:$0xff] %v2006_v59  ;;  %v1991_v30 = vmul.f32 %v9665_v14, %v1975_v3  ;;  %4548 = vadd.xlane.f32.xlu0 %v4529_v27  ;;  %v9956_v27 = vsub.f32 %v9261_v26, %v4502_v34  ;;  %v9963_v19 = vsub.f32 %v9271_v7, %v4503_v60 }
 0x3f1   : > { %v7065_v20 = vpop.eup %7064  ;;  %v2463_v21 = vadd.f32 1e-05, %v2447_v35  ;;  %4550 = vadd.xlane.f32.xlu1 %v4530_v43  ;;  %v4533_v26 = vmul.f32 %v9949_v0, %v9949_v0  ;;  %v9970_v34 = vsub.f32 %v9295_v48, %v4504_v40 }
 0x3f2   : > { %v2007_v1 = vadd.f32 %v9677_v32, %v1991_v30  ;;  %v1976_v13 = vmul.f32 %v7065_v20, %v10929_v11  ;;  %v2419_v49 = vpop.xlane.xlu1 %2418  ;;  %v4485_v28 = vpop.xlane.xlu0 %4484  ;;  %v4534_v7 = vmul.f32 %v9956_v27, %v9956_v27  ;;  %v4535_v48 = vmul.f32 %v9963_v19, %v9963_v19 }
 0x3f3   : > { %7070 = vrsqrt.f32 %v2463_v21  ;;  %v2448_v59 = vmul.f32 0.0078125, %v2419_v49  ;;  %v4505_v35 = vmul.f32 0.0078125, %v4485_v28  ;;  %v10931_v49 = vld [vmem:[#allocation102_spill] sm:$0xff] }
 0x3f4   : > { %4836 = vst [vmem:[%s9162_s19 + $0x168] sm:$0xff] %v2007_v1  ;;  %v1992_v42 = vmul.f32 %v9665_v14, %v1976_v13  ;;  %4552 = vadd.xlane.f32.xlu0 %v4531_v31  ;;  %v10932_v31 = vld [vmem:[#allocation61_spill] sm:$0xff] }
 0x3f5   : > { %v7067_v47 = vpop.eup %7066  ;;  %v2464_v3 = vadd.f32 1e-05, %v2448_v59  ;;  %4554 = vadd.xlane.f32.xlu1 %v4532_v53  ;;  %v9981_v59 = vsub.f32 %v10932_v31, %v4505_v35 }
 0x3f6   : > { %v2008_v2 = vadd.f32 %v9677_v32, %v1992_v42  ;;  %v1977_v43 = vmul.f32 %v7067_v47, %v10930_v45  ;;  %v4487_v30 = vpop.xlane.xlu1 %4486  ;;  %v2421_v20 = vpop.xlane.xlu0 %2420  ;;  %v4536_v47 = vmul.f32 %v9970_v34, %v9970_v34 }
 0x3f7   : > { %7072 = vrsqrt.f32 %v2464_v3  ;;  %v4506_v21 = vmul.f32 0.0078125, %v4487_v30  ;;  %v2449_v1 = vmul.f32 0.0078125, %v2421_v20  ;;  %v10933_v20 = vld [vmem:[#allocation25_spill] sm:$0xff] }
 0x3f8   : > { %4837 = vst [vmem:[%s9162_s19 + $0x170] sm:$0xff] %v2008_v2  ;;  %v1993_v60 = vmul.f32 %v9665_v14, %v1977_v43  ;;  %4556 = vadd.xlane.f32.xlu0 %v4533_v26 }
 0x3f9   : > { %v7069_v11 = vpop.eup %7068  ;;  %v2465_v13 = vadd.f32 1e-05, %v2449_v1  ;;  %4558 = vadd.xlane.f32.xlu1 %v4534_v7  ;;  %v9986_v3 = vsub.f32 %v9329_v25, %v4506_v21  ;;  %v10934_v7 = vld [vmem:[#allocation27_spill] sm:$0xff] }
 0x3fa   : > { %v2009_v40 = vadd.f32 %v9677_v32, %v1993_v60  ;;  %v2494_v28 = vmul.f32 %v7069_v11, %v10931_v49  ;;  %v2423_v53 = vpop.xlane.xlu1 %2422  ;;  %v4489_v42 = vpop.xlane.xlu0 %4488  ;;  %v4537_v11 = vmul.f32 %v9981_v59, %v9981_v59 }
 0x3fb   : > { %7074 = vrsqrt.f32 %v2465_v13  ;;  %v2450_v26 = vmul.f32 0.0078125, %v2423_v53  ;;  %v4507_v2 = vmul.f32 0.0078125, %v4489_v42 }
 0x3fc   : > { %4838 = vst [vmem:[%s9162_s19 + $0x178] sm:$0xff] %v2009_v40  ;;  %v2510_v45 = vmul.f32 %v9665_v14, %v2494_v28  ;;  %4560 = vadd.xlane.f32.xlu0 %v4535_v48  ;;  %v4538_v48 = vmul.f32 %v9986_v3, %v9986_v3 }
 0x3fd   : > { %v7071_v43 = vpop.eup %7070  ;;  %v2466_v30 = vadd.f32 1e-05, %v2450_v26  ;;  %4562 = vadd.xlane.f32.xlu1 %v4536_v47  ;;  %v9993_v60 = vsub.f32 %v10934_v7, %v4507_v2  ;;  %v10935_v47 = vld [vmem:[#allocation59_spill] sm:$0xff] }
 0x3fe   : > { %v2526_v35 = vadd.f32 %v9677_v32, %v2510_v45  ;;  %v2495_v1 = vmul.f32 %v7071_v43, %v10933_v20  ;;  %v4491_v25 = vpop.xlane.xlu1 %4490  ;;  %v2425_v21 = vpop.xlane.xlu0 %2424 }
 0x3ff   : > { %7076 = vrsqrt.f32 %v2466_v30  ;;  %v4508_v13 = vmul.f32 0.0078125, %v4491_v25  ;;  %v2451_v40 = vmul.f32 0.0078125, %v2425_v21  ;;  %v4539_v43 = vmul.f32 %v9993_v60, %v9993_v60  ;;  %v10936_v25 = vld [vmem:[#allocation28_spill] sm:$0xff] }
 0x400   : > { %4855 = vst [vmem:[%s9162_s19 + $0x180] sm:$0xff] %v2526_v35  ;;  %v2511_v49 = vmul.f32 %v9665_v14, %v2495_v1  ;;  %4564 = vadd.xlane.f32.xlu0 %v4537_v11 }
 0x401   : > { %v7073_v28 = vpop.eup %7072  ;;  %v10002_v31 = vsub.f32 %v9364_v39, %v4508_v13  ;;  %v2467_v53 = vadd.f32 1e-05, %v2451_v40  ;;  %4566 = vadd.xlane.f32.xlu1 %v4538_v48  ;;  %v10937_v13 = vld [vmem:[#allocation26_spill] sm:$0xff] }
 0x402   : > { %v2527_v42 = vadd.f32 %v9677_v32, %v2511_v49  ;;  %v2496_v26 = vmul.f32 %v7073_v28, %v10935_v47  ;;  %v2427_v2 = vpop.xlane.xlu1 %2426  ;;  %v4493_v45 = vpop.xlane.xlu0 %4492 }
 0x403   : > { %7078 = vrsqrt.f32 %v2467_v53  ;;  %v2452_v30 = vmul.f32 0.0078125, %v2427_v2  ;;  %v4509_v35 = vmul.f32 0.0078125, %v4493_v45  ;;  %v4540_v20 = vmul.f32 %v10002_v31, %v10002_v31 }
 0x404   : > { %4856 = vst [vmem:[%s9162_s19 + $0x188] sm:$0xff] %v2527_v42  ;;  %v2512_v39 = vmul.f32 %v9665_v14, %v2496_v26  ;;  %4568 = vadd.xlane.f32.xlu0 %v4539_v43 }
 0x405   : > { %v7075_v1 = vpop.eup %7074  ;;  %v2468_v7 = vadd.f32 1e-05, %v2452_v30  ;;  %v10013_v21 = vsub.f32 %v10936_v25, %v4509_v35  ;;  %4570 = vadd.xlane.f32.xlu1 %v4540_v20  ;;  %v10938_v30 = vld [vmem:[#allocation105_spill] sm:$0xff] }
 0x406   : > { %v2528_v11 = vadd.f32 %v9677_v32, %v2512_v39  ;;  %v2497_v40 = vmul.f32 %v7075_v1, %v10937_v13  ;;  %v2431_v48 = vpop.xlane.xlu1 %2430  ;;  %v2429_v49 = vpop.xlane.xlu0 %2428 }
 0x407   : > { %7080 = vrsqrt.f32 %v2468_v7  ;;  %v2454_v28 = vmul.f32 0.0078125, %v2431_v48  ;;  %v2453_v53 = vmul.f32 0.0078125, %v2429_v49  ;;  %v4541_v42 = vmul.f32 %v10013_v21, %v10013_v21  ;;  %v10939_v49 = vld [vmem:[#allocation63_spill] sm:$0xff] }
 0x408   : > { %4857 = vst [vmem:[%s9162_s19 + $0x190] sm:$0xff] %v2528_v11  ;;  %v2513_v47 = vmul.f32 %v9665_v14, %v2497_v40 }
 0x409   : > { %v7077_v26 = vpop.eup %7076  ;;  %v2470_v2 = vadd.f32 1e-05, %v2454_v28  ;;  %v2469_v45 = vadd.f32 1e-05, %v2453_v53  ;;  %4572 = vadd.xlane.f32.xlu0 %v4541_v42 }
 0x40a   : > { %v2529_v43 = vadd.f32 %v9677_v32, %v2513_v47  ;;  %v2498_v35 = vmul.f32 %v7077_v26, %v10938_v30  ;;  %v2435_v20 = vpop.xlane.xlu1 %2434  ;;  %v2433_v39 = vpop.xlane.xlu0 %2432 }
 0x40b   : > { %7082 = vrsqrt.f32 %v2470_v2  ;;  %v2456_v1 = vmul.f32 0.0078125, %v2435_v20  ;;  %v2455_v7 = vmul.f32 0.0078125, %v2433_v39  ;;  %v10940_v20 = vld [vmem:[#allocation65_spill] sm:$0xff] }
 0x40c   : > { %4858 = vst [vmem:[%s9162_s19 + $0x198] sm:$0xff] %v2529_v43  ;;  %v2514_v25 = vmul.f32 %v9665_v14, %v2498_v35  ;;  %7084 = vrsqrt.f32 %v2469_v45 }
 0x40d   : > { %v7079_v11 = vpop.eup %7078  ;;  %v2472_v13 = vadd.f32 1e-05, %v2456_v1  ;;  %v2471_v40 = vadd.f32 1e-05, %v2455_v7 }
 0x40e   : > { %v2530_v48 = vadd.f32 %v9677_v32, %v2514_v25  ;;  %v2499_v28 = vmul.f32 %v7079_v11, %v10939_v49  ;;  %v2439_v53 = vpop.xlane.xlu1 %2438  ;;  %v2437_v42 = vpop.xlane.xlu0 %2436 }
 0x40f   : > { %7086 = vrsqrt.f32 %v2472_v13  ;;  %v2458_v47 = vmul.f32 0.0078125, %v2439_v53  ;;  %v2457_v26 = vmul.f32 0.0078125, %v2437_v42  ;;  %v10941_v42 = vld [vmem:[#allocation108_spill] sm:$0xff] }
 0x410   : > { %4859 = vst [vmem:[%s9162_s19 + $0x1a0] sm:$0xff] %v2530_v48  ;;  %v2515_v2 = vmul.f32 %v9665_v14, %v2499_v28  ;;  %7088 = vrsqrt.f32 %v2471_v40 }
 0x411   : > { %v7081_v43 = vpop.eup %7080  ;;  %v2474_v30 = vadd.f32 1e-05, %v2458_v47  ;;  %v2473_v45 = vadd.f32 1e-05, %v2457_v26 }
 0x412   : > { %v2531_v35 = vadd.f32 %v9677_v32, %v2515_v2  ;;  %v2500_v39 = vmul.f32 %v7081_v43, %v10940_v20  ;;  %v2443_v1 = vpop.xlane.xlu1 %2442  ;;  %v2441_v7 = vpop.xlane.xlu0 %2440  ;;  %v10942_v43 = vld [vmem:[#allocation29_spill] sm:$0xff] }
 0x413   : > { %7090 = vrsqrt.f32 %v2474_v30  ;;  %v2460_v25 = vmul.f32 0.0078125, %v2443_v1  ;;  %v2459_v11 = vmul.f32 0.0078125, %v2441_v7 }
 0x414   : > { %4860 = vst [vmem:[%s9162_s19 + $0x1a8] sm:$0xff] %v2531_v35  ;;  %v2516_v13 = vmul.f32 %v9665_v14, %v2500_v39  ;;  %7092 = vrsqrt.f32 %v2473_v45 }
 0x415   : > { %v7083_v48 = vpop.eup %7082  ;;  %v2476_v49 = vadd.f32 1e-05, %v2460_v25  ;;  %v2475_v40 = vadd.f32 1e-05, %v2459_v11 }
 0x416   : > { %v7085_v28 = vpop.eup %7084  ;;  %v2532_v53 = vadd.f32 %v9677_v32, %v2516_v13  ;;  %v2502_v47 = vmul.f32 %v7083_v48, %v10941_v42  ;;  %v2947_v26 = vpop.xlane.xlu1 %2946 }
 0x417   : > { %v2445_v2 = vpop.xlane.xlu0 %2444  ;;  %v2501_v20 = vmul.f32 %v7085_v28, %v10942_v43  ;;  %7094 = vrsqrt.f32 %v2476_v49  ;;  %v2978_v30 = vmul.f32 0.0078125, %v2947_v26 }
 0x418   : > { %v2461_v1 = vmul.f32 0.0078125, %v2445_v2  ;;  %4861 = vst [vmem:[%s9162_s19 + $0x1b0] sm:$0xff] %v2532_v53  ;;  %v2518_v35 = vmul.f32 %v9665_v14, %v2502_v47  ;;  %7096 = vrsqrt.f32 %v2475_v40  ;;  %v10943_v53 = vld [vmem:[#allocation67_spill] sm:$0xff] }
 0x419   : > { %v7087_v45 = vpop.eup %7086  ;;  %v2517_v39 = vmul.f32 %v9665_v14, %v2501_v20  ;;  %v2994_v7 = vadd.f32 1e-05, %v2978_v30 }
 0x41a   : > { %v2477_v25 = vadd.f32 1e-05, %v2461_v1  ;;  %v7089_v11 = vpop.eup %7088  ;;  %v2534_v13 = vadd.f32 %v9677_v32, %v2518_v35  ;;  %v2504_v48 = vmul.f32 %v7087_v45, %v9406_v36  ;;  %v2951_v28 = vpop.xlane.xlu1 %2950  ;;  %v10944_v35 = vld [vmem:[#allocation30_spill] sm:$0xff] }
 0x41b   : > { %v2949_v49 = vpop.xlane.xlu0 %2948  ;;  %v2533_v42 = vadd.f32 %v9677_v32, %v2517_v39  ;;  %v2503_v26 = vmul.f32 %v7089_v11, %v10943_v53  ;;  %7098 = vrsqrt.f32 %v2994_v7  ;;  %v2980_v47 = vmul.f32 0.0078125, %v2951_v28 }
 0x41c   : > { %4863 = vst [vmem:[%s9162_s19 + $0x1c0] sm:$0xff] %v2534_v13  ;;  %v2520_v40 = vmul.f32 %v9665_v14, %v2504_v48  ;;  %7100 = vrsqrt.f32 %v2477_v25  ;;  %v2979_v2 = vmul.f32 0.0078125, %v2949_v49  ;;  %v10945_v48 = vld [vmem:[#allocation69_spill] sm:$0xff] }
 0x41d   : > { %v7091_v43 = vpop.eup %7090  ;;  %4862 = vst [vmem:[%s9162_s19 + $0x1b8] sm:$0xff] %v2533_v42  ;;  %v2519_v20 = vmul.f32 %v9665_v14, %v2503_v26  ;;  %v2996_v30 = vadd.f32 1e-05, %v2980_v47 }
 0x41e   : > { %v7093_v36 = vpop.eup %7092  ;;  %v2536_v1 = vadd.f32 %v9677_v32, %v2520_v40  ;;  %v2506_v45 = vmul.f32 %v7091_v43, %v10944_v35  ;;  %v2995_v39 = vadd.f32 1e-05, %v2979_v2  ;;  %v2955_v7 = vpop.xlane.xlu1 %2954  ;;  %v10946_v43 = vld [vmem:[#allocation111_spill] sm:$0xff] }
 0x41f   : > { %v2953_v11 = vpop.xlane.xlu0 %2952  ;;  %v2535_v13 = vadd.f32 %v9677_v32, %v2519_v20  ;;  %v2505_v25 = vmul.f32 %v7093_v36, %v10945_v48  ;;  %7102 = vrsqrt.f32 %v2996_v30  ;;  %v2982_v28 = vmul.f32 0.0078125, %v2955_v7 }
 0x420   : > { %4865 = vst [vmem:[%s9162_s19 + $0x1d0] sm:$0xff] %v2536_v1  ;;  %v2522_v49 = vmul.f32 %v9665_v14, %v2506_v45  ;;  %7104 = vrsqrt.f32 %v2995_v39  ;;  %v2981_v42 = vmul.f32 0.0078125, %v2953_v11  ;;  %v10947_v45 = vld [vmem:[#allocation31_spill] sm:$0xff] }
 0x421   : > { %v7095_v53 = vpop.eup %7094  ;;  %4864 = vst [vmem:[%s9162_s19 + $0x1c8] sm:$0xff] %v2535_v13  ;;  %v2521_v26 = vmul.f32 %v9665_v14, %v2505_v25  ;;  %v2998_v47 = vadd.f32 1e-05, %v2982_v28 }
 0x422   : > { %v7097_v40 = vpop.eup %7096  ;;  %v2538_v2 = vadd.f32 %v9677_v32, %v2522_v49  ;;  %v2508_v20 = vmul.f32 %v7095_v53, %v10946_v43  ;;  %v2997_v36 = vadd.f32 1e-05, %v2981_v42  ;;  %v2959_v30 = vpop.xlane.xlu1 %2958  ;;  %v10948_v53 = vld [vmem:[#allocation73_spill] sm:$0xff] }
 0x423   : > { %v2957_v35 = vpop.xlane.xlu0 %2956  ;;  %v2537_v1 = vadd.f32 %v9677_v32, %v2521_v26  ;;  %v2507_v39 = vmul.f32 %v7097_v40, %v10947_v45  ;;  %7106 = vrsqrt.f32 %v2998_v47  ;;  %v2984_v7 = vmul.f32 0.0078125, %v2959_v30 }
 0x424   : > { %4867 = vst [vmem:[%s9162_s19 + $0x1e0] sm:$0xff] %v2538_v2  ;;  %v2524_v11 = vmul.f32 %v9665_v14, %v2508_v20  ;;  %7108 = vrsqrt.f32 %v2997_v36  ;;  %v2983_v13 = vmul.f32 0.0078125, %v2957_v35  ;;  %v10949_v20 = vld [vmem:[#allocation71_spill] sm:$0xff] }
 0x425   : > { %v7099_v48 = vpop.eup %7098  ;;  %4866 = vst [vmem:[%s9162_s19 + $0x1d8] sm:$0xff] %v2537_v1  ;;  %v2523_v25 = vmul.f32 %v9665_v14, %v2507_v39  ;;  %v3000_v28 = vadd.f32 1e-05, %v2984_v7  ;;  %v10071_v14 = vld [vmem:[%s10386_s5] ss:$0 sm:$0xff] }
 0x426   : > { %v7101_v49 = vpop.eup %7100  ;;  %v2540_v42 = vadd.f32 %v9677_v32, %v2524_v11  ;;  %v3026_v26 = vmul.f32 %v7099_v48, %v10948_v53  ;;  %v2999_v40 = vadd.f32 1e-05, %v2983_v13  ;;  %v2963_v47 = vpop.xlane.xlu1 %2962  ;;  %v10079_v11 = vld [vmem:[%s10387_s6] ss:$0 sm:$0xff]  ;;  %v10950_v48 = vld [vmem:[#allocation32_spill] sm:$0xff] }
 0x427   : > { %v2961_v43 = vpop.xlane.xlu0 %2960  ;;  %v2539_v2 = vadd.f32 %v9677_v32, %v2523_v25  ;;  %v2509_v36 = vmul.f32 %v7101_v49, %v10949_v20  ;;  %7110 = vrsqrt.f32 %v3000_v28  ;;  %v2986_v30 = vmul.f32 0.0078125, %v2963_v47 }
 0x428   : > { %4869 = vst [vmem:[%s9162_s19 + $0x1f0] sm:$0xff] %v2540_v42  ;;  %v3042_v35 = vmul.f32 %v10071_v14, %v3026_v26  ;;  %7112 = vrsqrt.f32 %v2999_v40  ;;  %v2985_v1 = vmul.f32 0.0078125, %v2961_v43  ;;  %v10951_v26 = vld [vmem:[#allocation115_spill] sm:$0xff] }
 0x429   : > { %v7103_v45 = vpop.eup %7102  ;;  %4868 = vst [vmem:[%s9162_s19 + $0x1e8] sm:$0xff] %v2539_v2  ;;  %v2525_v39 = vmul.f32 %v10071_v14, %v2509_v36  ;;  %v3002_v32 = vadd.f32 1e-05, %v2986_v30 }
 0x42a   : > { %v7105_v7 = vpop.eup %7104  ;;  %v3058_v13 = vadd.f32 %v10079_v11, %v3042_v35  ;;  %v3028_v25 = vmul.f32 %v7103_v45, %v10950_v48  ;;  %v3001_v28 = vadd.f32 1e-05, %v2985_v1  ;;  %v2967_v49 = vpop.xlane.xlu1 %2966  ;;  %v10952_v45 = vld [vmem:[#allocation114_spill] sm:$0xff] }
 0x42b   : > { %v2965_v42 = vpop.xlane.xlu0 %2964  ;;  %v2541_v53 = vadd.f32 %v10079_v11, %v2525_v39  ;;  %v3027_v40 = vmul.f32 %v7105_v7, %v10951_v26  ;;  %7114 = vrsqrt.f32 %v3002_v32  ;;  %v2988_v47 = vmul.f32 0.0078125, %v2967_v49 }
 0x42c   : > { %4887 = vst [vmem:[%s9162_s19 + $0x200] sm:$0xff] %v3058_v13  ;;  %v3044_v43 = vmul.f32 %v10071_v14, %v3028_v25  ;;  %7116 = vrsqrt.f32 %v3001_v28  ;;  %v2987_v2 = vmul.f32 0.0078125, %v2965_v42  ;;  %v10953_v25 = vld [vmem:[#allocation33_spill] sm:$0xff] }
 0x42d   : > { %v7107_v20 = vpop.eup %7106  ;;  %4870 = vst [vmem:[%s9162_s19 + $0x1f8] sm:$0xff] %v2541_v53  ;;  %v3043_v36 = vmul.f32 %v10071_v14, %v3027_v40  ;;  %v3004_v30 = vadd.f32 1e-05, %v2988_v47 }
 0x42e   : > { %v7109_v35 = vpop.eup %7108  ;;  %v3060_v1 = vadd.f32 %v10079_v11, %v3044_v43  ;;  %v3030_v39 = vmul.f32 %v7107_v20, %v10952_v45  ;;  %v3003_v7 = vadd.f32 1e-05, %v2987_v2  ;;  %v2971_v32 = vpop.xlane.xlu1 %2970 }
 0x42f   : > { %v2969_v48 = vpop.xlane.xlu0 %2968  ;;  %v3059_v13 = vadd.f32 %v10079_v11, %v3043_v36  ;;  %v3029_v28 = vmul.f32 %v7109_v35, %v10953_v25  ;;  %7118 = vrsqrt.f32 %v3004_v30  ;;  %v2990_v49 = vmul.f32 0.0078125, %v2971_v32 }
 0x430   : > { %4889 = vst [vmem:[%s9162_s19 + $0x210] sm:$0xff] %v3060_v1  ;;  %v3046_v42 = vmul.f32 %v10071_v14, %v3030_v39  ;;  %7120 = vrsqrt.f32 %v3003_v7  ;;  %v2989_v53 = vmul.f32 0.0078125, %v2969_v48 }
 0x431   : > { %v7111_v26 = vpop.eup %7110  ;;  %4888 = vst [vmem:[%s9162_s19 + $0x208] sm:$0xff] %v3059_v13  ;;  %v3045_v40 = vmul.f32 %v10071_v14, %v3029_v28  ;;  %v3006_v47 = vadd.f32 1e-05, %v2990_v49  ;;  %v10954_v49 = vld [vmem:[#allocation120_spill] sm:$0xff] }
 0x432   : > { %v7113_v43 = vpop.eup %7112  ;;  %v3062_v2 = vadd.f32 %v10079_v11, %v3046_v42  ;;  %v3032_v20 = vmul.f32 %v7111_v26, %v9514_v22  ;;  %v3005_v36 = vadd.f32 1e-05, %v2989_v53  ;;  %v2975_v30 = vpop.xlane.xlu1 %2974 }
 0x433   : > { %v2973_v35 = vpop.xlane.xlu0 %2972  ;;  %v3061_v1 = vadd.f32 %v10079_v11, %v3045_v40  ;;  %v3031_v45 = vmul.f32 %v7113_v43, %v9505_v57  ;;  %7122 = vrsqrt.f32 %v3006_v47  ;;  %v2992_v39 = vmul.f32 0.0078125, %v2975_v30  ;;  %v10955_v47 = vld [vmem:[#allocation75_spill] sm:$0xff] }
 0x434   : > { %4891 = vst [vmem:[%s9162_s19 + $0x220] sm:$0xff] %v3062_v2  ;;  %v3048_v7 = vmul.f32 %v10071_v14, %v3032_v20  ;;  %7124 = vrsqrt.f32 %v3005_v36  ;;  %v2991_v32 = vmul.f32 0.0078125, %v2973_v35 }
 0x435   : > { %v7115_v48 = vpop.eup %7114  ;;  %4890 = vst [vmem:[%s9162_s19 + $0x218] sm:$0xff] %v3061_v1  ;;  %v3047_v13 = vmul.f32 %v10071_v14, %v3031_v45  ;;  %v3008_v22 = vadd.f32 1e-05, %v2992_v39 }
 0x436   : > { %v7117_v25 = vpop.eup %7116  ;;  %v3064_v28 = vadd.f32 %v10079_v11, %v3048_v7  ;;  %v3034_v42 = vmul.f32 %v7115_v48, %v10954_v49  ;;  %v3007_v57 = vadd.f32 1e-05, %v2991_v32  ;;  %v3479_v53 = vpop.xlane.xlu1 %3478  ;;  %v10956_v7 = vld [vmem:[#allocation119_spill] sm:$0xff] }
 0x437   : > { %v2977_v26 = vpop.xlane.xlu0 %2976  ;;  %v3063_v40 = vadd.f32 %v10079_v11, %v3047_v13  ;;  %v3033_v43 = vmul.f32 %v7117_v25, %v10955_v47  ;;  %7126 = vrsqrt.f32 %v3008_v22  ;;  %v3510_v2 = vmul.f32 0.0078125, %v3479_v53 }
 0x438   : > { %4893 = vst [vmem:[%s9162_s19 + $0x230] sm:$0xff] %v3064_v28  ;;  %v3050_v20 = vmul.f32 %v10071_v14, %v3034_v42  ;;  %7128 = vrsqrt.f32 %v3007_v57  ;;  %v2993_v36 = vmul.f32 0.0078125, %v2977_v26  ;;  %v10957_v28 = vld [vmem:[#allocation77_spill] sm:$0xff] }
 0x439   : > { %v7119_v30 = vpop.eup %7118  ;;  %4892 = vst [vmem:[%s9162_s19 + $0x228] sm:$0xff] %v3063_v40  ;;  %v3049_v35 = vmul.f32 %v10071_v14, %v3033_v43  ;;  %v3526_v1 = vadd.f32 1e-05, %v3510_v2 }
 0x43a   : > { %v7121_v45 = vpop.eup %7120  ;;  %v3066_v39 = vadd.f32 %v10079_v11, %v3050_v20  ;;  %v3036_v32 = vmul.f32 %v7119_v30, %v10956_v7  ;;  %v3009_v48 = vadd.f32 1e-05, %v2993_v36  ;;  %v3483_v13 = vpop.xlane.xlu1 %3482 }
 0x43b   : > { %v3481_v22 = vpop.xlane.xlu0 %3480  ;;  %v3065_v25 = vadd.f32 %v10079_v11, %v3049_v35  ;;  %v3035_v49 = vmul.f32 %v7121_v45, %v10957_v28  ;;  %7130 = vrsqrt.f32 %v3526_v1  ;;  %v3512_v42 = vmul.f32 0.0078125, %v3483_v13 }
 0x43c   : > { %4895 = vst [vmem:[%s9162_s19 + $0x240] sm:$0xff] %v3066_v39  ;;  %v3052_v57 = vmul.f32 %v10071_v14, %v3036_v32  ;;  %7132 = vrsqrt.f32 %v3009_v48  ;;  %v3511_v53 = vmul.f32 0.0078125, %v3481_v22 }
 0x43d   : > { %v7123_v26 = vpop.eup %7122  ;;  %4894 = vst [vmem:[%s9162_s19 + $0x238] sm:$0xff] %v3065_v25  ;;  %v3051_v40 = vmul.f32 %v10071_v14, %v3035_v49  ;;  %v3528_v47 = vadd.f32 1e-05, %v3512_v42 }
 0x43e   : > { %v7125_v43 = vpop.eup %7124  ;;  %v3068_v2 = vadd.f32 %v10079_v11, %v3052_v57  ;;  %v3038_v20 = vmul.f32 %v7123_v26, %v9568_v51  ;;  %v3527_v36 = vadd.f32 1e-05, %v3511_v53  ;;  %v3487_v30 = vpop.xlane.xlu1 %3486  ;;  %v10958_v53 = vld [vmem:[#allocation34_spill] sm:$0xff] }
 0x43f   : > { %v3485_v35 = vpop.xlane.xlu0 %3484  ;;  %v3067_v1 = vadd.f32 %v10079_v11, %v3051_v40  ;;  %v3037_v45 = vmul.f32 %v7125_v43, %v9559_v33  ;;  %7134 = vrsqrt.f32 %v3528_v47  ;;  %v3514_v39 = vmul.f32 0.0078125, %v3487_v30 }
 0x440   : > { %4897 = vst [vmem:[%s9162_s19 + $0x250] sm:$0xff] %v3068_v2  ;;  %v3054_v7 = vmul.f32 %v10071_v14, %v3038_v20  ;;  %7136 = vrsqrt.f32 %v3527_v36  ;;  %v3513_v32 = vmul.f32 0.0078125, %v3485_v35  ;;  %v10959_v35 = vld [vmem:[#allocation35_spill] sm:$0xff] }
 0x441   : > { %v7127_v48 = vpop.eup %7126  ;;  %4896 = vst [vmem:[%s9162_s19 + $0x248] sm:$0xff] %v3067_v1  ;;  %v3053_v13 = vmul.f32 %v10071_v14, %v3037_v45  ;;  %v3530_v51 = vadd.f32 1e-05, %v3514_v39 }
 0x442   : > { %v7129_v22 = vpop.eup %7128  ;;  %v3070_v25 = vadd.f32 %v10079_v11, %v3054_v7  ;;  %v3040_v28 = vmul.f32 %v7127_v48, %v9585_v52  ;;  %v3529_v33 = vadd.f32 1e-05, %v3513_v32  ;;  %v3491_v49 = vpop.xlane.xlu1 %3490  ;;  %v10960_v48 = vld [vmem:[#allocation118_spill] sm:$0xff] }
 0x443   : > { %v3489_v42 = vpop.xlane.xlu0 %3488  ;;  %v3069_v57 = vadd.f32 %v10079_v11, %v3053_v13  ;;  %v3039_v26 = vmul.f32 %v7129_v22, %v10958_v53  ;;  %7138 = vrsqrt.f32 %v3530_v51  ;;  %v3516_v40 = vmul.f32 0.0078125, %v3491_v49 }
 0x444   : > { %4899 = vst [vmem:[%s9162_s19 + $0x260] sm:$0xff] %v3070_v25  ;;  %v3056_v47 = vmul.f32 %v10071_v14, %v3040_v28  ;;  %7140 = vrsqrt.f32 %v3529_v33  ;;  %v3515_v43 = vmul.f32 0.0078125, %v3489_v42 }
 0x445   : > { %v7131_v2 = vpop.eup %7130  ;;  %4898 = vst [vmem:[%s9162_s19 + $0x258] sm:$0xff] %v3069_v57  ;;  %v3055_v20 = vmul.f32 %v10071_v14, %v3039_v26  ;;  %v3532_v52 = vadd.f32 1e-05, %v3516_v40 }
 0x446   : > { %v7133_v36 = vpop.eup %7132  ;;  %v3072_v30 = vadd.f32 %v10079_v11, %v3056_v47  ;;  %v3558_v1 = vmul.f32 %v7131_v2, %v10959_v35  ;;  %v3531_v45 = vadd.f32 1e-05, %v3515_v43  ;;  %v3495_v39 = vpop.xlane.xlu1 %3494 }
 0x447   : > { %v3493_v7 = vpop.xlane.xlu0 %3492  ;;  %v3071_v32 = vadd.f32 %v10079_v11, %v3055_v20  ;;  %v3041_v13 = vmul.f32 %v7133_v36, %v10960_v48  ;;  %7142 = vrsqrt.f32 %v3532_v52  ;;  %v3518_v51 = vmul.f32 0.0078125, %v3495_v39 }
 0x448   : > { %4901 = vst [vmem:[%s9162_s19 + $0x270] sm:$0xff] %v3072_v30  ;;  %v3574_v22 = vmul.f32 %v10071_v14, %v3558_v1  ;;  %7144 = vrsqrt.f32 %v3531_v45  ;;  %v3517_v25 = vmul.f32 0.0078125, %v3493_v7 }
 0x449   : > { %v7135_v28 = vpop.eup %7134  ;;  %4900 = vst [vmem:[%s9162_s19 + $0x268] sm:$0xff] %v3071_v32  ;;  %v3057_v33 = vmul.f32 %v10071_v14, %v3041_v13  ;;  %v3534_v49 = vadd.f32 1e-05, %v3518_v51  ;;  %v10961_v13 = vld [vmem:[#allocation79_spill] sm:$0xff] }
 0x44a   : > { %v7137_v42 = vpop.eup %7136  ;;  %v3590_v57 = vadd.f32 %v10079_v11, %v3574_v22  ;;  %v3560_v53 = vmul.f32 %v7135_v28, %v9622_v44  ;;  %v3533_v26 = vadd.f32 1e-05, %v3517_v25  ;;  %v3499_v40 = vpop.xlane.xlu1 %3498 }
 0x44b   : > { %v3497_v47 = vpop.xlane.xlu0 %3496  ;;  %v3073_v43 = vadd.f32 %v10079_v11, %v3057_v33  ;;  %v3559_v2 = vmul.f32 %v7137_v42, %v9613_v4  ;;  %7146 = vrsqrt.f32 %v3534_v49  ;;  %v3520_v20 = vmul.f32 0.0078125, %v3499_v40 }
 0x44c   : > { %4919 = vst [vmem:[%s9162_s19 + $0x280] sm:$0xff] %v3590_v57  ;;  %v3576_v52 = vmul.f32 %v10071_v14, %v3560_v53  ;;  %7148 = vrsqrt.f32 %v3533_v26  ;;  %v3519_v36 = vmul.f32 0.0078125, %v3497_v47  ;;  %v10962_v53 = vld [vmem:[#allocation81_spill] sm:$0xff] }
 0x44d   : > { %v7139_v30 = vpop.eup %7138  ;;  %4902 = vst [vmem:[%s9162_s19 + $0x278] sm:$0xff] %v3073_v43  ;;  %v3575_v35 = vmul.f32 %v10071_v14, %v3559_v2  ;;  %v3536_v44 = vadd.f32 1e-05, %v3520_v20  ;;  %v10963_v20 = vld [vmem:[#allocation124_spill] sm:$0xff] }
 0x44e   : > { %v7141_v1 = vpop.eup %7140  ;;  %v3592_v45 = vadd.f32 %v10079_v11, %v3576_v52  ;;  %v3562_v39 = vmul.f32 %v7139_v30, %v9639_v38  ;;  %v3535_v4 = vadd.f32 1e-05, %v3519_v36  ;;  %v3503_v7 = vpop.xlane.xlu1 %3502 }
 0x44f   : > { %v3501_v32 = vpop.xlane.xlu0 %3500  ;;  %v3591_v48 = vadd.f32 %v10079_v11, %v3575_v35  ;;  %v3561_v51 = vmul.f32 %v7141_v1, %v10961_v13  ;;  %7150 = vrsqrt.f32 %v3536_v44  ;;  %v3522_v22 = vmul.f32 0.0078125, %v3503_v7 }
 0x450   : > { %4921 = vst [vmem:[%s9162_s19 + $0x290] sm:$0xff] %v3592_v45  ;;  %v3578_v25 = vmul.f32 %v10071_v14, %v3562_v39  ;;  %7152 = vrsqrt.f32 %v3535_v4  ;;  %v3521_v28 = vmul.f32 0.0078125, %v3501_v32 }
 0x451   : > { %v7143_v33 = vpop.eup %7142  ;;  %4920 = vst [vmem:[%s9162_s19 + $0x288] sm:$0xff] %v3591_v48  ;;  %v3577_v49 = vmul.f32 %v10071_v14, %v3561_v51  ;;  %v3538_v38 = vadd.f32 1e-05, %v3522_v22 }
 0x452   : > { %v7145_v42 = vpop.eup %7144  ;;  %v3594_v57 = vadd.f32 %v10079_v11, %v3578_v25  ;;  %v3564_v26 = vmul.f32 %v7143_v33, %v10962_v53  ;;  %v3537_v40 = vadd.f32 1e-05, %v3521_v28  ;;  %v3507_v47 = vpop.xlane.xlu1 %3506 }
 0x453   : > { %v3505_v43 = vpop.xlane.xlu0 %3504  ;;  %v3593_v2 = vadd.f32 %v10079_v11, %v3577_v49  ;;  %v3563_v52 = vmul.f32 %v7145_v42, %v10963_v20  ;;  %7154 = vrsqrt.f32 %v3538_v38  ;;  %v3524_v36 = vmul.f32 0.0078125, %v3507_v47 }
 0x454   : > { %4923 = vst [vmem:[%s9162_s19 + $0x2a0] sm:$0xff] %v3594_v57  ;;  %v3580_v30 = vmul.f32 %v10071_v14, %v3564_v26  ;;  %7156 = vrsqrt.f32 %v3537_v40  ;;  %v3523_v35 = vmul.f32 0.0078125, %v3505_v43  ;;  %v10964_v43 = vld [vmem:[#allocation123_spill] sm:$0xff] }
 0x455   : > { %v7147_v44 = vpop.eup %7146  ;;  %4922 = vst [vmem:[%s9162_s19 + $0x298] sm:$0xff] %v3593_v2  ;;  %v3579_v1 = vmul.f32 %v10071_v14, %v3563_v52  ;;  %v3540_v45 = vadd.f32 1e-05, %v3524_v36 }
 0x456   : > { %v7149_v39 = vpop.eup %7148  ;;  %v3596_v4 = vadd.f32 %v10079_v11, %v3580_v30  ;;  %v3566_v7 = vmul.f32 %v7147_v44, %v9686_v41  ;;  %v3539_v32 = vadd.f32 1e-05, %v3523_v35  ;;  %v4011_v48 = vpop.xlane.xlu1 %4010 }
 0x457   : > { %v3509_v13 = vpop.xlane.xlu0 %3508  ;;  %v3595_v51 = vadd.f32 %v10079_v11, %v3579_v1  ;;  %v3565_v22 = vmul.f32 %v7149_v39, %v9672_v12  ;;  %7158 = vrsqrt.f32 %v3540_v45  ;;  %v4042_v25 = vmul.f32 0.0078125, %v4011_v48  ;;  %v10965_v45 = vld [vmem:[#allocation122_spill] sm:$0xff] }
 0x458   : > { %4925 = vst [vmem:[%s9162_s19 + $0x2b0] sm:$0xff] %v3596_v4  ;;  %v3582_v28 = vmul.f32 %v10071_v14, %v3566_v7  ;;  %7160 = vrsqrt.f32 %v3539_v32  ;;  %v3525_v33 = vmul.f32 0.0078125, %v3509_v13  ;;  %v10966_v13 = vld [vmem:[#allocation36_spill] sm:$0xff] }
 0x459   : > { %v7151_v49 = vpop.eup %7150  ;;  %4924 = vst [vmem:[%s9162_s19 + $0x2a8] sm:$0xff] %v3595_v51  ;;  %v3581_v38 = vmul.f32 %v10071_v14, %v3565_v22  ;;  %v4058_v41 = vadd.f32 1e-05, %v4042_v25 }
 0x45a   : > { %v7153_v42 = vpop.eup %7152  ;;  %v3598_v57 = vadd.f32 %v10079_v11, %v3582_v28  ;;  %v3568_v53 = vmul.f32 %v7151_v49, %v9703_v8  ;;  %v3541_v12 = vadd.f32 1e-05, %v3525_v33  ;;  %v4015_v26 = vpop.xlane.xlu1 %4014 }
 0x45b   : > { %v4013_v40 = vpop.xlane.xlu0 %4012  ;;  %v3597_v47 = vadd.f32 %v10079_v11, %v3581_v38  ;;  %v3567_v2 = vmul.f32 %v7153_v42, %v10964_v43  ;;  %7162 = vrsqrt.f32 %v4058_v41  ;;  %v4044_v20 = vmul.f32 0.0078125, %v4015_v26 }
 0x45c   : > { %4927 = vst [vmem:[%s9162_s19 + $0x2c0] sm:$0xff] %v3598_v57  ;;  %v3584_v52 = vmul.f32 %v10071_v14, %v3568_v53  ;;  %7164 = vrsqrt.f32 %v3541_v12  ;;  %v4043_v36 = vmul.f32 0.0078125, %v4013_v40 }
 0x45d   : > { %v7155_v30 = vpop.eup %7154  ;;  %4926 = vst [vmem:[%s9162_s19 + $0x2b8] sm:$0xff] %v3597_v47  ;;  %v3583_v35 = vmul.f32 %v10071_v14, %v3567_v2  ;;  %v4060_v8 = vadd.f32 1e-05, %v4044_v20 }
 0x45e   : > { %v7157_v44 = vpop.eup %7156  ;;  %v3600_v1 = vadd.f32 %v10079_v11, %v3584_v52  ;;  %v3570_v39 = vmul.f32 %v7155_v30, %v10965_v45  ;;  %v4059_v4 = vadd.f32 1e-05, %v4043_v36  ;;  %v4019_v7 = vpop.xlane.xlu1 %4018 }
 0x45f   : > { %v4017_v32 = vpop.xlane.xlu0 %4016  ;;  %v3599_v48 = vadd.f32 %v10079_v11, %v3583_v35  ;;  %v3569_v51 = vmul.f32 %v7157_v44, %v10966_v13  ;;  %7166 = vrsqrt.f32 %v4060_v8  ;;  %v4046_v22 = vmul.f32 0.0078125, %v4019_v7 }
 0x460   : > { %4929 = vst [vmem:[%s9162_s19 + $0x2d0] sm:$0xff] %v3600_v1  ;;  %v3586_v25 = vmul.f32 %v10071_v14, %v3570_v39  ;;  %7168 = vrsqrt.f32 %v4059_v4  ;;  %v4045_v28 = vmul.f32 0.0078125, %v4017_v32  ;;  %v10967_v39 = vld [vmem:[#allocation38_spill] sm:$0xff] }
 0x461   : > { %v7159_v33 = vpop.eup %7158  ;;  %4928 = vst [vmem:[%s9162_s19 + $0x2c8] sm:$0xff] %v3599_v48  ;;  %v3585_v49 = vmul.f32 %v10071_v14, %v3569_v51  ;;  %v4062_v38 = vadd.f32 1e-05, %v4046_v22 }
 0x462   : > { %v7161_v41 = vpop.eup %7160  ;;  %v3602_v42 = vadd.f32 %v10079_v11, %v3586_v25  ;;  %v3572_v57 = vmul.f32 %v7159_v33, %v9740_v58  ;;  %v4061_v53 = vadd.f32 1e-05, %v4045_v28  ;;  %v4023_v12 = vpop.xlane.xlu1 %4022  ;;  %v10968_v28 = vld [vmem:[#allocation83_spill] sm:$0xff] }
 0x463   : > { %v4021_v26 = vpop.xlane.xlu0 %4020  ;;  %v3601_v40 = vadd.f32 %v10079_v11, %v3585_v49  ;;  %v3571_v47 = vmul.f32 %v7161_v41, %v9731_v16  ;;  %7170 = vrsqrt.f32 %v4062_v38  ;;  %v4048_v43 = vmul.f32 0.0078125, %v4023_v12 }
 0x464   : > { %4931 = vst [vmem:[%s9162_s19 + $0x2e0] sm:$0xff] %v3602_v42  ;;  %v3588_v2 = vmul.f32 %v10071_v14, %v3572_v57  ;;  %7172 = vrsqrt.f32 %v4061_v53  ;;  %v4047_v20 = vmul.f32 0.0078125, %v4021_v26  ;;  %v10969_v57 = vld [vmem:[#allocation37_spill] sm:$0xff] }
 0x465   : > { %v7163_v52 = vpop.eup %7162  ;;  %4930 = vst [vmem:[%s9162_s19 + $0x2d8] sm:$0xff] %v3601_v40  ;;  %v3587_v36 = vmul.f32 %v10071_v14, %v3571_v47  ;;  %v4064_v58 = vadd.f32 1e-05, %v4048_v43 }
 0x466   : > { %v7165_v30 = vpop.eup %7164  ;;  %v3604_v35 = vadd.f32 %v10079_v11, %v3588_v2  ;;  %v4090_v8 = vmul.f32 %v7163_v52, %v9757_v56  ;;  %v4063_v16 = vadd.f32 1e-05, %v4047_v20  ;;  %v4027_v44 = vpop.xlane.xlu1 %4026 }
 0x467   : > { %v4025_v1 = vpop.xlane.xlu0 %4024  ;;  %v3603_v45 = vadd.f32 %v10079_v11, %v3587_v36  ;;  %v3573_v4 = vmul.f32 %v7165_v30, %v10967_v39  ;;  %7174 = vrsqrt.f32 %v4064_v58  ;;  %v4050_v7 = vmul.f32 0.0078125, %v4027_v44 }
 0x468   : > { %4933 = vst [vmem:[%s9162_s19 + $0x2f0] sm:$0xff] %v3604_v35  ;;  %v4106_v32 = vmul.f32 %v10071_v14, %v4090_v8  ;;  %7176 = vrsqrt.f32 %v4063_v16  ;;  %v4049_v48 = vmul.f32 0.0078125, %v4025_v1 }
 0x469   : > { %v7167_v13 = vpop.eup %7166  ;;  %4932 = vst [vmem:[%s9162_s19 + $0x2e8] sm:$0xff] %v3603_v45  ;;  %v3589_v51 = vmul.f32 %v10071_v14, %v3573_v4  ;;  %v4066_v56 = vadd.f32 1e-05, %v4050_v7 }
 0x46a   : > { %v7169_v22 = vpop.eup %7168  ;;  %v4122_v25 = vadd.f32 %v10079_v11, %v4106_v32  ;;  %v4092_v33 = vmul.f32 %v7167_v13, %v10968_v28  ;;  %v4065_v49 = vadd.f32 1e-05, %v4049_v48  ;;  %v4031_v38 = vpop.xlane.xlu1 %4030 }
 0x46b   : > { %v4029_v41 = vpop.xlane.xlu0 %4028  ;;  %v3605_v42 = vadd.f32 %v10079_v11, %v3589_v51  ;;  %v4091_v53 = vmul.f32 %v7169_v22, %v10969_v57  ;;  %7178 = vrsqrt.f32 %v4066_v56  ;;  %v4052_v12 = vmul.f32 0.0078125, %v4031_v38  ;;  %v10970_v22 = vld [vmem:[#allocation39_spill] sm:$0xff] }
 0x46c   : > { %4951 = vst [vmem:[%s9162_s19 + $0x300] sm:$0xff] %v4122_v25  ;;  %v4108_v26 = vmul.f32 %v10071_v14, %v4092_v33  ;;  %7180 = vrsqrt.f32 %v4065_v49  ;;  %v4051_v40 = vmul.f32 0.0078125, %v4029_v41 }
 0x46d   : > { %v7171_v47 = vpop.eup %7170  ;;  %4934 = vst [vmem:[%s9162_s19 + $0x2f8] sm:$0xff] %v3605_v42  ;;  %v4107_v43 = vmul.f32 %v10071_v14, %v4091_v53  ;;  %v4068_v2 = vadd.f32 1e-05, %v4052_v12 }
 0x46e   : > { %v7173_v20 = vpop.eup %7172  ;;  %v4124_v52 = vadd.f32 %v10079_v11, %v4108_v26  ;;  %v4094_v36 = vmul.f32 %v7171_v47, %v9794_v6  ;;  %v4067_v58 = vadd.f32 1e-05, %v4051_v40  ;;  %v4035_v30 = vpop.xlane.xlu1 %4034 }
 0x46f   : > { %v4033_v35 = vpop.xlane.xlu0 %4032  ;;  %v4123_v8 = vadd.f32 %v10079_v11, %v4107_v43  ;;  %v4093_v16 = vmul.f32 %v7173_v20, %v9785_v24  ;;  %7182 = vrsqrt.f32 %v4068_v2  ;;  %v4054_v44 = vmul.f32 0.0078125, %v4035_v30  ;;  %v10971_v43 = vld [vmem:[#allocation86_spill] sm:$0xff] }
 0x470   : > { %4953 = vst [vmem:[%s9162_s19 + $0x310] sm:$0xff] %v4124_v52  ;;  %v4110_v1 = vmul.f32 %v10071_v14, %v4094_v36  ;;  %7184 = vrsqrt.f32 %v4067_v58  ;;  %v4053_v45 = vmul.f32 0.0078125, %v4033_v35 }
 0x471   : > { %v7175_v39 = vpop.eup %7174  ;;  %4952 = vst [vmem:[%s9162_s19 + $0x308] sm:$0xff] %v4123_v8  ;;  %v4109_v4 = vmul.f32 %v10071_v14, %v4093_v16  ;;  %v4070_v6 = vadd.f32 1e-05, %v4054_v44 }
 0x472   : > { %v7177_v7 = vpop.eup %7176  ;;  %v4126_v32 = vadd.f32 %v10079_v11, %v4110_v1  ;;  %v4096_v48 = vmul.f32 %v7175_v39, %v9811_v9  ;;  %v4069_v24 = vadd.f32 1e-05, %v4053_v45  ;;  %v4039_v13 = vpop.xlane.xlu1 %4038 }
 0x473   : > { %v4037_v51 = vpop.xlane.xlu0 %4036  ;;  %v4125_v56 = vadd.f32 %v10079_v11, %v4109_v4  ;;  %v4095_v25 = vmul.f32 %v7177_v7, %v10970_v22  ;;  %7186 = vrsqrt.f32 %v4070_v6  ;;  %v4056_v28 = vmul.f32 0.0078125, %v4039_v13 }
 0x474   : > { %4955 = vst [vmem:[%s9162_s19 + $0x320] sm:$0xff] %v4126_v32  ;;  %v4112_v33 = vmul.f32 %v10071_v14, %v4096_v48  ;;  %7188 = vrsqrt.f32 %v4069_v24  ;;  %v4055_v49 = vmul.f32 0.0078125, %v4037_v51 }
 0x475   : > { %v7179_v38 = vpop.eup %7178  ;;  %4954 = vst [vmem:[%s9162_s19 + $0x318] sm:$0xff] %v4125_v56  ;;  %v4111_v41 = vmul.f32 %v10071_v14, %v4095_v25  ;;  %v4072_v9 = vadd.f32 1e-05, %v4056_v28 }
 0x476   : > { %v7181_v42 = vpop.eup %7180  ;;  %v4128_v57 = vadd.f32 %v10079_v11, %v4112_v33  ;;  %v4098_v53 = vmul.f32 %v7179_v38, %v9823_v61  ;;  %v4071_v12 = vadd.f32 1e-05, %v4055_v49  ;;  %v4543_v26 = vpop.xlane.xlu1 %4542 }
 0x477   : > { %v4041_v40 = vpop.xlane.xlu0 %4040  ;;  %v4127_v47 = vadd.f32 %v10079_v11, %v4111_v41  ;;  %v4097_v2 = vmul.f32 %v7181_v42, %v10971_v43  ;;  %7190 = vrsqrt.f32 %v4072_v9  ;;  %v4574_v20 = vmul.f32 0.0078125, %v4543_v26 }
 0x478   : > { %4957 = vst [vmem:[%s9162_s19 + $0x330] sm:$0xff] %v4128_v57  ;;  %v4114_v52 = vmul.f32 %v10071_v14, %v4098_v53  ;;  %7192 = vrsqrt.f32 %v4071_v12  ;;  %v4057_v36 = vmul.f32 0.0078125, %v4041_v40 }
 0x479   : > { %v7183_v58 = vpop.eup %7182  ;;  %4956 = vst [vmem:[%s9162_s19 + $0x328] sm:$0xff] %v4127_v47  ;;  %v4113_v30 = vmul.f32 %v10071_v14, %v4097_v2  ;;  %v4590_v61 = vadd.f32 1e-05, %v4574_v20 }
 0x47a   : > { %v7185_v35 = vpop.eup %7184  ;;  %v4130_v8 = vadd.f32 %v10079_v11, %v4114_v52  ;;  %v4100_v16 = vmul.f32 %v7183_v58, %v9848_v18  ;;  %v4073_v44 = vadd.f32 1e-05, %v4057_v36  ;;  %v4547_v1 = vpop.xlane.xlu1 %4546 }
 0x47b   : > { %v4545_v45 = vpop.xlane.xlu0 %4544  ;;  %v4129_v39 = vadd.f32 %v10079_v11, %v4113_v30  ;;  %v4099_v4 = vmul.f32 %v7185_v35, %v9839_v29  ;;  %7194 = vrsqrt.f32 %v4590_v61  ;;  %v4576_v6 = vmul.f32 0.0078125, %v4547_v1 }
 0x47c   : > { %4959 = vst [vmem:[%s9162_s19 + $0x340] sm:$0xff] %v4130_v8  ;;  %v4116_v7 = vmul.f32 %v10071_v14, %v4100_v16  ;;  %7196 = vrsqrt.f32 %v4073_v44  ;;  %v4575_v32 = vmul.f32 0.0078125, %v4545_v45 }
 0x47d   : > { %v7187_v48 = vpop.eup %7186  ;;  %4958 = vst [vmem:[%s9162_s19 + $0x338] sm:$0xff] %v4129_v39  ;;  %v4115_v24 = vmul.f32 %v10071_v14, %v4099_v4  ;;  %v4592_v18 = vadd.f32 1e-05, %v4576_v6 }
 0x47e   : > { %v7189_v13 = vpop.eup %7188  ;;  %v4132_v51 = vadd.f32 %v10079_v11, %v4116_v7  ;;  %v4102_v56 = vmul.f32 %v7187_v48, %v9865_v63  ;;  %v4591_v29 = vadd.f32 1e-05, %v4575_v32  ;;  %v4551_v22 = vpop.xlane.xlu1 %4550 }
 0x47f   : > { %v4549_v25 = vpop.xlane.xlu0 %4548  ;;  %v4131_v28 = vadd.f32 %v10079_v11, %v4115_v24  ;;  %v4101_v33 = vmul.f32 %v7189_v13, %v9854_v62  ;;  %7198 = vrsqrt.f32 %v4592_v18  ;;  %v4578_v49 = vmul.f32 0.0078125, %v4551_v22 }
 0x480   : > { %4961 = vst [vmem:[%s9162_s19 + $0x350] sm:$0xff] %v4132_v51  ;;  %v4118_v38 = vmul.f32 %v10071_v14, %v4102_v56  ;;  %7200 = vrsqrt.f32 %v4591_v29  ;;  %v4577_v41 = vmul.f32 0.0078125, %v4549_v25 }
 0x481   : > { %v7191_v9 = vpop.eup %7190  ;;  %4960 = vst [vmem:[%s9162_s19 + $0x348] sm:$0xff] %v4131_v28  ;;  %v4117_v42 = vmul.f32 %v10071_v14, %v4101_v33  ;;  %v4594_v63 = vadd.f32 1e-05, %v4578_v49 }
 0x482   : > { %v7193_v57 = vpop.eup %7192  ;;  %v4134_v53 = vadd.f32 %v10079_v11, %v4118_v38  ;;  %v4104_v12 = vmul.f32 %v7191_v9, %v9877_v23  ;;  %v4593_v62 = vadd.f32 1e-05, %v4577_v41  ;;  %v4555_v26 = vpop.xlane.xlu1 %4554 }
 0x483   : > { %v4553_v40 = vpop.xlane.xlu0 %4552  ;;  %v4133_v47 = vadd.f32 %v10079_v11, %v4117_v42  ;;  %v4103_v43 = vmul.f32 %v7193_v57, %v9872_v17  ;;  %7202 = vrsqrt.f32 %v4594_v63  ;;  %v4580_v2 = vmul.f32 0.0078125, %v4555_v26 }
 0x484   : > { %4963 = vst [vmem:[%s9162_s19 + $0x360] sm:$0xff] %v4134_v53  ;;  %v4120_v20 = vmul.f32 %v10071_v14, %v4104_v12  ;;  %7204 = vrsqrt.f32 %v4593_v62  ;;  %v4579_v52 = vmul.f32 0.0078125, %v4553_v40 }
 0x485   : > { %v7195_v36 = vpop.eup %7194  ;;  %4962 = vst [vmem:[%s9162_s19 + $0x358] sm:$0xff] %v4133_v47  ;;  %v4119_v58 = vmul.f32 %v10071_v14, %v4103_v43  ;;  %v4596_v23 = vadd.f32 1e-05, %v4580_v2 }
 0x486   : > { %v7197_v30 = vpop.eup %7196  ;;  %v4136_v61 = vadd.f32 %v10079_v11, %v4120_v20  ;;  %v4622_v35 = vmul.f32 %v7195_v36, %v9898_v55  ;;  %v4595_v17 = vadd.f32 1e-05, %v4579_v52  ;;  %v4559_v8 = vpop.xlane.xlu1 %4558 }
 0x487   : > { %v4557_v16 = vpop.xlane.xlu0 %4556  ;;  %v4135_v44 = vadd.f32 %v10079_v11, %v4119_v58  ;;  %v4105_v1 = vmul.f32 %v7197_v30, %v9891_v46  ;;  %7206 = vrsqrt.f32 %v4596_v23  ;;  %v4582_v45 = vmul.f32 0.0078125, %v4559_v8 }
 0x488   : > { %4965 = vst [vmem:[%s9162_s19 + $0x370] sm:$0xff] %v4136_v61  ;;  %v4638_v39 = vmul.f32 %v10071_v14, %v4622_v35  ;;  %7208 = vrsqrt.f32 %v4595_v17  ;;  %v4581_v4 = vmul.f32 0.0078125, %v4557_v16 }
 0x489   : > { %v7199_v6 = vpop.eup %7198  ;;  %4964 = vst [vmem:[%s9162_s19 + $0x368] sm:$0xff] %v4135_v44  ;;  %v4121_v7 = vmul.f32 %v10071_v14, %v4105_v1  ;;  %v4598_v55 = vadd.f32 1e-05, %v4582_v45 }
 0x48a   : > { %v7201_v32 = vpop.eup %7200  ;;  %v4654_v48 = vadd.f32 %v10079_v11, %v4638_v39  ;;  %v4624_v24 = vmul.f32 %v7199_v6, %v9913_v10  ;;  %v4597_v46 = vadd.f32 1e-05, %v4581_v4  ;;  %v4563_v18 = vpop.xlane.xlu1 %4562 }
 0x48b   : > { %v4561_v13 = vpop.xlane.xlu0 %4560  ;;  %v4137_v51 = vadd.f32 %v10079_v11, %v4121_v7  ;;  %v4623_v56 = vmul.f32 %v7201_v32, %v9904_v37  ;;  %7210 = vrsqrt.f32 %v4598_v55  ;;  %v4584_v29 = vmul.f32 0.0078125, %v4563_v18  ;;  %v7249_v18 = vld [vmem:[%s10386_s5] ss:$0 sm:$0xff] }
 0x48c   : > { %4983 = vst [vmem:[%s9162_s19 + $0x380] sm:$0xff] %v4654_v48  ;;  %v4640_v22 = vmul.f32 %v10071_v14, %v4624_v24  ;;  %7212 = vrsqrt.f32 %v4597_v46  ;;  %v4583_v25 = vmul.f32 0.0078125, %v4561_v13 }
 0x48d   : > { %v7203_v28 = vpop.eup %7202  ;;  %4966 = vst [vmem:[%s9162_s19 + $0x378] sm:$0xff] %v4137_v51  ;;  %v4639_v33 = vmul.f32 %v10071_v14, %v4623_v56  ;;  %v4600_v10 = vadd.f32 1e-05, %v4584_v29 }
 0x48e   : > { %v7205_v49 = vpop.eup %7204  ;;  %v4656_v38 = vadd.f32 %v10079_v11, %v4640_v22  ;;  %v4626_v41 = vmul.f32 %v7203_v28, %v9925_v54  ;;  %v4599_v37 = vadd.f32 1e-05, %v4583_v25  ;;  %v4567_v9 = vpop.xlane.xlu1 %4566 }
 0x48f   : > { %v4565_v42 = vpop.xlane.xlu0 %4564  ;;  %v4655_v63 = vadd.f32 %v10079_v11, %v4639_v33  ;;  %v4625_v57 = vmul.f32 %v7205_v49, %v9920_v50  ;;  %7214 = vrsqrt.f32 %v4600_v10  ;;  %v4586_v53 = vmul.f32 0.0078125, %v4567_v9 }
 0x490   : > { %4985 = vst [vmem:[%s9162_s19 + $0x390] sm:$0xff] %v4656_v38  ;;  %v4642_v12 = vmul.f32 %v10071_v14, %v4626_v41  ;;  %7216 = vrsqrt.f32 %v4599_v37  ;;  %v4585_v62 = vmul.f32 0.0078125, %v4565_v42 }
 0x491   : > { %v7207_v26 = vpop.eup %7206  ;;  %4984 = vst [vmem:[%s9162_s19 + $0x388] sm:$0xff] %v4655_v63  ;;  %v4641_v40 = vmul.f32 %v10071_v14, %v4625_v57  ;;  %v4602_v54 = vadd.f32 1e-05, %v4586_v53 }
 0x492   : > { %v7209_v47 = vpop.eup %7208  ;;  %v4658_v43 = vadd.f32 %v10079_v11, %v4642_v12  ;;  %v4628_v2 = vmul.f32 %v7207_v26, %v9944_v5  ;;  %v4601_v50 = vadd.f32 1e-05, %v4585_v62  ;;  %v4571_v20 = vpop.xlane.xlu1 %4570 }
 0x493   : > { %v4569_v52 = vpop.xlane.xlu0 %4568  ;;  %v4657_v36 = vadd.f32 %v10079_v11, %v4641_v40  ;;  %v4627_v58 = vmul.f32 %v7209_v47, %v9938_v15  ;;  %7218 = vrsqrt.f32 %v4602_v54  ;;  %v4588_v23 = vmul.f32 0.0078125, %v4571_v20 }
 0x494   : > { %4987 = vst [vmem:[%s9162_s19 + $0x3a0] sm:$0xff] %v4658_v43  ;;  %v4644_v30 = vmul.f32 %v10071_v14, %v4628_v2  ;;  %7220 = vrsqrt.f32 %v4601_v50  ;;  %v4587_v61 = vmul.f32 0.0078125, %v4569_v52 }
 0x495   : > { %v7211_v35 = vpop.eup %7210  ;;  %4986 = vst [vmem:[%s9162_s19 + $0x398] sm:$0xff] %v4657_v36  ;;  %v4643_v5 = vmul.f32 %v10071_v14, %v4627_v58  ;;  %v4604_v17 = vadd.f32 1e-05, %v4588_v23 }
 0x496   : > { %v7213_v8 = vpop.eup %7212  ;;  %v4660_v16 = vadd.f32 %v10079_v11, %v4644_v30  ;;  %v4630_v44 = vmul.f32 %v7211_v35, %v9956_v27  ;;  %v4603_v15 = vadd.f32 1e-05, %v4587_v61 }
 0x497   : > { %v4573_v1 = vpop.xlane.xlu0 %4572  ;;  %v4659_v45 = vadd.f32 %v10079_v11, %v4643_v5  ;;  %v4629_v39 = vmul.f32 %v7213_v8, %v9949_v0  ;;  %7222 = vrsqrt.f32 %v4604_v17 }
 0x498   : > { %v4589_v4 = vmul.f32 0.0078125, %v4573_v1  ;;  %4989 = vst [vmem:[%s9162_s19 + $0x3b0] sm:$0xff] %v4660_v16  ;;  %v4646_v6 = vmul.f32 %v10071_v14, %v4630_v44  ;;  %7224 = vrsqrt.f32 %v4603_v15 }
 0x499   : > { %v7215_v7 = vpop.eup %7214  ;;  %4988 = vst [vmem:[%s9162_s19 + $0x3a8] sm:$0xff] %v4659_v45  ;;  %v4645_v55 = vmul.f32 %v10071_v14, %v4629_v39 }
 0x49a   : > { %v4605_v32 = vadd.f32 1e-05, %v4589_v4  ;;  %v7217_v27 = vpop.eup %7216  ;;  %v4662_v48 = vadd.f32 %v10079_v11, %v4646_v6  ;;  %v4632_v24 = vmul.f32 %v7215_v7, %v9970_v34  ;;  %v7250_v34 = vld [vmem:[%s10387_s6] ss:$0 sm:$0xff] }
 0x49b   : > { %v4661_v0 = vadd.f32 %v10079_v11, %v4645_v55  ;;  %v4631_v46 = vmul.f32 %v7217_v27, %v9963_v19 }
 0x49c   : > { %7226 = vrsqrt.f32 %v4605_v32  ;;  %4991 = vst [vmem:[%s9162_s19 + $0x3c0] sm:$0xff] %v4662_v48  ;;  %v4648_v13 = vmul.f32 %v7249_v18, %v4632_v24 }
 0x49d   : > { %v7219_v14 = vpop.eup %7218  ;;  %4990 = vst [vmem:[%s9162_s19 + $0x3b8] sm:$0xff] %v4661_v0  ;;  %v4647_v51 = vmul.f32 %v7249_v18, %v4631_v46 }
 0x49e   : > { %v7221_v56 = vpop.eup %7220  ;;  %v4664_v11 = vadd.f32 %v7250_v34, %v4648_v13  ;;  %v4634_v19 = vmul.f32 %v7219_v14, %v9986_v3 }
 0x49f   : > { %v4663_v29 = vadd.f32 %v7250_v34, %v4647_v51  ;;  %v4633_v22 = vmul.f32 %v7221_v56, %v9981_v59 }
 0x4a0   : > { %4993 = vst [vmem:[%s9162_s19 + $0x3d0] sm:$0xff] %v4664_v11  ;;  %v4650_v25 = vmul.f32 %v7249_v18, %v4634_v19 }
 0x4a1   : > { %v7223_v28 = vpop.eup %7222  ;;  %4992 = vst [vmem:[%s9162_s19 + $0x3c8] sm:$0xff] %v4663_v29  ;;  %v4649_v33 = vmul.f32 %v7249_v18, %v4633_v22 }
 0x4a2   : > { %v7225_v10 = vpop.eup %7224  ;;  %v4666_v49 = vadd.f32 %v7250_v34, %v4650_v25  ;;  %v4636_v38 = vmul.f32 %v7223_v28, %v10002_v31 }
 0x4a3   : > { %v4665_v41 = vadd.f32 %v7250_v34, %v4649_v33  ;;  %v4635_v3 = vmul.f32 %v7225_v10, %v9993_v60 }
 0x4a4   : > { %4995 = vst [vmem:[%s9162_s19 + $0x3e0] sm:$0xff] %v4666_v49  ;;  %v4652_v37 = vmul.f32 %v7249_v18, %v4636_v38 }
 0x4a5   : > { %4994 = vst [vmem:[%s9162_s19 + $0x3d8] sm:$0xff] %v4665_v41  ;;  %v4651_v9 = vmul.f32 %v7249_v18, %v4635_v3 }
 0x4a6   : > { %v7227_v59 = vpop.eup %7226  ;;  %v4668_v42 = vadd.f32 %v7250_v34, %v4652_v37 }
 0x4a7   : > { %v4637_v63 = vmul.f32 %v7227_v59, %v10013_v21  ;;  %v4667_v57 = vadd.f32 %v7250_v34, %v4651_v9 }
 0x4a8   : > { %4997 = vst [vmem:[%s9162_s19 + $0x3f0] sm:$0xff] %v4668_v42 }
 0x4a9   : > { %v4653_v53 = vmul.f32 %v7249_v18, %v4637_v63  ;;  %4996 = vst [vmem:[%s9162_s19 + $0x3e8] sm:$0xff] %v4667_v57 }
 0x4ab   : > { %v4669_v60 = vadd.f32 %v7250_v34, %v4653_v53 }
 0x4ad   : > { %4998 = vst [vmem:[%s9162_s19 + $0x3f8] sm:$0xff] %v4669_v60 }
 0x4ae   : > { %7264 = shalt.err (!%p7261_p3)
}
 0x4af   : > { %s7265_s20 = scalar_lea.hbm %s10333_s8, 16384  ;;  %s7269_s17 = scalar_lea.hbm %s10388_s7, 65536 }
 0x4b0   : > { %p7266_p4 = scmp.ne.s32.totalorder %s10333_s8, %s7265_s20  ;;  %p7270_p9 = scmp.lt.u32.totalorder %s10333_s8, %s10388_s7 }
 0x4b1   : > { %p7271_p10 = scmp.lt.u32.totalorder %s7269_s17, %s7265_s20  ;;  %p7273_p12 = scmp.lt.u32.totalorder %s7265_s20, %s10333_s8 }
 0x4b2   : > { %p7267_p7 = pnand %p7266_p4, %p7397_p5 }
 0x4b3   : > { %p7272_p11 = por %p7271_p10, %p7270_p9 }
 0x4b4   : > { %p7268_p8 = pneg %p7267_p7 }
 0x4b5   : > { %p7274_p13 = por %p7273_p12, %p7272_p11 }
 0x4b7   : > { %p7275_p0 = pnand %p7274_p13, %p7268_p8 }
 0x4b9   : > { %7278 = shalt.err (!%p7275_p0)
}
 0x4ba   : > { %s7317_s23 = smov 128   ;;  %s7318_s29 = smov 8  }
 0x4bb   : > { %6928 = dma.vmem_to_hbm [thread:$0]  (%p7397_p5), %s10335_s22, 16384, %s10333_s8, %s10340_s9, %s7317_s23, %s7317_s23, %s7318_s29  }
 0x4bc PF: > { %p6934_p1 = scmp.ge.s32.totalorder %s7313_s27, 2  ;;  %s4717_s28 = sand.u32 1, %s7301_s24  }
 0x4bd   : > { %s4718_s13 = scalar_lea.sflag [#allocation3], %s4717_s28 }
 0x4be   : > { %p6931_p2 = pnand %p6934_p1, %p7401_p6 }
 0x4c0   : > { %7296 = dma.done.wait (!%p6931_p2), %s4718_s13, 16384  }
 0x4c1   : > { %7298 = vsyncadd (!%p6931_p2), %s4718_s13, 4294950912  ;;  %p17_p3 = scmp.ge.s32.totalorder %s7384_s30, 6   ;;  %s10972_s24 = smov %s7305_s25 }
 0x4c2   : > { %s10973_s25 = smov %s7309_s26  ;;  %s10974_s26 = smov %s7395_s10 }
 0x4c3   : > { %s10975_s27 = smov %s7384_s30  ;;  %19 = sbr.rel (!%p17_p3) target bundleno = 3 (0x3), region = 97 }
 0x4ca   :  { %4723 = vsyncpa [#allocation3], 1 }
 0x4cb   :  { %4725 = vsyncpa [#allocation3 + $0x1], 1 }

</bundles_post_ra>
